<compile_context>
chip_gen: v6e
topology: v6e:2x2x1
jax: 0.10.0
libtpu: 0.0.40
codegen_flags: <defaults>
</compile_context>

<pallas_src>
import functools

import jax
import jax.numpy as jnp
from jax import lax
from jax.experimental import pallas as pl
from jax.experimental.pallas import tpu as pltpu

_PREC = lax.Precision.HIGHEST  # MXU is not binding at these sizes; keep accuracy


def _round_up(x, m):
    return -(-x // m) * m


def _kraus_channel_kernel(a_re_ref, a_im_ref, p_re_ref, p_im_ref,
                          o_re_ref, o_im_ref, *, nk, d):
    """One batch tile.

    Layouts:
      A stack : (nk, d, d)  f32 re/im (resident, constant across the grid)
      psi     : (d, tb)     f32 re/im, batch lane-dense
      out     : (d, d, tb)  f32 re/im, out[i, j, b], batch lane-dense
    """
    p_re = p_re_ref[...]                     # (d, tb)
    p_im = p_im_ref[...]

    for k in range(nk):                      # nk is small: fully unrolled
        a_re = a_re_ref[k]                   # (d, d)
        a_im = a_im_ref[k]

        # phi_k = A_k @ psi : plain 4-real-matmul complex product (d <= 128).
        rr = jnp.dot(a_re, p_re, preferred_element_type=jnp.float32, precision=_PREC)
        ii = jnp.dot(a_im, p_im, preferred_element_type=jnp.float32, precision=_PREC)
        ri = jnp.dot(a_re, p_im, preferred_element_type=jnp.float32, precision=_PREC)
        ir = jnp.dot(a_im, p_re, preferred_element_type=jnp.float32, precision=_PREC)
        phi_re = rr - ii                     # (d, tb)
        phi_im = ri + ir

        # out_k[i, j, b] = phi[i, b] * conj(phi[j, b])  (VPU outer product).
        # Row i of the density matrix per iteration; every store/accumulate is
        # a full (d, tb) slab into the output refs (no masked refold loop, no
        # large loop-carried accumulator values).
        # TODO(synk): for large qubit counts (d >> 128) switch the i-loop to a
        # fori_loop / tiled (i, j) grid instead of a fully unrolled Python loop.
        for i in range(d):
            row_re = phi_re[i:i + 1, :]      # (1, tb) -> sublane-broadcast in mul
            row_im = phi_im[i:i + 1, :]
            upd_re = row_re * phi_re + row_im * phi_im   # (d, tb)
            upd_im = row_im * phi_re - row_re * phi_im
            if k == 0:
                o_re_ref[i] = upd_re
                o_im_ref[i] = upd_im
            else:
                o_re_ref[i] += upd_re
                o_im_ref[i] += upd_im


def _embed_on_target(kraus_2x2, target, n_qubits):
    """I_{2^t} (x) K (x) I_{2^(n-t-1)} — pyqtorch qubit ordering (qubit 0 = MSB)."""
    left = jnp.eye(2 ** target, dtype=jnp.complex64)
    right = jnp.eye(2 ** (n_qubits - target - 1), dtype=jnp.complex64)
    return jnp.kron(jnp.kron(left, kraus_2x2.astype(jnp.complex64)), right)


def _pick_tiling(batch, d, nk):
    """Choose batch tile tb / grid size nb from a lane-padded VMEM estimate."""
    try:
        vmem_cap = int(pltpu.get_tpu_info().vmem_capacity_bytes)
    except Exception:
        vmem_cap = 64 * 1024 * 1024              # conservative (v7x per-TC)
    vmem_limit = min(vmem_cap * 3 // 4, 96 * 1024 * 1024)
    budget = vmem_limit // 2                     # headroom for temps / pipeline

    r8d = _round_up(d, 8)

    def est(tb):
        tbp = _round_up(tb, 128)                 # real lane-padded residency
        out_slab = d * r8d * tbp * 4             # one f32 output block
        psi_slab = r8d * tbp * 4
        a_bytes = 2 * 2 * nk * r8d * _round_up(d, 128) * 4
        # 2 parts x (2 double-buffered out blocks + ~2 temp slabs) + psi blocks
        return a_bytes + 2 * (2 + 2) * out_slab + 2 * 2 * psi_slab

    if batch <= 256:
        # single tile: block last dim equals the full batch dim (BlockSpec-legal)
        return batch, 1, batch, vmem_limit

    b_pad = _round_up(batch, 128)
    tb = 128
    while tb * 2 <= b_pad and est(tb * 2) <= budget:
        tb *= 2
    # keep >= 2 grid steps when possible so both v7x TensorCores get work
    if b_pad >= 2 * 128:
        tb = min(tb, max(128, (b_pad // 2) // 128 * 128))
    nb = -(-b_pad // tb)
    b_pad = nb * tb
    return tb, nb, b_pad, vmem_limit


def noise_forward(state, kraus_list, target):
    """Pallas equivalent of Noise.forward (state-vector input)."""
    n_qubits = state.ndim - 1
    batch = state.shape[-1]
    d = 2 ** n_qubits
    nk = len(kraus_list)

    # --- embed each 2x2 Kraus op into the full 2^n space (tiny, setup-time) ---
    # TODO(synk): for large n_qubits, apply the 2x2 Kraus to the target axis of
    # a reshaped psi instead of materializing dense 2^n x 2^n operators.
    a = jnp.stack([_embed_on_target(k, target, n_qubits) for k in kraus_list])
    a_re = jnp.real(a).astype(jnp.float32)       # (nk, d, d)
    a_im = jnp.imag(a).astype(jnp.float32)

    # --- psi as a (d, batch) matrix, batch lane-dense ---
    psi = state.reshape(d, batch)
    tb, nb, b_pad, vmem_limit = _pick_tiling(batch, d, nk)
    if b_pad != batch:
        psi = jnp.pad(psi, ((0, 0), (0, b_pad - batch)))
    p_re = jnp.real(psi).astype(jnp.float32)
    p_im = jnp.imag(psi).astype(jnp.float32)

    kernel = functools.partial(_kraus_channel_kernel, nk=nk, d=d)
    out_re, out_im = pl.pallas_call(
        kernel,
        out_shape=(jax.ShapeDtypeStruct((d, d, b_pad), jnp.float32),
                   jax.ShapeDtypeStruct((d, d, b_pad), jnp.float32)),
        grid_spec=pltpu.PrefetchScalarGridSpec(
            num_scalar_prefetch=0,
            grid=(nb,),
            in_specs=[pl.BlockSpec((nk, d, d), lambda t: (0, 0, 0)),
                      pl.BlockSpec((nk, d, d), lambda t: (0, 0, 0)),
                      pl.BlockSpec((d, tb), lambda t: (0, t)),
                      pl.BlockSpec((d, tb), lambda t: (0, t))],
            out_specs=[pl.BlockSpec((d, d, tb), lambda t: (0, 0, t)),
                       pl.BlockSpec((d, d, tb), lambda t: (0, 0, t))]),
        compiler_params=pltpu.CompilerParams(
            dimension_semantics=("parallel",),     # batch tiles -> megacore/2 TCs
            vmem_limit_bytes=vmem_limit),
    )(a_re, a_im, p_re, p_im)

    # kernel already produces the pyqtorch layout (i, j, batch): no transpose
    rho_out = (out_re + 1j * out_im).astype(jnp.complex64)
    return rho_out[:, :, :batch]


if __name__ == "__main__":
    n_qubits = 3
    batch = 4
    target = 1
    p = 0.1  # `probabilities` of the noise channel (deterministic parameter)

    # deterministic normalized complex state, shape (2,)*n + (batch,)
    key = jax.random.PRNGKey(0)
    k_re, k_im = jax.random.split(key)
    shape = (2,) * n_qubits + (batch,)
    re = jax.random.normal(k_re, shape, dtype=jnp.float32)
    im = jax.random.normal(k_im, shape, dtype=jnp.float32)
    state = (re + 1j * im).astype(jnp.complex64)
    norm = jnp.sqrt(jnp.sum(jnp.abs(state) ** 2,
                            axis=tuple(range(n_qubits)), keepdims=True))
    state = state / norm

    # Depolarizing-channel Kraus operators (the `kraus_i` buffers), built
    # deterministically in-script from the probability parameter p.
    I2 = jnp.eye(2, dtype=jnp.complex64)
    X = jnp.array([[0, 1], [1, 0]], dtype=jnp.complex64)
    Y = jnp.array([[0, -1j], [1j, 0]], dtype=jnp.complex64)
    Z = jnp.array([[1, 0], [0, -1]], dtype=jnp.complex64)
    kraus = [jnp.sqrt(jnp.float32(1 - p)) * I2,
             jnp.sqrt(jnp.float32(p / 3)) * X,
             jnp.sqrt(jnp.float32(p / 3)) * Y,
             jnp.sqrt(jnp.float32(p / 3)) * Z]

    rho_out = noise_forward(state, kraus, target)
    rho_out = jax.block_until_ready(rho_out)

    # pure-JAX reference: sum_k A_k rho A_k^dagger with rho = psi psi^dagger
    D = 2 ** n_qubits
    psi = state.reshape(D, batch)
    rho = jnp.einsum('ib,jb->ijb', psi, jnp.conj(psi))
    ref = jnp.zeros_like(rho)
    for K in kraus:
        A = _embed_on_target(K, target, n_qubits)
        ref = ref + jnp.einsum('ik,klb,jl->ijb', A, rho, jnp.conj(A),
                               precision=lax.Precision.HIGHEST)

    assert rho_out.shape == (D, D, batch)
    assert jnp.allclose(rho_out, ref, atol=1e-4, rtol=1e-4)
    # sanity: trace of each density matrix stays ~1 (trace-preserving channel)
    tr = jnp.einsum('iib->b', rho_out)
    assert jnp.allclose(tr, jnp.ones_like(tr), atol=1e-4)

    print("KERNEL_OK")
</pallas_src>

<mosaic_0001>
module attributes {stable_mosaic.version = 11 : i64} {
  func.func @_kraus_channel_kernel(%arg0: i32, %arg1: memref<4x8x8xf32, #tpu.memory_space<vmem>>, %arg2: memref<4x8x8xf32, #tpu.memory_space<vmem>>, %arg3: memref<8x4xf32, #tpu.memory_space<vmem>>, %arg4: memref<8x4xf32, #tpu.memory_space<vmem>>, %arg5: memref<8x8x4xf32, #tpu.memory_space<vmem>>, %arg6: memref<8x8x4xf32, #tpu.memory_space<vmem>>) attributes {dimension_semantics = [#tpu.dimension_semantics<parallel>], iteration_bounds = array<i64: 1>, scalar_prefetch = 0 : i64, scratch_operands = 0 : i64, tpu.core_type = #tpu.core_type<tc>, window_params = [{pipeline_mode = #tpu.pipeline_mode<synchronous>, transform_indices = @transform_0, window_bounds = array<i64: 4, 8, 8>}, {pipeline_mode = #tpu.pipeline_mode<synchronous>, transform_indices = @transform_1, window_bounds = array<i64: 4, 8, 8>}, {transform_indices = @transform_2, window_bounds = array<i64: 8, 4>}, {transform_indices = @transform_3, window_bounds = array<i64: 8, 4>}, {transform_indices = @transform_4, window_bounds = array<i64: 8, 8, 4>}, {transform_indices = @transform_5, window_bounds = array<i64: 8, 8, 4>}]} {
    %c0 = arith.constant 0 : index
    %c0_0 = arith.constant 0 : index
    %0 = vector.load %arg3[%c0, %c0_0] : memref<8x4xf32, #tpu.memory_space<vmem>>, vector<8x4xf32>
    %c0_1 = arith.constant 0 : index
    %c0_2 = arith.constant 0 : index
    %1 = vector.load %arg4[%c0_1, %c0_2] : memref<8x4xf32, #tpu.memory_space<vmem>>, vector<8x4xf32>
    %c0_3 = arith.constant 0 : index
    %c0_4 = arith.constant 0 : index
    %c0_5 = arith.constant 0 : index
    %2 = vector.load %arg1[%c0_3, %c0_4, %c0_5] : memref<4x8x8xf32, #tpu.memory_space<vmem>>, vector<1x8x8xf32>
    %3 = vector.shape_cast %2 : vector<1x8x8xf32> to vector<8x8xf32>
    %c0_6 = arith.constant 0 : index
    %c0_7 = arith.constant 0 : index
    %c0_8 = arith.constant 0 : index
    %4 = vector.load %arg2[%c0_6, %c0_7, %c0_8] : memref<4x8x8xf32, #tpu.memory_space<vmem>>, vector<1x8x8xf32>
    %5 = vector.shape_cast %4 : vector<1x8x8xf32> to vector<8x8xf32>
    %cst = arith.constant dense<0.000000e+00> : vector<8x4xf32>
    %6 = tpu.matmul %3, %0, %cst {dimension_numbers = #tpu.dot_dimension_numbers<[1], [0], [0], [1], [0, 0, 1, 1], [], []>, precision = #tpu.contract_precision<fp32>} : vector<8x8xf32>, vector<8x4xf32>, vector<8x4xf32> -> vector<8x4xf32>
    %cst_9 = arith.constant dense<0.000000e+00> : vector<8x4xf32>
    %7 = tpu.matmul %5, %1, %cst_9 {dimension_numbers = #tpu.dot_dimension_numbers<[1], [0], [0], [1], [0, 0, 1, 1], [], []>, precision = #tpu.contract_precision<fp32>} : vector<8x8xf32>, vector<8x4xf32>, vector<8x4xf32> -> vector<8x4xf32>
    %cst_10 = arith.constant dense<0.000000e+00> : vector<8x4xf32>
    %8 = tpu.matmul %3, %1, %cst_10 {dimension_numbers = #tpu.dot_dimension_numbers<[1], [0], [0], [1], [0, 0, 1, 1], [], []>, precision = #tpu.contract_precision<fp32>} : vector<8x8xf32>, vector<8x4xf32>, vector<8x4xf32> -> vector<8x4xf32>
    %cst_11 = arith.constant dense<0.000000e+00> : vector<8x4xf32>
    %9 = tpu.matmul %5, %0, %cst_11 {dimension_numbers = #tpu.dot_dimension_numbers<[1], [0], [0], [1], [0, 0, 1, 1], [], []>, precision = #tpu.contract_precision<fp32>} : vector<8x8xf32>, vector<8x4xf32>, vector<8x4xf32> -> vector<8x4xf32>
    %10 = arith.subf %6, %7 : vector<8x4xf32>
    %11 = arith.addf %8, %9 : vector<8x4xf32>
    %12 = vector.extract_strided_slice %10 {offsets = [0, 0], sizes = [1, 4], strides = [1, 1]} : vector<8x4xf32> to vector<1x4xf32>
    %13 = vector.extract_strided_slice %11 {offsets = [0, 0], sizes = [1, 4], strides = [1, 1]} : vector<8x4xf32> to vector<1x4xf32>
    %14 = vector.broadcast %12 : vector<1x4xf32> to vector<8x4xf32>
    %15 = arith.mulf %14, %10 : vector<8x4xf32>
    %16 = vector.broadcast %13 : vector<1x4xf32> to vector<8x4xf32>
    %17 = arith.mulf %16, %11 : vector<8x4xf32>
    %18 = arith.addf %15, %17 : vector<8x4xf32>
    %19 = vector.broadcast %13 : vector<1x4xf32> to vector<8x4xf32>
    %20 = arith.mulf %19, %10 : vector<8x4xf32>
    %21 = vector.broadcast %12 : vector<1x4xf32> to vector<8x4xf32>
    %22 = arith.mulf %21, %11 : vector<8x4xf32>
    %23 = arith.subf %20, %22 : vector<8x4xf32>
    %c0_12 = arith.constant 0 : index
    %c0_13 = arith.constant 0 : index
    %c0_14 = arith.constant 0 : index
    %24 = vector.load %arg5[%c0_12, %c0_13, %c0_14] : memref<8x8x4xf32, #tpu.memory_space<vmem>>, vector<1x8x4xf32>
    %25 = vector.shape_cast %24 : vector<1x8x4xf32> to vector<8x4xf32>
    %26 = vector.shape_cast %18 : vector<8x4xf32> to vector<1x8x4xf32>
    tpu.vector_store %arg5[%c0_12, %c0_13, %c0_14], %26 {strides = array<i32>} : memref<8x8x4xf32, #tpu.memory_space<vmem>>, vector<1x8x4xf32>,
    %c0_15 = arith.constant 0 : index
    %c0_16 = arith.constant 0 : index
    %c0_17 = arith.constant 0 : index
    %27 = vector.load %arg6[%c0_15, %c0_16, %c0_17] : memref<8x8x4xf32, #tpu.memory_space<vmem>>, vector<1x8x4xf32>
    %28 = vector.shape_cast %27 : vector<1x8x4xf32> to vector<8x4xf32>
    %29 = vector.shape_cast %23 : vector<8x4xf32> to vector<1x8x4xf32>
    tpu.vector_store %arg6[%c0_15, %c0_16, %c0_17], %29 {strides = array<i32>} : memref<8x8x4xf32, #tpu.memory_space<vmem>>, vector<1x8x4xf32>,
    %30 = vector.extract_strided_slice %10 {offsets = [1, 0], sizes = [1, 4], strides = [1, 1]} : vector<8x4xf32> to vector<1x4xf32>
    %31 = vector.extract_strided_slice %11 {offsets = [1, 0], sizes = [1, 4], strides = [1, 1]} : vector<8x4xf32> to vector<1x4xf32>
    %32 = vector.broadcast %30 : vector<1x4xf32> to vector<8x4xf32>
    %33 = arith.mulf %32, %10 : vector<8x4xf32>
    %34 = vector.broadcast %31 : vector<1x4xf32> to vector<8x4xf32>
    %35 = arith.mulf %34, %11 : vector<8x4xf32>
    %36 = arith.addf %33, %35 : vector<8x4xf32>
    %37 = vector.broadcast %31 : vector<1x4xf32> to vector<8x4xf32>
    %38 = arith.mulf %37, %10 : vector<8x4xf32>
    %39 = vector.broadcast %30 : vector<1x4xf32> to vector<8x4xf32>
    %40 = arith.mulf %39, %11 : vector<8x4xf32>
    %41 = arith.subf %38, %40 : vector<8x4xf32>
    %c1 = arith.constant 1 : index
    %c0_18 = arith.constant 0 : index
    %c0_19 = arith.constant 0 : index
    %42 = vector.load %arg5[%c1, %c0_18, %c0_19] : memref<8x8x4xf32, #tpu.memory_space<vmem>>, vector<1x8x4xf32>
    %43 = vector.shape_cast %42 : vector<1x8x4xf32> to vector<8x4xf32>
    %44 = vector.shape_cast %36 : vector<8x4xf32> to vector<1x8x4xf32>
    tpu.vector_store %arg5[%c1, %c0_18, %c0_19], %44 {strides = array<i32>} : memref<8x8x4xf32, #tpu.memory_space<vmem>>, vector<1x8x4xf32>,
    %c1_20 = arith.constant 1 : index
    %c0_21 = arith.constant 0 : index
    %c0_22 = arith.constant 0 : index
    %45 = vector.load %arg6[%c1_20, %c0_21, %c0_22] : memref<8x8x4xf32, #tpu.memory_space<vmem>>, vector<1x8x4xf32>
    %46 = vector.shape_cast %45 : vector<1x8x4xf32> to vector<8x4xf32>
    %47 = vector.shape_cast %41 : vector<8x4xf32> to vector<1x8x4xf32>
    tpu.vector_store %arg6[%c1_20, %c0_21, %c0_22], %47 {strides = array<i32>} : memref<8x8x4xf32, #tpu.memory_space<vmem>>, vector<1x8x4xf32>,
    %48 = vector.extract_strided_slice %10 {offsets = [2, 0], sizes = [1, 4], strides = [1, 1]} : vector<8x4xf32> to vector<1x4xf32>
    %49 = vector.extract_strided_slice %11 {offsets = [2, 0], sizes = [1, 4], strides = [1, 1]} : vector<8x4xf32> to vector<1x4xf32>
    %50 = vector.broadcast %48 : vector<1x4xf32> to vector<8x4xf32>
    %51 = arith.mulf %50, %10 : vector<8x4xf32>
    %52 = vector.broadcast %49 : vector<1x4xf32> to vector<8x4xf32>
    %53 = arith.mulf %52, %11 : vector<8x4xf32>
    %54 = arith.addf %51, %53 : vector<8x4xf32>
    %55 = vector.broadcast %49 : vector<1x4xf32> to vector<8x4xf32>
    %56 = arith.mulf %55, %10 : vector<8x4xf32>
    %57 = vector.broadcast %48 : vector<1x4xf32> to vector<8x4xf32>
    %58 = arith.mulf %57, %11 : vector<8x4xf32>
    %59 = arith.subf %56, %58 : vector<8x4xf32>
    %c2 = arith.constant 2 : index
    %c0_23 = arith.constant 0 : index
    %c0_24 = arith.constant 0 : index
    %60 = vector.load %arg5[%c2, %c0_23, %c0_24] : memref<8x8x4xf32, #tpu.memory_space<vmem>>, vector<1x8x4xf32>
    %61 = vector.shape_cast %60 : vector<1x8x4xf32> to vector<8x4xf32>
    %62 = vector.shape_cast %54 : vector<8x4xf32> to vector<1x8x4xf32>
    tpu.vector_store %arg5[%c2, %c0_23, %c0_24], %62 {strides = array<i32>} : memref<8x8x4xf32, #tpu.memory_space<vmem>>, vector<1x8x4xf32>,
    %c2_25 = arith.constant 2 : index
    %c0_26 = arith.constant 0 : index
    %c0_27 = arith.constant 0 : index
    %63 = vector.load %arg6[%c2_25, %c0_26, %c0_27] : memref<8x8x4xf32, #tpu.memory_space<vmem>>, vector<1x8x4xf32>
    %64 = vector.shape_cast %63 : vector<1x8x4xf32> to vector<8x4xf32>
    %65 = vector.shape_cast %59 : vector<8x4xf32> to vector<1x8x4xf32>
    tpu.vector_store %arg6[%c2_25, %c0_26, %c0_27], %65 {strides = array<i32>} : memref<8x8x4xf32, #tpu.memory_space<vmem>>, vector<1x8x4xf32>,
    %66 = vector.extract_strided_slice %10 {offsets = [3, 0], sizes = [1, 4], strides = [1, 1]} : vector<8x4xf32> to vector<1x4xf32>
    %67 = vector.extract_strided_slice %11 {offsets = [3, 0], sizes = [1, 4], strides = [1, 1]} : vector<8x4xf32> to vector<1x4xf32>
    %68 = vector.broadcast %66 : vector<1x4xf32> to vector<8x4xf32>
    %69 = arith.mulf %68, %10 : vector<8x4xf32>
    %70 = vector.broadcast %67 : vector<1x4xf32> to vector<8x4xf32>
    %71 = arith.mulf %70, %11 : vector<8x4xf32>
    %72 = arith.addf %69, %71 : vector<8x4xf32>
    %73 = vector.broadcast %67 : vector<1x4xf32> to vector<8x4xf32>
    %74 = arith.mulf %73, %10 : vector<8x4xf32>
    %75 = vector.broadcast %66 : vector<1x4xf32> to vector<8x4xf32>
    %76 = arith.mulf %75, %11 : vector<8x4xf32>
    %77 = arith.subf %74, %76 : vector<8x4xf32>
    %c3 = arith.constant 3 : index
    %c0_28 = arith.constant 0 : index
    %c0_29 = arith.constant 0 : index
    %78 = vector.load %arg5[%c3, %c0_28, %c0_29] : memref<8x8x4xf32, #tpu.memory_space<vmem>>, vector<1x8x4xf32>
    %79 = vector.shape_cast %78 : vector<1x8x4xf32> to vector<8x4xf32>
    %80 = vector.shape_cast %72 : vector<8x4xf32> to vector<1x8x4xf32>
    tpu.vector_store %arg5[%c3, %c0_28, %c0_29], %80 {strides = array<i32>} : memref<8x8x4xf32, #tpu.memory_space<vmem>>, vector<1x8x4xf32>,
    %c3_30 = arith.constant 3 : index
    %c0_31 = arith.constant 0 : index
    %c0_32 = arith.constant 0 : index
    %81 = vector.load %arg6[%c3_30, %c0_31, %c0_32] : memref<8x8x4xf32, #tpu.memory_space<vmem>>, vector<1x8x4xf32>
    %82 = vector.shape_cast %81 : vector<1x8x4xf32> to vector<8x4xf32>
    %83 = vector.shape_cast %77 : vector<8x4xf32> to vector<1x8x4xf32>
    tpu.vector_store %arg6[%c3_30, %c0_31, %c0_32], %83 {strides = array<i32>} : memref<8x8x4xf32, #tpu.memory_space<vmem>>, vector<1x8x4xf32>,
    %84 = vector.extract_strided_slice %10 {offsets = [4, 0], sizes = [1, 4], strides = [1, 1]} : vector<8x4xf32> to vector<1x4xf32>
    %85 = vector.extract_strided_slice %11 {offsets = [4, 0], sizes = [1, 4], strides = [1, 1]} : vector<8x4xf32> to vector<1x4xf32>
    %86 = vector.broadcast %84 : vector<1x4xf32> to vector<8x4xf32>
    %87 = arith.mulf %86, %10 : vector<8x4xf32>
    %88 = vector.broadcast %85 : vector<1x4xf32> to vector<8x4xf32>
    %89 = arith.mulf %88, %11 : vector<8x4xf32>
    %90 = arith.addf %87, %89 : vector<8x4xf32>
    %91 = vector.broadcast %85 : vector<1x4xf32> to vector<8x4xf32>
    %92 = arith.mulf %91, %10 : vector<8x4xf32>
    %93 = vector.broadcast %84 : vector<1x4xf32> to vector<8x4xf32>
    %94 = arith.mulf %93, %11 : vector<8x4xf32>
    %95 = arith.subf %92, %94 : vector<8x4xf32>
    %c4 = arith.constant 4 : index
    %c0_33 = arith.constant 0 : index
    %c0_34 = arith.constant 0 : index
    %96 = vector.load %arg5[%c4, %c0_33, %c0_34] : memref<8x8x4xf32, #tpu.memory_space<vmem>>, vector<1x8x4xf32>
    %97 = vector.shape_cast %96 : vector<1x8x4xf32> to vector<8x4xf32>
    %98 = vector.shape_cast %90 : vector<8x4xf32> to vector<1x8x4xf32>
    tpu.vector_store %arg5[%c4, %c0_33, %c0_34], %98 {strides = array<i32>} : memref<8x8x4xf32, #tpu.memory_space<vmem>>, vector<1x8x4xf32>,
    %c4_35 = arith.constant 4 : index
    %c0_36 = arith.constant 0 : index
    %c0_37 = arith.constant 0 : index
    %99 = vector.load %arg6[%c4_35, %c0_36, %c0_37] : memref<8x8x4xf32, #tpu.memory_space<vmem>>, vector<1x8x4xf32>
    %100 = vector.shape_cast %99 : vector<1x8x4xf32> to vector<8x4xf32>
    %101 = vector.shape_cast %95 : vector<8x4xf32> to vector<1x8x4xf32>
    tpu.vector_store %arg6[%c4_35, %c0_36, %c0_37], %101 {strides = array<i32>} : memref<8x8x4xf32, #tpu.memory_space<vmem>>, vector<1x8x4xf32>,
    %102 = vector.extract_strided_slice %10 {offsets = [5, 0], sizes = [1, 4], strides = [1, 1]} : vector<8x4xf32> to vector<1x4xf32>
    %103 = vector.extract_strided_slice %11 {offsets = [5, 0], sizes = [1, 4], strides = [1, 1]} : vector<8x4xf32> to vector<1x4xf32>
    %104 = vector.broadcast %102 : vector<1x4xf32> to vector<8x4xf32>
    %105 = arith.mulf %104, %10 : vector<8x4xf32>
    %106 = vector.broadcast %103 : vector<1x4xf32> to vector<8x4xf32>
    %107 = arith.mulf %106, %11 : vector<8x4xf32>
    %108 = arith.addf %105, %107 : vector<8x4xf32>
    %109 = vector.broadcast %103 : vector<1x4xf32> to vector<8x4xf32>
    %110 = arith.mulf %109, %10 : vector<8x4xf32>
    %111 = vector.broadcast %102 : vector<1x4xf32> to vector<8x4xf32>
    %112 = arith.mulf %111, %11 : vector<8x4xf32>
    %113 = arith.subf %110, %112 : vector<8x4xf32>
    %c5 = arith.constant 5 : index
    %c0_38 = arith.constant 0 : index
    %c0_39 = arith.constant 0 : index
    %114 = vector.load %arg5[%c5, %c0_38, %c0_39] : memref<8x8x4xf32, #tpu.memory_space<vmem>>, vector<1x8x4xf32>
    %115 = vector.shape_cast %114 : vector<1x8x4xf32> to vector<8x4xf32>
    %116 = vector.shape_cast %108 : vector<8x4xf32> to vector<1x8x4xf32>
    tpu.vector_store %arg5[%c5, %c0_38, %c0_39], %116 {strides = array<i32>} : memref<8x8x4xf32, #tpu.memory_space<vmem>>, vector<1x8x4xf32>,
    %c5_40 = arith.constant 5 : index
    %c0_41 = arith.constant 0 : index
    %c0_42 = arith.constant 0 : index
    %117 = vector.load %arg6[%c5_40, %c0_41, %c0_42] : memref<8x8x4xf32, #tpu.memory_space<vmem>>, vector<1x8x4xf32>
    %118 = vector.shape_cast %117 : vector<1x8x4xf32> to vector<8x4xf32>
    %119 = vector.shape_cast %113 : vector<8x4xf32> to vector<1x8x4xf32>
    tpu.vector_store %arg6[%c5_40, %c0_41, %c0_42], %119 {strides = array<i32>} : memref<8x8x4xf32, #tpu.memory_space<vmem>>, vector<1x8x4xf32>,
    %120 = vector.extract_strided_slice %10 {offsets = [6, 0], sizes = [1, 4], strides = [1, 1]} : vector<8x4xf32> to vector<1x4xf32>
    %121 = vector.extract_strided_slice %11 {offsets = [6, 0], sizes = [1, 4], strides = [1, 1]} : vector<8x4xf32> to vector<1x4xf32>
    %122 = vector.broadcast %120 : vector<1x4xf32> to vector<8x4xf32>
    %123 = arith.mulf %122, %10 : vector<8x4xf32>
    %124 = vector.broadcast %121 : vector<1x4xf32> to vector<8x4xf32>
    %125 = arith.mulf %124, %11 : vector<8x4xf32>
    %126 = arith.addf %123, %125 : vector<8x4xf32>
    %127 = vector.broadcast %121 : vector<1x4xf32> to vector<8x4xf32>
    %128 = arith.mulf %127, %10 : vector<8x4xf32>
    %129 = vector.broadcast %120 : vector<1x4xf32> to vector<8x4xf32>
    %130 = arith.mulf %129, %11 : vector<8x4xf32>
    %131 = arith.subf %128, %130 : vector<8x4xf32>
    %c6 = arith.constant 6 : index
    %c0_43 = arith.constant 0 : index
    %c0_44 = arith.constant 0 : index
    %132 = vector.load %arg5[%c6, %c0_43, %c0_44] : memref<8x8x4xf32, #tpu.memory_space<vmem>>, vector<1x8x4xf32>
    %133 = vector.shape_cast %132 : vector<1x8x4xf32> to vector<8x4xf32>
    %134 = vector.shape_cast %126 : vector<8x4xf32> to vector<1x8x4xf32>
    tpu.vector_store %arg5[%c6, %c0_43, %c0_44], %134 {strides = array<i32>} : memref<8x8x4xf32, #tpu.memory_space<vmem>>, vector<1x8x4xf32>,
    %c6_45 = arith.constant 6 : index
    %c0_46 = arith.constant 0 : index
    %c0_47 = arith.constant 0 : index
    %135 = vector.load %arg6[%c6_45, %c0_46, %c0_47] : memref<8x8x4xf32, #tpu.memory_space<vmem>>, vector<1x8x4xf32>
    %136 = vector.shape_cast %135 : vector<1x8x4xf32> to vector<8x4xf32>
    %137 = vector.shape_cast %131 : vector<8x4xf32> to vector<1x8x4xf32>
    tpu.vector_store %arg6[%c6_45, %c0_46, %c0_47], %137 {strides = array<i32>} : memref<8x8x4xf32, #tpu.memory_space<vmem>>, vector<1x8x4xf32>,
    %138 = vector.extract_strided_slice %10 {offsets = [7, 0], sizes = [1, 4], strides = [1, 1]} : vector<8x4xf32> to vector<1x4xf32>
    %139 = vector.extract_strided_slice %11 {offsets = [7, 0], sizes = [1, 4], strides = [1, 1]} : vector<8x4xf32> to vector<1x4xf32>
    %140 = vector.broadcast %138 : vector<1x4xf32> to vector<8x4xf32>
    %141 = arith.mulf %140, %10 : vector<8x4xf32>
    %142 = vector.broadcast %139 : vector<1x4xf32> to vector<8x4xf32>
    %143 = arith.mulf %142, %11 : vector<8x4xf32>
    %144 = arith.addf %141, %143 : vector<8x4xf32>
    %145 = vector.broadcast %139 : vector<1x4xf32> to vector<8x4xf32>
    %146 = arith.mulf %145, %10 : vector<8x4xf32>
    %147 = vector.broadcast %138 : vector<1x4xf32> to vector<8x4xf32>
    %148 = arith.mulf %147, %11 : vector<8x4xf32>
    %149 = arith.subf %146, %148 : vector<8x4xf32>
    %c7 = arith.constant 7 : index
    %c0_48 = arith.constant 0 : index
    %c0_49 = arith.constant 0 : index
    %150 = vector.load %arg5[%c7, %c0_48, %c0_49] : memref<8x8x4xf32, #tpu.memory_space<vmem>>, vector<1x8x4xf32>
    %151 = vector.shape_cast %150 : vector<1x8x4xf32> to vector<8x4xf32>
    %152 = vector.shape_cast %144 : vector<8x4xf32> to vector<1x8x4xf32>
    tpu.vector_store %arg5[%c7, %c0_48, %c0_49], %152 {strides = array<i32>} : memref<8x8x4xf32, #tpu.memory_space<vmem>>, vector<1x8x4xf32>,
    %c7_50 = arith.constant 7 : index
    %c0_51 = arith.constant 0 : index
    %c0_52 = arith.constant 0 : index
    %153 = vector.load %arg6[%c7_50, %c0_51, %c0_52] : memref<8x8x4xf32, #tpu.memory_space<vmem>>, vector<1x8x4xf32>
    %154 = vector.shape_cast %153 : vector<1x8x4xf32> to vector<8x4xf32>
    %155 = vector.shape_cast %149 : vector<8x4xf32> to vector<1x8x4xf32>
    tpu.vector_store %arg6[%c7_50, %c0_51, %c0_52], %155 {strides = array<i32>} : memref<8x8x4xf32, #tpu.memory_space<vmem>>, vector<1x8x4xf32>,
    %c1_53 = arith.constant 1 : index
    %c0_54 = arith.constant 0 : index
    %c0_55 = arith.constant 0 : index
    %156 = vector.load %arg1[%c1_53, %c0_54, %c0_55] : memref<4x8x8xf32, #tpu.memory_space<vmem>>, vector<1x8x8xf32>
    %157 = vector.shape_cast %156 : vector<1x8x8xf32> to vector<8x8xf32>
    %c1_56 = arith.constant 1 : index
    %c0_57 = arith.constant 0 : index
    %c0_58 = arith.constant 0 : index
    %158 = vector.load %arg2[%c1_56, %c0_57, %c0_58] : memref<4x8x8xf32, #tpu.memory_space<vmem>>, vector<1x8x8xf32>
    %159 = vector.shape_cast %158 : vector<1x8x8xf32> to vector<8x8xf32>
    %cst_59 = arith.constant dense<0.000000e+00> : vector<8x4xf32>
    %160 = tpu.matmul %157, %0, %cst_59 {dimension_numbers = #tpu.dot_dimension_numbers<[1], [0], [0], [1], [0, 0, 1, 1], [], []>, precision = #tpu.contract_precision<fp32>} : vector<8x8xf32>, vector<8x4xf32>, vector<8x4xf32> -> vector<8x4xf32>
    %cst_60 = arith.constant dense<0.000000e+00> : vector<8x4xf32>
    %161 = tpu.matmul %159, %1, %cst_60 {dimension_numbers = #tpu.dot_dimension_numbers<[1], [0], [0], [1], [0, 0, 1, 1], [], []>, precision = #tpu.contract_precision<fp32>} : vector<8x8xf32>, vector<8x4xf32>, vector<8x4xf32> -> vector<8x4xf32>
    %cst_61 = arith.constant dense<0.000000e+00> : vector<8x4xf32>
    %162 = tpu.matmul %157, %1, %cst_61 {dimension_numbers = #tpu.dot_dimension_numbers<[1], [0], [0], [1], [0, 0, 1, 1], [], []>, precision = #tpu.contract_precision<fp32>} : vector<8x8xf32>, vector<8x4xf32>, vector<8x4xf32> -> vector<8x4xf32>
    %cst_62 = arith.constant dense<0.000000e+00> : vector<8x4xf32>
    %163 = tpu.matmul %159, %0, %cst_62 {dimension_numbers = #tpu.dot_dimension_numbers<[1], [0], [0], [1], [0, 0, 1, 1], [], []>, precision = #tpu.contract_precision<fp32>} : vector<8x8xf32>, vector<8x4xf32>, vector<8x4xf32> -> vector<8x4xf32>
    %164 = arith.subf %160, %161 : vector<8x4xf32>
    %165 = arith.addf %162, %163 : vector<8x4xf32>
    %166 = vector.extract_strided_slice %164 {offsets = [0, 0], sizes = [1, 4], strides = [1, 1]} : vector<8x4xf32> to vector<1x4xf32>
    %167 = vector.extract_strided_slice %165 {offsets = [0, 0], sizes = [1, 4], strides = [1, 1]} : vector<8x4xf32> to vector<1x4xf32>
    %168 = vector.broadcast %166 : vector<1x4xf32> to vector<8x4xf32>
    %169 = arith.mulf %168, %164 : vector<8x4xf32>
    %170 = vector.broadcast %167 : vector<1x4xf32> to vector<8x4xf32>
    %171 = arith.mulf %170, %165 : vector<8x4xf32>
    %172 = arith.addf %169, %171 : vector<8x4xf32>
    %173 = vector.broadcast %167 : vector<1x4xf32> to vector<8x4xf32>
    %174 = arith.mulf %173, %164 : vector<8x4xf32>
    %175 = vector.broadcast %166 : vector<1x4xf32> to vector<8x4xf32>
    %176 = arith.mulf %175, %165 : vector<8x4xf32>
    %177 = arith.subf %174, %176 : vector<8x4xf32>
    %c0_63 = arith.constant 0 : index
    %c0_64 = arith.constant 0 : index
    %c0_65 = arith.constant 0 : index
    %178 = vector.load %arg5[%c0_63, %c0_64, %c0_65] : memref<8x8x4xf32, #tpu.memory_space<vmem>>, vector<1x8x4xf32>
    %179 = vector.shape_cast %178 : vector<1x8x4xf32> to vector<8x4xf32>
    %180 = arith.addf %179, %172 : vector<8x4xf32>
    %c0_66 = arith.constant 0 : index
    %c0_67 = arith.constant 0 : index
    %c0_68 = arith.constant 0 : index
    %181 = vector.load %arg5[%c0_66, %c0_67, %c0_68] : memref<8x8x4xf32, #tpu.memory_space<vmem>>, vector<1x8x4xf32>
    %182 = vector.shape_cast %181 : vector<1x8x4xf32> to vector<8x4xf32>
    %183 = vector.shape_cast %180 : vector<8x4xf32> to vector<1x8x4xf32>
    tpu.vector_store %arg5[%c0_66, %c0_67, %c0_68], %183 {strides = array<i32>} : memref<8x8x4xf32, #tpu.memory_space<vmem>>, vector<1x8x4xf32>,
    %c0_69 = arith.constant 0 : index
    %c0_70 = arith.constant 0 : index
    %c0_71 = arith.constant 0 : index
    %184 = vector.load %arg6[%c0_69, %c0_70, %c0_71] : memref<8x8x4xf32, #tpu.memory_space<vmem>>, vector<1x8x4xf32>
    %185 = vector.shape_cast %184 : vector<1x8x4xf32> to vector<8x4xf32>
    %186 = arith.addf %185, %177 : vector<8x4xf32>
    %c0_72 = arith.constant 0 : index
    %c0_73 = arith.constant 0 : index
    %c0_74 = arith.constant 0 : index
    %187 = vector.load %arg6[%c0_72, %c0_73, %c0_74] : memref<8x8x4xf32, #tpu.memory_space<vmem>>, vector<1x8x4xf32>
    %188 = vector.shape_cast %187 : vector<1x8x4xf32> to vector<8x4xf32>
    %189 = vector.shape_cast %186 : vector<8x4xf32> to vector<1x8x4xf32>
    tpu.vector_store %arg6[%c0_72, %c0_73, %c0_74], %189 {strides = array<i32>} : memref<8x8x4xf32, #tpu.memory_space<vmem>>, vector<1x8x4xf32>,
    %190 = vector.extract_strided_slice %164 {offsets = [1, 0], sizes = [1, 4], strides = [1, 1]} : vector<8x4xf32> to vector<1x4xf32>
    %191 = vector.extract_strided_slice %165 {offsets = [1, 0], sizes = [1, 4], strides = [1, 1]} : vector<8x4xf32> to vector<1x4xf32>
    %192 = vector.broadcast %190 : vector<1x4xf32> to vector<8x4xf32>
    %193 = arith.mulf %192, %164 : vector<8x4xf32>
    %194 = vector.broadcast %191 : vector<1x4xf32> to vector<8x4xf32>
    %195 = arith.mulf %194, %165 : vector<8x4xf32>
    %196 = arith.addf %193, %195 : vector<8x4xf32>
    %197 = vector.broadcast %191 : vector<1x4xf32> to vector<8x4xf32>
    %198 = arith.mulf %197, %164 : vector<8x4xf32>
    %199 = vector.broadcast %190 : vector<1x4xf32> to vector<8x4xf32>
    %200 = arith.mulf %199, %165 : vector<8x4xf32>
    %201 = arith.subf %198, %200 : vector<8x4xf32>
    %c1_75 = arith.constant 1 : index
    %c0_76 = arith.constant 0 : index
    %c0_77 = arith.constant 0 : index
    %202 = vector.load %arg5[%c1_75, %c0_76, %c0_77] : memref<8x8x4xf32, #tpu.memory_space<vmem>>, vector<1x8x4xf32>
    %203 = vector.shape_cast %202 : vector<1x8x4xf32> to vector<8x4xf32>
    %204 = arith.addf %203, %196 : vector<8x4xf32>
    %c1_78 = arith.constant 1 : index
    %c0_79 = arith.constant 0 : index
    %c0_80 = arith.constant 0 : index
    %205 = vector.load %arg5[%c1_78, %c0_79, %c0_80] : memref<8x8x4xf32, #tpu.memory_space<vmem>>, vector<1x8x4xf32>
    %206 = vector.shape_cast %205 : vector<1x8x4xf32> to vector<8x4xf32>
    %207 = vector.shape_cast %204 : vector<8x4xf32> to vector<1x8x4xf32>
    tpu.vector_store %arg5[%c1_78, %c0_79, %c0_80], %207 {strides = array<i32>} : memref<8x8x4xf32, #tpu.memory_space<vmem>>, vector<1x8x4xf32>,
    %c1_81 = arith.constant 1 : index
    %c0_82 = arith.constant 0 : index
    %c0_83 = arith.constant 0 : index
    %208 = vector.load %arg6[%c1_81, %c0_82, %c0_83] : memref<8x8x4xf32, #tpu.memory_space<vmem>>, vector<1x8x4xf32>
    %209 = vector.shape_cast %208 : vector<1x8x4xf32> to vector<8x4xf32>
    %210 = arith.addf %209, %201 : vector<8x4xf32>
    %c1_84 = arith.constant 1 : index
    %c0_85 = arith.constant 0 : index
    %c0_86 = arith.constant 0 : index
    %211 = vector.load %arg6[%c1_84, %c0_85, %c0_86] : memref<8x8x4xf32, #tpu.memory_space<vmem>>, vector<1x8x4xf32>
    %212 = vector.shape_cast %211 : vector<1x8x4xf32> to vector<8x4xf32>
    %213 = vector.shape_cast %210 : vector<8x4xf32> to vector<1x8x4xf32>
    tpu.vector_store %arg6[%c1_84, %c0_85, %c0_86], %213 {strides = array<i32>} : memref<8x8x4xf32, #tpu.memory_space<vmem>>, vector<1x8x4xf32>,
    %214 = vector.extract_strided_slice %164 {offsets = [2, 0], sizes = [1, 4], strides = [1, 1]} : vector<8x4xf32> to vector<1x4xf32>
    %215 = vector.extract_strided_slice %165 {offsets = [2, 0], sizes = [1, 4], strides = [1, 1]} : vector<8x4xf32> to vector<1x4xf32>
    %216 = vector.broadcast %214 : vector<1x4xf32> to vector<8x4xf32>
    %217 = arith.mulf %216, %164 : vector<8x4xf32>
    %218 = vector.broadcast %215 : vector<1x4xf32> to vector<8x4xf32>
    %219 = arith.mulf %218, %165 : vector<8x4xf32>
    %220 = arith.addf %217, %219 : vector<8x4xf32>
    %221 = vector.broadcast %215 : vector<1x4xf32> to vector<8x4xf32>
    %222 = arith.mulf %221, %164 : vector<8x4xf32>
    %223 = vector.broadcast %214 : vector<1x4xf32> to vector<8x4xf32>
    %224 = arith.mulf %223, %165 : vector<8x4xf32>
    %225 = arith.subf %222, %224 : vector<8x4xf32>
    %c2_87 = arith.constant 2 : index
    %c0_88 = arith.constant 0 : index
    %c0_89 = arith.constant 0 : index
    %226 = vector.load %arg5[%c2_87, %c0_88, %c0_89] : memref<8x8x4xf32, #tpu.memory_space<vmem>>, vector<1x8x4xf32>
    %227 = vector.shape_cast %226 : vector<1x8x4xf32> to vector<8x4xf32>
    %228 = arith.addf %227, %220 : vector<8x4xf32>
    %c2_90 = arith.constant 2 : index
    %c0_91 = arith.constant 0 : index
    %c0_92 = arith.constant 0 : index
    %229 = vector.load %arg5[%c2_90, %c0_91, %c0_92] : memref<8x8x4xf32, #tpu.memory_space<vmem>>, vector<1x8x4xf32>
    %230 = vector.shape_cast %229 : vector<1x8x4xf32> to vector<8x4xf32>
    %231 = vector.shape_cast %228 : vector<8x4xf32> to vector<1x8x4xf32>
    tpu.vector_store %arg5[%c2_90, %c0_91, %c0_92], %231 {strides = array<i32>} : memref<8x8x4xf32, #tpu.memory_space<vmem>>, vector<1x8x4xf32>,
    %c2_93 = arith.constant 2 : index
    %c0_94 = arith.constant 0 : index
    %c0_95 = arith.constant 0 : index
    %232 = vector.load %arg6[%c2_93, %c0_94, %c0_95] : memref<8x8x4xf32, #tpu.memory_space<vmem>>, vector<1x8x4xf32>
    %233 = vector.shape_cast %232 : vector<1x8x4xf32> to vector<8x4xf32>
    %234 = arith.addf %233, %225 : vector<8x4xf32>
    %c2_96 = arith.constant 2 : index
    %c0_97 = arith.constant 0 : index
    %c0_98 = arith.constant 0 : index
    %235 = vector.load %arg6[%c2_96, %c0_97, %c0_98] : memref<8x8x4xf32, #tpu.memory_space<vmem>>, vector<1x8x4xf32>
    %236 = vector.shape_cast %235 : vector<1x8x4xf32> to vector<8x4xf32>
    %237 = vector.shape_cast %234 : vector<8x4xf32> to vector<1x8x4xf32>
    tpu.vector_store %arg6[%c2_96, %c0_97, %c0_98], %237 {strides = array<i32>} : memref<8x8x4xf32, #tpu.memory_space<vmem>>, vector<1x8x4xf32>,
    %238 = vector.extract_strided_slice %164 {offsets = [3, 0], sizes = [1, 4], strides = [1, 1]} : vector<8x4xf32> to vector<1x4xf32>
    %239 = vector.extract_strided_slice %165 {offsets = [3, 0], sizes = [1, 4], strides = [1, 1]} : vector<8x4xf32> to vector<1x4xf32>
    %240 = vector.broadcast %238 : vector<1x4xf32> to vector<8x4xf32>
    %241 = arith.mulf %240, %164 : vector<8x4xf32>
    %242 = vector.broadcast %239 : vector<1x4xf32> to vector<8x4xf32>
    %243 = arith.mulf %242, %165 : vector<8x4xf32>
    %244 = arith.addf %241, %243 : vector<8x4xf32>
    %245 = vector.broadcast %239 : vector<1x4xf32> to vector<8x4xf32>
    %246 = arith.mulf %245, %164 : vector<8x4xf32>
    %247 = vector.broadcast %238 : vector<1x4xf32> to vector<8x4xf32>
    %248 = arith.mulf %247, %165 : vector<8x4xf32>
    %249 = arith.subf %246, %248 : vector<8x4xf32>
    %c3_99 = arith.constant 3 : index
    %c0_100 = arith.constant 0 : index
    %c0_101 = arith.constant 0 : index
    %250 = vector.load %arg5[%c3_99, %c0_100, %c0_101] : memref<8x8x4xf32, #tpu.memory_space<vmem>>, vector<1x8x4xf32>
    %251 = vector.shape_cast %250 : vector<1x8x4xf32> to vector<8x4xf32>
    %252 = arith.addf %251, %244 : vector<8x4xf32>
    %c3_102 = arith.constant 3 : index
    %c0_103 = arith.constant 0 : index
    %c0_104 = arith.constant 0 : index
    %253 = vector.load %arg5[%c3_102, %c0_103, %c0_104] : memref<8x8x4xf32, #tpu.memory_space<vmem>>, vector<1x8x4xf32>
    %254 = vector.shape_cast %253 : vector<1x8x4xf32> to vector<8x4xf32>
    %255 = vector.shape_cast %252 : vector<8x4xf32> to vector<1x8x4xf32>
    tpu.vector_store %arg5[%c3_102, %c0_103, %c0_104], %255 {strides = array<i32>} : memref<8x8x4xf32, #tpu.memory_space<vmem>>, vector<1x8x4xf32>,
    %c3_105 = arith.constant 3 : index
    %c0_106 = arith.constant 0 : index
    %c0_107 = arith.constant 0 : index
    %256 = vector.load %arg6[%c3_105, %c0_106, %c0_107] : memref<8x8x4xf32, #tpu.memory_space<vmem>>, vector<1x8x4xf32>
    %257 = vector.shape_cast %256 : vector<1x8x4xf32> to vector<8x4xf32>
    %258 = arith.addf %257, %249 : vector<8x4xf32>
    %c3_108 = arith.constant 3 : index
    %c0_109 = arith.constant 0 : index
    %c0_110 = arith.constant 0 : index
    %259 = vector.load %arg6[%c3_108, %c0_109, %c0_110] : memref<8x8x4xf32, #tpu.memory_space<vmem>>, vector<1x8x4xf32>
    %260 = vector.shape_cast %259 : vector<1x8x4xf32> to vector<8x4xf32>
    %261 = vector.shape_cast %258 : vector<8x4xf32> to vector<1x8x4xf32>
    tpu.vector_store %arg6[%c3_108, %c0_109, %c0_110], %261 {strides = array<i32>} : memref<8x8x4xf32, #tpu.memory_space<vmem>>, vector<1x8x4xf32>,
    %262 = vector.extract_strided_slice %164 {offsets = [4, 0], sizes = [1, 4], strides = [1, 1]} : vector<8x4xf32> to vector<1x4xf32>
    %263 = vector.extract_strided_slice %165 {offsets = [4, 0], sizes = [1, 4], strides = [1, 1]} : vector<8x4xf32> to vector<1x4xf32>
    %264 = vector.broadcast %262 : vector<1x4xf32> to vector<8x4xf32>
    %265 = arith.mulf %264, %164 : vector<8x4xf32>
    %266 = vector.broadcast %263 : vector<1x4xf32> to vector<8x4xf32>
    %267 = arith.mulf %266, %165 : vector<8x4xf32>
    %268 = arith.addf %265, %267 : vector<8x4xf32>
    %269 = vector.broadcast %263 : vector<1x4xf32> to vector<8x4xf32>
    %270 = arith.mulf %269, %164 : vector<8x4xf32>
    %271 = vector.broadcast %262 : vector<1x4xf32> to vector<8x4xf32>
    %272 = arith.mulf %271, %165 : vector<8x4xf32>
    %273 = arith.subf %270, %272 : vector<8x4xf32>
    %c4_111 = arith.constant 4 : index
    %c0_112 = arith.constant 0 : index
    %c0_113 = arith.constant 0 : index
    %274 = vector.load %arg5[%c4_111, %c0_112, %c0_113] : memref<8x8x4xf32, #tpu.memory_space<vmem>>, vector<1x8x4xf32>
    %275 = vector.shape_cast %274 : vector<1x8x4xf32> to vector<8x4xf32>
    %276 = arith.addf %275, %268 : vector<8x4xf32>
    %c4_114 = arith.constant 4 : index
    %c0_115 = arith.constant 0 : index
    %c0_116 = arith.constant 0 : index
    %277 = vector.load %arg5[%c4_114, %c0_115, %c0_116] : memref<8x8x4xf32, #tpu.memory_space<vmem>>, vector<1x8x4xf32>
    %278 = vector.shape_cast %277 : vector<1x8x4xf32> to vector<8x4xf32>
    %279 = vector.shape_cast %276 : vector<8x4xf32> to vector<1x8x4xf32>
    tpu.vector_store %arg5[%c4_114, %c0_115, %c0_116], %279 {strides = array<i32>} : memref<8x8x4xf32, #tpu.memory_space<vmem>>, vector<1x8x4xf32>,
    %c4_117 = arith.constant 4 : index
    %c0_118 = arith.constant 0 : index
    %c0_119 = arith.constant 0 : index
    %280 = vector.load %arg6[%c4_117, %c0_118, %c0_119] : memref<8x8x4xf32, #tpu.memory_space<vmem>>, vector<1x8x4xf32>
    %281 = vector.shape_cast %280 : vector<1x8x4xf32> to vector<8x4xf32>
    %282 = arith.addf %281, %273 : vector<8x4xf32>
    %c4_120 = arith.constant 4 : index
    %c0_121 = arith.constant 0 : index
    %c0_122 = arith.constant 0 : index
    %283 = vector.load %arg6[%c4_120, %c0_121, %c0_122] : memref<8x8x4xf32, #tpu.memory_space<vmem>>, vector<1x8x4xf32>
    %284 = vector.shape_cast %283 : vector<1x8x4xf32> to vector<8x4xf32>
    %285 = vector.shape_cast %282 : vector<8x4xf32> to vector<1x8x4xf32>
    tpu.vector_store %arg6[%c4_120, %c0_121, %c0_122], %285 {strides = array<i32>} : memref<8x8x4xf32, #tpu.memory_space<vmem>>, vector<1x8x4xf32>,
    %286 = vector.extract_strided_slice %164 {offsets = [5, 0], sizes = [1, 4], strides = [1, 1]} : vector<8x4xf32> to vector<1x4xf32>
    %287 = vector.extract_strided_slice %165 {offsets = [5, 0], sizes = [1, 4], strides = [1, 1]} : vector<8x4xf32> to vector<1x4xf32>
    %288 = vector.broadcast %286 : vector<1x4xf32> to vector<8x4xf32>
    %289 = arith.mulf %288, %164 : vector<8x4xf32>
    %290 = vector.broadcast %287 : vector<1x4xf32> to vector<8x4xf32>
    %291 = arith.mulf %290, %165 : vector<8x4xf32>
    %292 = arith.addf %289, %291 : vector<8x4xf32>
    %293 = vector.broadcast %287 : vector<1x4xf32> to vector<8x4xf32>
    %294 = arith.mulf %293, %164 : vector<8x4xf32>
    %295 = vector.broadcast %286 : vector<1x4xf32> to vector<8x4xf32>
    %296 = arith.mulf %295, %165 : vector<8x4xf32>
    %297 = arith.subf %294, %296 : vector<8x4xf32>
    %c5_123 = arith.constant 5 : index
    %c0_124 = arith.constant 0 : index
    %c0_125 = arith.constant 0 : index
    %298 = vector.load %arg5[%c5_123, %c0_124, %c0_125] : memref<8x8x4xf32, #tpu.memory_space<vmem>>, vector<1x8x4xf32>
    %299 = vector.shape_cast %298 : vector<1x8x4xf32> to vector<8x4xf32>
    %300 = arith.addf %299, %292 : vector<8x4xf32>
    %c5_126 = arith.constant 5 : index
    %c0_127 = arith.constant 0 : index
    %c0_128 = arith.constant 0 : index
    %301 = vector.load %arg5[%c5_126, %c0_127, %c0_128] : memref<8x8x4xf32, #tpu.memory_space<vmem>>, vector<1x8x4xf32>
    %302 = vector.shape_cast %301 : vector<1x8x4xf32> to vector<8x4xf32>
    %303 = vector.shape_cast %300 : vector<8x4xf32> to vector<1x8x4xf32>
    tpu.vector_store %arg5[%c5_126, %c0_127, %c0_128], %303 {strides = array<i32>} : memref<8x8x4xf32, #tpu.memory_space<vmem>>, vector<1x8x4xf32>,
    %c5_129 = arith.constant 5 : index
    %c0_130 = arith.constant 0 : index
    %c0_131 = arith.constant 0 : index
    %304 = vector.load %arg6[%c5_129, %c0_130, %c0_131] : memref<8x8x4xf32, #tpu.memory_space<vmem>>, vector<1x8x4xf32>
    %305 = vector.shape_cast %304 : vector<1x8x4xf32> to vector<8x4xf32>
    %306 = arith.addf %305, %297 : vector<8x4xf32>
    %c5_132 = arith.constant 5 : index
    %c0_133 = arith.constant 0 : index
    %c0_134 = arith.constant 0 : index
    %307 = vector.load %arg6[%c5_132, %c0_133, %c0_134] : memref<8x8x4xf32, #tpu.memory_space<vmem>>, vector<1x8x4xf32>
    %308 = vector.shape_cast %307 : vector<1x8x4xf32> to vector<8x4xf32>
    %309 = vector.shape_cast %306 : vector<8x4xf32> to vector<1x8x4xf32>
    tpu.vector_store %arg6[%c5_132, %c0_133, %c0_134], %309 {strides = array<i32>} : memref<8x8x4xf32, #tpu.memory_space<vmem>>, vector<1x8x4xf32>,
    %310 = vector.extract_strided_slice %164 {offsets = [6, 0], sizes = [1, 4], strides = [1, 1]} : vector<8x4xf32> to vector<1x4xf32>
    %311 = vector.extract_strided_slice %165 {offsets = [6, 0], sizes = [1, 4], strides = [1, 1]} : vector<8x4xf32> to vector<1x4xf32>
    %312 = vector.broadcast %310 : vector<1x4xf32> to vector<8x4xf32>
    %313 = arith.mulf %312, %164 : vector<8x4xf32>
    %314 = vector.broadcast %311 : vector<1x4xf32> to vector<8x4xf32>
    %315 = arith.mulf %314, %165 : vector<8x4xf32>
    %316 = arith.addf %313, %315 : vector<8x4xf32>
    %317 = vector.broadcast %311 : vector<1x4xf32> to vector<8x4xf32>
    %318 = arith.mulf %317, %164 : vector<8x4xf32>
    %319 = vector.broadcast %310 : vector<1x4xf32> to vector<8x4xf32>
    %320 = arith.mulf %319, %165 : vector<8x4xf32>
    %321 = arith.subf %318, %320 : vector<8x4xf32>
    %c6_135 = arith.constant 6 : index
    %c0_136 = arith.constant 0 : index
    %c0_137 = arith.constant 0 : index
    %322 = vector.load %arg5[%c6_135, %c0_136, %c0_137] : memref<8x8x4xf32, #tpu.memory_space<vmem>>, vector<1x8x4xf32>
    %323 = vector.shape_cast %322 : vector<1x8x4xf32> to vector<8x4xf32>
    %324 = arith.addf %323, %316 : vector<8x4xf32>
    %c6_138 = arith.constant 6 : index
    %c0_139 = arith.constant 0 : index
    %c0_140 = arith.constant 0 : index
    %325 = vector.load %arg5[%c6_138, %c0_139, %c0_140] : memref<8x8x4xf32, #tpu.memory_space<vmem>>, vector<1x8x4xf32>
    %326 = vector.shape_cast %325 : vector<1x8x4xf32> to vector<8x4xf32>
    %327 = vector.shape_cast %324 : vector<8x4xf32> to vector<1x8x4xf32>
    tpu.vector_store %arg5[%c6_138, %c0_139, %c0_140], %327 {strides = array<i32>} : memref<8x8x4xf32, #tpu.memory_space<vmem>>, vector<1x8x4xf32>,
    %c6_141 = arith.constant 6 : index
    %c0_142 = arith.constant 0 : index
    %c0_143 = arith.constant 0 : index
    %328 = vector.load %arg6[%c6_141, %c0_142, %c0_143] : memref<8x8x4xf32, #tpu.memory_space<vmem>>, vector<1x8x4xf32>
    %329 = vector.shape_cast %328 : vector<1x8x4xf32> to vector<8x4xf32>
    %330 = arith.addf %329, %321 : vector<8x4xf32>
    %c6_144 = arith.constant 6 : index
    %c0_145 = arith.constant 0 : index
    %c0_146 = arith.constant 0 : index
    %331 = vector.load %arg6[%c6_144, %c0_145, %c0_146] : memref<8x8x4xf32, #tpu.memory_space<vmem>>, vector<1x8x4xf32>
    %332 = vector.shape_cast %331 : vector<1x8x4xf32> to vector<8x4xf32>
    %333 = vector.shape_cast %330 : vector<8x4xf32> to vector<1x8x4xf32>
    tpu.vector_store %arg6[%c6_144, %c0_145, %c0_146], %333 {strides = array<i32>} : memref<8x8x4xf32, #tpu.memory_space<vmem>>, vector<1x8x4xf32>,
    %334 = vector.extract_strided_slice %164 {offsets = [7, 0], sizes = [1, 4], strides = [1, 1]} : vector<8x4xf32> to vector<1x4xf32>
    %335 = vector.extract_strided_slice %165 {offsets = [7, 0], sizes = [1, 4], strides = [1, 1]} : vector<8x4xf32> to vector<1x4xf32>
    %336 = vector.broadcast %334 : vector<1x4xf32> to vector<8x4xf32>
    %337 = arith.mulf %336, %164 : vector<8x4xf32>
    %338 = vector.broadcast %335 : vector<1x4xf32> to vector<8x4xf32>
    %339 = arith.mulf %338, %165 : vector<8x4xf32>
    %340 = arith.addf %337, %339 : vector<8x4xf32>
    %341 = vector.broadcast %335 : vector<1x4xf32> to vector<8x4xf32>
    %342 = arith.mulf %341, %164 : vector<8x4xf32>
    %343 = vector.broadcast %334 : vector<1x4xf32> to vector<8x4xf32>
    %344 = arith.mulf %343, %165 : vector<8x4xf32>
    %345 = arith.subf %342, %344 : vector<8x4xf32>
    %c7_147 = arith.constant 7 : index
    %c0_148 = arith.constant 0 : index
    %c0_149 = arith.constant 0 : index
    %346 = vector.load %arg5[%c7_147, %c0_148, %c0_149] : memref<8x8x4xf32, #tpu.memory_space<vmem>>, vector<1x8x4xf32>
    %347 = vector.shape_cast %346 : vector<1x8x4xf32> to vector<8x4xf32>
    %348 = arith.addf %347, %340 : vector<8x4xf32>
    %c7_150 = arith.constant 7 : index
    %c0_151 = arith.constant 0 : index
    %c0_152 = arith.constant 0 : index
    %349 = vector.load %arg5[%c7_150, %c0_151, %c0_152] : memref<8x8x4xf32, #tpu.memory_space<vmem>>, vector<1x8x4xf32>
    %350 = vector.shape_cast %349 : vector<1x8x4xf32> to vector<8x4xf32>
    %351 = vector.shape_cast %348 : vector<8x4xf32> to vector<1x8x4xf32>
    tpu.vector_store %arg5[%c7_150, %c0_151, %c0_152], %351 {strides = array<i32>} : memref<8x8x4xf32, #tpu.memory_space<vmem>>, vector<1x8x4xf32>,
    %c7_153 = arith.constant 7 : index
    %c0_154 = arith.constant 0 : index
    %c0_155 = arith.constant 0 : index
    %352 = vector.load %arg6[%c7_153, %c0_154, %c0_155] : memref<8x8x4xf32, #tpu.memory_space<vmem>>, vector<1x8x4xf32>
    %353 = vector.shape_cast %352 : vector<1x8x4xf32> to vector<8x4xf32>
    %354 = arith.addf %353, %345 : vector<8x4xf32>
    %c7_156 = arith.constant 7 : index
    %c0_157 = arith.constant 0 : index
    %c0_158 = arith.constant 0 : index
    %355 = vector.load %arg6[%c7_156, %c0_157, %c0_158] : memref<8x8x4xf32, #tpu.memory_space<vmem>>, vector<1x8x4xf32>
    %356 = vector.shape_cast %355 : vector<1x8x4xf32> to vector<8x4xf32>
    %357 = vector.shape_cast %354 : vector<8x4xf32> to vector<1x8x4xf32>
    tpu.vector_store %arg6[%c7_156, %c0_157, %c0_158], %357 {strides = array<i32>} : memref<8x8x4xf32, #tpu.memory_space<vmem>>, vector<1x8x4xf32>,
    %c2_159 = arith.constant 2 : index
    %c0_160 = arith.constant 0 : index
    %c0_161 = arith.constant 0 : index
    %358 = vector.load %arg1[%c2_159, %c0_160, %c0_161] : memref<4x8x8xf32, #tpu.memory_space<vmem>>, vector<1x8x8xf32>
    %359 = vector.shape_cast %358 : vector<1x8x8xf32> to vector<8x8xf32>
    %c2_162 = arith.constant 2 : index
    %c0_163 = arith.constant 0 : index
    %c0_164 = arith.constant 0 : index
    %360 = vector.load %arg2[%c2_162, %c0_163, %c0_164] : memref<4x8x8xf32, #tpu.memory_space<vmem>>, vector<1x8x8xf32>
    %361 = vector.shape_cast %360 : vector<1x8x8xf32> to vector<8x8xf32>
    %cst_165 = arith.constant dense<0.000000e+00> : vector<8x4xf32>
    %362 = tpu.matmul %359, %0, %cst_165 {dimension_numbers = #tpu.dot_dimension_numbers<[1], [0], [0], [1], [0, 0, 1, 1], [], []>, precision = #tpu.contract_precision<fp32>} : vector<8x8xf32>, vector<8x4xf32>, vector<8x4xf32> -> vector<8x4xf32>
    %cst_166 = arith.constant dense<0.000000e+00> : vector<8x4xf32>
    %363 = tpu.matmul %361, %1, %cst_166 {dimension_numbers = #tpu.dot_dimension_numbers<[1], [0], [0], [1], [0, 0, 1, 1], [], []>, precision = #tpu.contract_precision<fp32>} : vector<8x8xf32>, vector<8x4xf32>, vector<8x4xf32> -> vector<8x4xf32>
    %cst_167 = arith.constant dense<0.000000e+00> : vector<8x4xf32>
    %364 = tpu.matmul %359, %1, %cst_167 {dimension_numbers = #tpu.dot_dimension_numbers<[1], [0], [0], [1], [0, 0, 1, 1], [], []>, precision = #tpu.contract_precision<fp32>} : vector<8x8xf32>, vector<8x4xf32>, vector<8x4xf32> -> vector<8x4xf32>
    %cst_168 = arith.constant dense<0.000000e+00> : vector<8x4xf32>
    %365 = tpu.matmul %361, %0, %cst_168 {dimension_numbers = #tpu.dot_dimension_numbers<[1], [0], [0], [1], [0, 0, 1, 1], [], []>, precision = #tpu.contract_precision<fp32>} : vector<8x8xf32>, vector<8x4xf32>, vector<8x4xf32> -> vector<8x4xf32>
    %366 = arith.subf %362, %363 : vector<8x4xf32>
    %367 = arith.addf %364, %365 : vector<8x4xf32>
    %368 = vector.extract_strided_slice %366 {offsets = [0, 0], sizes = [1, 4], strides = [1, 1]} : vector<8x4xf32> to vector<1x4xf32>
    %369 = vector.extract_strided_slice %367 {offsets = [0, 0], sizes = [1, 4], strides = [1, 1]} : vector<8x4xf32> to vector<1x4xf32>
    %370 = vector.broadcast %368 : vector<1x4xf32> to vector<8x4xf32>
    %371 = arith.mulf %370, %366 : vector<8x4xf32>
    %372 = vector.broadcast %369 : vector<1x4xf32> to vector<8x4xf32>
    %373 = arith.mulf %372, %367 : vector<8x4xf32>
    %374 = arith.addf %371, %373 : vector<8x4xf32>
    %375 = vector.broadcast %369 : vector<1x4xf32> to vector<8x4xf32>
    %376 = arith.mulf %375, %366 : vector<8x4xf32>
    %377 = vector.broadcast %368 : vector<1x4xf32> to vector<8x4xf32>
    %378 = arith.mulf %377, %367 : vector<8x4xf32>
    %379 = arith.subf %376, %378 : vector<8x4xf32>
    %c0_169 = arith.constant 0 : index
    %c0_170 = arith.constant 0 : index
    %c0_171 = arith.constant 0 : index
    %380 = vector.load %arg5[%c0_169, %c0_170, %c0_171] : memref<8x8x4xf32, #tpu.memory_space<vmem>>, vector<1x8x4xf32>
    %381 = vector.shape_cast %380 : vector<1x8x4xf32> to vector<8x4xf32>
    %382 = arith.addf %381, %374 : vector<8x4xf32>
    %c0_172 = arith.constant 0 : index
    %c0_173 = arith.constant 0 : index
    %c0_174 = arith.constant 0 : index
    %383 = vector.load %arg5[%c0_172, %c0_173, %c0_174] : memref<8x8x4xf32, #tpu.memory_space<vmem>>, vector<1x8x4xf32>
    %384 = vector.shape_cast %383 : vector<1x8x4xf32> to vector<8x4xf32>
    %385 = vector.shape_cast %382 : vector<8x4xf32> to vector<1x8x4xf32>
    tpu.vector_store %arg5[%c0_172, %c0_173, %c0_174], %385 {strides = array<i32>} : memref<8x8x4xf32, #tpu.memory_space<vmem>>, vector<1x8x4xf32>,
    %c0_175 = arith.constant 0 : index
    %c0_176 = arith.constant 0 : index
    %c0_177 = arith.constant 0 : index
    %386 = vector.load %arg6[%c0_175, %c0_176, %c0_177] : memref<8x8x4xf32, #tpu.memory_space<vmem>>, vector<1x8x4xf32>
    %387 = vector.shape_cast %386 : vector<1x8x4xf32> to vector<8x4xf32>
    %388 = arith.addf %387, %379 : vector<8x4xf32>
    %c0_178 = arith.constant 0 : index
    %c0_179 = arith.constant 0 : index
    %c0_180 = arith.constant 0 : index
    %389 = vector.load %arg6[%c0_178, %c0_179, %c0_180] : memref<8x8x4xf32, #tpu.memory_space<vmem>>, vector<1x8x4xf32>
    %390 = vector.shape_cast %389 : vector<1x8x4xf32> to vector<8x4xf32>
    %391 = vector.shape_cast %388 : vector<8x4xf32> to vector<1x8x4xf32>
    tpu.vector_store %arg6[%c0_178, %c0_179, %c0_180], %391 {strides = array<i32>} : memref<8x8x4xf32, #tpu.memory_space<vmem>>, vector<1x8x4xf32>,
    %392 = vector.extract_strided_slice %366 {offsets = [1, 0], sizes = [1, 4], strides = [1, 1]} : vector<8x4xf32> to vector<1x4xf32>
    %393 = vector.extract_strided_slice %367 {offsets = [1, 0], sizes = [1, 4], strides = [1, 1]} : vector<8x4xf32> to vector<1x4xf32>
    %394 = vector.broadcast %392 : vector<1x4xf32> to vector<8x4xf32>
    %395 = arith.mulf %394, %366 : vector<8x4xf32>
    %396 = vector.broadcast %393 : vector<1x4xf32> to vector<8x4xf32>
    %397 = arith.mulf %396, %367 : vector<8x4xf32>
    %398 = arith.addf %395, %397 : vector<8x4xf32>
    %399 = vector.broadcast %393 : vector<1x4xf32> to vector<8x4xf32>
    %400 = arith.mulf %399, %366 : vector<8x4xf32>
    %401 = vector.broadcast %392 : vector<1x4xf32> to vector<8x4xf32>
    %402 = arith.mulf %401, %367 : vector<8x4xf32>
    %403 = arith.subf %400, %402 : vector<8x4xf32>
    %c1_181 = arith.constant 1 : index
    %c0_182 = arith.constant 0 : index
    %c0_183 = arith.constant 0 : index
    %404 = vector.load %arg5[%c1_181, %c0_182, %c0_183] : memref<8x8x4xf32, #tpu.memory_space<vmem>>, vector<1x8x4xf32>
    %405 = vector.shape_cast %404 : vector<1x8x4xf32> to vector<8x4xf32>
    %406 = arith.addf %405, %398 : vector<8x4xf32>
    %c1_184 = arith.constant 1 : index
    %c0_185 = arith.constant 0 : index
    %c0_186 = arith.constant 0 : index
    %407 = vector.load %arg5[%c1_184, %c0_185, %c0_186] : memref<8x8x4xf32, #tpu.memory_space<vmem>>, vector<1x8x4xf32>
    %408 = vector.shape_cast %407 : vector<1x8x4xf32> to vector<8x4xf32>
    %409 = vector.shape_cast %406 : vector<8x4xf32> to vector<1x8x4xf32>
    tpu.vector_store %arg5[%c1_184, %c0_185, %c0_186], %409 {strides = array<i32>} : memref<8x8x4xf32, #tpu.memory_space<vmem>>, vector<1x8x4xf32>,
    %c1_187 = arith.constant 1 : index
    %c0_188 = arith.constant 0 : index
    %c0_189 = arith.constant 0 : index
    %410 = vector.load %arg6[%c1_187, %c0_188, %c0_189] : memref<8x8x4xf32, #tpu.memory_space<vmem>>, vector<1x8x4xf32>
    %411 = vector.shape_cast %410 : vector<1x8x4xf32> to vector<8x4xf32>
    %412 = arith.addf %411, %403 : vector<8x4xf32>
    %c1_190 = arith.constant 1 : index
    %c0_191 = arith.constant 0 : index
    %c0_192 = arith.constant 0 : index
    %413 = vector.load %arg6[%c1_190, %c0_191, %c0_192] : memref<8x8x4xf32, #tpu.memory_space<vmem>>, vector<1x8x4xf32>
    %414 = vector.shape_cast %413 : vector<1x8x4xf32> to vector<8x4xf32>
    %415 = vector.shape_cast %412 : vector<8x4xf32> to vector<1x8x4xf32>
    tpu.vector_store %arg6[%c1_190, %c0_191, %c0_192], %415 {strides = array<i32>} : memref<8x8x4xf32, #tpu.memory_space<vmem>>, vector<1x8x4xf32>,
    %416 = vector.extract_strided_slice %366 {offsets = [2, 0], sizes = [1, 4], strides = [1, 1]} : vector<8x4xf32> to vector<1x4xf32>
    %417 = vector.extract_strided_slice %367 {offsets = [2, 0], sizes = [1, 4], strides = [1, 1]} : vector<8x4xf32> to vector<1x4xf32>
    %418 = vector.broadcast %416 : vector<1x4xf32> to vector<8x4xf32>
    %419 = arith.mulf %418, %366 : vector<8x4xf32>
    %420 = vector.broadcast %417 : vector<1x4xf32> to vector<8x4xf32>
    %421 = arith.mulf %420, %367 : vector<8x4xf32>
    %422 = arith.addf %419, %421 : vector<8x4xf32>
    %423 = vector.broadcast %417 : vector<1x4xf32> to vector<8x4xf32>
    %424 = arith.mulf %423, %366 : vector<8x4xf32>
    %425 = vector.broadcast %416 : vector<1x4xf32> to vector<8x4xf32>
    %426 = arith.mulf %425, %367 : vector<8x4xf32>
    %427 = arith.subf %424, %426 : vector<8x4xf32>
    %c2_193 = arith.constant 2 : index
    %c0_194 = arith.constant 0 : index
    %c0_195 = arith.constant 0 : index
    %428 = vector.load %arg5[%c2_193, %c0_194, %c0_195] : memref<8x8x4xf32, #tpu.memory_space<vmem>>, vector<1x8x4xf32>
    %429 = vector.shape_cast %428 : vector<1x8x4xf32> to vector<8x4xf32>
    %430 = arith.addf %429, %422 : vector<8x4xf32>
    %c2_196 = arith.constant 2 : index
    %c0_197 = arith.constant 0 : index
    %c0_198 = arith.constant 0 : index
    %431 = vector.load %arg5[%c2_196, %c0_197, %c0_198] : memref<8x8x4xf32, #tpu.memory_space<vmem>>, vector<1x8x4xf32>
    %432 = vector.shape_cast %431 : vector<1x8x4xf32> to vector<8x4xf32>
    %433 = vector.shape_cast %430 : vector<8x4xf32> to vector<1x8x4xf32>
    tpu.vector_store %arg5[%c2_196, %c0_197, %c0_198], %433 {strides = array<i32>} : memref<8x8x4xf32, #tpu.memory_space<vmem>>, vector<1x8x4xf32>,
    %c2_199 = arith.constant 2 : index
    %c0_200 = arith.constant 0 : index
    %c0_201 = arith.constant 0 : index
    %434 = vector.load %arg6[%c2_199, %c0_200, %c0_201] : memref<8x8x4xf32, #tpu.memory_space<vmem>>, vector<1x8x4xf32>
    %435 = vector.shape_cast %434 : vector<1x8x4xf32> to vector<8x4xf32>
    %436 = arith.addf %435, %427 : vector<8x4xf32>
    %c2_202 = arith.constant 2 : index
    %c0_203 = arith.constant 0 : index
    %c0_204 = arith.constant 0 : index
    %437 = vector.load %arg6[%c2_202, %c0_203, %c0_204] : memref<8x8x4xf32, #tpu.memory_space<vmem>>, vector<1x8x4xf32>
    %438 = vector.shape_cast %437 : vector<1x8x4xf32> to vector<8x4xf32>
    %439 = vector.shape_cast %436 : vector<8x4xf32> to vector<1x8x4xf32>
    tpu.vector_store %arg6[%c2_202, %c0_203, %c0_204], %439 {strides = array<i32>} : memref<8x8x4xf32, #tpu.memory_space<vmem>>, vector<1x8x4xf32>,
    %440 = vector.extract_strided_slice %366 {offsets = [3, 0], sizes = [1, 4], strides = [1, 1]} : vector<8x4xf32> to vector<1x4xf32>
    %441 = vector.extract_strided_slice %367 {offsets = [3, 0], sizes = [1, 4], strides = [1, 1]} : vector<8x4xf32> to vector<1x4xf32>
    %442 = vector.broadcast %440 : vector<1x4xf32> to vector<8x4xf32>
    %443 = arith.mulf %442, %366 : vector<8x4xf32>
    %444 = vector.broadcast %441 : vector<1x4xf32> to vector<8x4xf32>
    %445 = arith.mulf %444, %367 : vector<8x4xf32>
    %446 = arith.addf %443, %445 : vector<8x4xf32>
    %447 = vector.broadcast %441 : vector<1x4xf32> to vector<8x4xf32>
    %448 = arith.mulf %447, %366 : vector<8x4xf32>
    %449 = vector.broadcast %440 : vector<1x4xf32> to vector<8x4xf32>
    %450 = arith.mulf %449, %367 : vector<8x4xf32>
    %451 = arith.subf %448, %450 : vector<8x4xf32>
    %c3_205 = arith.constant 3 : index
    %c0_206 = arith.constant 0 : index
    %c0_207 = arith.constant 0 : index
    %452 = vector.load %arg5[%c3_205, %c0_206, %c0_207] : memref<8x8x4xf32, #tpu.memory_space<vmem>>, vector<1x8x4xf32>
    %453 = vector.shape_cast %452 : vector<1x8x4xf32> to vector<8x4xf32>
    %454 = arith.addf %453, %446 : vector<8x4xf32>
    %c3_208 = arith.constant 3 : index
    %c0_209 = arith.constant 0 : index
    %c0_210 = arith.constant 0 : index
    %455 = vector.load %arg5[%c3_208, %c0_209, %c0_210] : memref<8x8x4xf32, #tpu.memory_space<vmem>>, vector<1x8x4xf32>
    %456 = vector.shape_cast %455 : vector<1x8x4xf32> to vector<8x4xf32>
    %457 = vector.shape_cast %454 : vector<8x4xf32> to vector<1x8x4xf32>
    tpu.vector_store %arg5[%c3_208, %c0_209, %c0_210], %457 {strides = array<i32>} : memref<8x8x4xf32, #tpu.memory_space<vmem>>, vector<1x8x4xf32>,
    %c3_211 = arith.constant 3 : index
    %c0_212 = arith.constant 0 : index
    %c0_213 = arith.constant 0 : index
    %458 = vector.load %arg6[%c3_211, %c0_212, %c0_213] : memref<8x8x4xf32, #tpu.memory_space<vmem>>, vector<1x8x4xf32>
    %459 = vector.shape_cast %458 : vector<1x8x4xf32> to vector<8x4xf32>
    %460 = arith.addf %459, %451 : vector<8x4xf32>
    %c3_214 = arith.constant 3 : index
    %c0_215 = arith.constant 0 : index
    %c0_216 = arith.constant 0 : index
    %461 = vector.load %arg6[%c3_214, %c0_215, %c0_216] : memref<8x8x4xf32, #tpu.memory_space<vmem>>, vector<1x8x4xf32>
    %462 = vector.shape_cast %461 : vector<1x8x4xf32> to vector<8x4xf32>
    %463 = vector.shape_cast %460 : vector<8x4xf32> to vector<1x8x4xf32>
    tpu.vector_store %arg6[%c3_214, %c0_215, %c0_216], %463 {strides = array<i32>} : memref<8x8x4xf32, #tpu.memory_space<vmem>>, vector<1x8x4xf32>,
    %464 = vector.extract_strided_slice %366 {offsets = [4, 0], sizes = [1, 4], strides = [1, 1]} : vector<8x4xf32> to vector<1x4xf32>
    %465 = vector.extract_strided_slice %367 {offsets = [4, 0], sizes = [1, 4], strides = [1, 1]} : vector<8x4xf32> to vector<1x4xf32>
    %466 = vector.broadcast %464 : vector<1x4xf32> to vector<8x4xf32>
    %467 = arith.mulf %466, %366 : vector<8x4xf32>
    %468 = vector.broadcast %465 : vector<1x4xf32> to vector<8x4xf32>
    %469 = arith.mulf %468, %367 : vector<8x4xf32>
    %470 = arith.addf %467, %469 : vector<8x4xf32>
    %471 = vector.broadcast %465 : vector<1x4xf32> to vector<8x4xf32>
    %472 = arith.mulf %471, %366 : vector<8x4xf32>
    %473 = vector.broadcast %464 : vector<1x4xf32> to vector<8x4xf32>
    %474 = arith.mulf %473, %367 : vector<8x4xf32>
    %475 = arith.subf %472, %474 : vector<8x4xf32>
    %c4_217 = arith.constant 4 : index
    %c0_218 = arith.constant 0 : index
    %c0_219 = arith.constant 0 : index
    %476 = vector.load %arg5[%c4_217, %c0_218, %c0_219] : memref<8x8x4xf32, #tpu.memory_space<vmem>>, vector<1x8x4xf32>
    %477 = vector.shape_cast %476 : vector<1x8x4xf32> to vector<8x4xf32>
    %478 = arith.addf %477, %470 : vector<8x4xf32>
    %c4_220 = arith.constant 4 : index
    %c0_221 = arith.constant 0 : index
    %c0_222 = arith.constant 0 : index
    %479 = vector.load %arg5[%c4_220, %c0_221, %c0_222] : memref<8x8x4xf32, #tpu.memory_space<vmem>>, vector<1x8x4xf32>
    %480 = vector.shape_cast %479 : vector<1x8x4xf32> to vector<8x4xf32>
    %481 = vector.shape_cast %478 : vector<8x4xf32> to vector<1x8x4xf32>
    tpu.vector_store %arg5[%c4_220, %c0_221, %c0_222], %481 {strides = array<i32>} : memref<8x8x4xf32, #tpu.memory_space<vmem>>, vector<1x8x4xf32>,
    %c4_223 = arith.constant 4 : index
    %c0_224 = arith.constant 0 : index
    %c0_225 = arith.constant 0 : index
    %482 = vector.load %arg6[%c4_223, %c0_224, %c0_225] : memref<8x8x4xf32, #tpu.memory_space<vmem>>, vector<1x8x4xf32>
    %483 = vector.shape_cast %482 : vector<1x8x4xf32> to vector<8x4xf32>
    %484 = arith.addf %483, %475 : vector<8x4xf32>
    %c4_226 = arith.constant 4 : index
    %c0_227 = arith.constant 0 : index
    %c0_228 = arith.constant 0 : index
    %485 = vector.load %arg6[%c4_226, %c0_227, %c0_228] : memref<8x8x4xf32, #tpu.memory_space<vmem>>, vector<1x8x4xf32>
    %486 = vector.shape_cast %485 : vector<1x8x4xf32> to vector<8x4xf32>
    %487 = vector.shape_cast %484 : vector<8x4xf32> to vector<1x8x4xf32>
    tpu.vector_store %arg6[%c4_226, %c0_227, %c0_228], %487 {strides = array<i32>} : memref<8x8x4xf32, #tpu.memory_space<vmem>>, vector<1x8x4xf32>,
    %488 = vector.extract_strided_slice %366 {offsets = [5, 0], sizes = [1, 4], strides = [1, 1]} : vector<8x4xf32> to vector<1x4xf32>
    %489 = vector.extract_strided_slice %367 {offsets = [5, 0], sizes = [1, 4], strides = [1, 1]} : vector<8x4xf32> to vector<1x4xf32>
    %490 = vector.broadcast %488 : vector<1x4xf32> to vector<8x4xf32>
    %491 = arith.mulf %490, %366 : vector<8x4xf32>
    %492 = vector.broadcast %489 : vector<1x4xf32> to vector<8x4xf32>
    %493 = arith.mulf %492, %367 : vector<8x4xf32>
    %494 = arith.addf %491, %493 : vector<8x4xf32>
    %495 = vector.broadcast %489 : vector<1x4xf32> to vector<8x4xf32>
    %496 = arith.mulf %495, %366 : vector<8x4xf32>
    %497 = vector.broadcast %488 : vector<1x4xf32> to vector<8x4xf32>
    %498 = arith.mulf %497, %367 : vector<8x4xf32>
    %499 = arith.subf %496, %498 : vector<8x4xf32>
    %c5_229 = arith.constant 5 : index
    %c0_230 = arith.constant 0 : index
    %c0_231 = arith.constant 0 : index
    %500 = vector.load %arg5[%c5_229, %c0_230, %c0_231] : memref<8x8x4xf32, #tpu.memory_space<vmem>>, vector<1x8x4xf32>
    %501 = vector.shape_cast %500 : vector<1x8x4xf32> to vector<8x4xf32>
    %502 = arith.addf %501, %494 : vector<8x4xf32>
    %c5_232 = arith.constant 5 : index
    %c0_233 = arith.constant 0 : index
    %c0_234 = arith.constant 0 : index
    %503 = vector.load %arg5[%c5_232, %c0_233, %c0_234] : memref<8x8x4xf32, #tpu.memory_space<vmem>>, vector<1x8x4xf32>
    %504 = vector.shape_cast %503 : vector<1x8x4xf32> to vector<8x4xf32>
    %505 = vector.shape_cast %502 : vector<8x4xf32> to vector<1x8x4xf32>
    tpu.vector_store %arg5[%c5_232, %c0_233, %c0_234], %505 {strides = array<i32>} : memref<8x8x4xf32, #tpu.memory_space<vmem>>, vector<1x8x4xf32>,
    %c5_235 = arith.constant 5 : index
    %c0_236 = arith.constant 0 : index
    %c0_237 = arith.constant 0 : index
    %506 = vector.load %arg6[%c5_235, %c0_236, %c0_237] : memref<8x8x4xf32, #tpu.memory_space<vmem>>, vector<1x8x4xf32>
    %507 = vector.shape_cast %506 : vector<1x8x4xf32> to vector<8x4xf32>
    %508 = arith.addf %507, %499 : vector<8x4xf32>
    %c5_238 = arith.constant 5 : index
    %c0_239 = arith.constant 0 : index
    %c0_240 = arith.constant 0 : index
    %509 = vector.load %arg6[%c5_238, %c0_239, %c0_240] : memref<8x8x4xf32, #tpu.memory_space<vmem>>, vector<1x8x4xf32>
    %510 = vector.shape_cast %509 : vector<1x8x4xf32> to vector<8x4xf32>
    %511 = vector.shape_cast %508 : vector<8x4xf32> to vector<1x8x4xf32>
    tpu.vector_store %arg6[%c5_238, %c0_239, %c0_240], %511 {strides = array<i32>} : memref<8x8x4xf32, #tpu.memory_space<vmem>>, vector<1x8x4xf32>,
    %512 = vector.extract_strided_slice %366 {offsets = [6, 0], sizes = [1, 4], strides = [1, 1]} : vector<8x4xf32> to vector<1x4xf32>
    %513 = vector.extract_strided_slice %367 {offsets = [6, 0], sizes = [1, 4], strides = [1, 1]} : vector<8x4xf32> to vector<1x4xf32>
    %514 = vector.broadcast %512 : vector<1x4xf32> to vector<8x4xf32>
    %515 = arith.mulf %514, %366 : vector<8x4xf32>
    %516 = vector.broadcast %513 : vector<1x4xf32> to vector<8x4xf32>
    %517 = arith.mulf %516, %367 : vector<8x4xf32>
    %518 = arith.addf %515, %517 : vector<8x4xf32>
    %519 = vector.broadcast %513 : vector<1x4xf32> to vector<8x4xf32>
    %520 = arith.mulf %519, %366 : vector<8x4xf32>
    %521 = vector.broadcast %512 : vector<1x4xf32> to vector<8x4xf32>
    %522 = arith.mulf %521, %367 : vector<8x4xf32>
    %523 = arith.subf %520, %522 : vector<8x4xf32>
    %c6_241 = arith.constant 6 : index
    %c0_242 = arith.constant 0 : index
    %c0_243 = arith.constant 0 : index
    %524 = vector.load %arg5[%c6_241, %c0_242, %c0_243] : memref<8x8x4xf32, #tpu.memory_space<vmem>>, vector<1x8x4xf32>
    %525 = vector.shape_cast %524 : vector<1x8x4xf32> to vector<8x4xf32>
    %526 = arith.addf %525, %518 : vector<8x4xf32>
    %c6_244 = arith.constant 6 : index
    %c0_245 = arith.constant 0 : index
    %c0_246 = arith.constant 0 : index
    %527 = vector.load %arg5[%c6_244, %c0_245, %c0_246] : memref<8x8x4xf32, #tpu.memory_space<vmem>>, vector<1x8x4xf32>
    %528 = vector.shape_cast %527 : vector<1x8x4xf32> to vector<8x4xf32>
    %529 = vector.shape_cast %526 : vector<8x4xf32> to vector<1x8x4xf32>
    tpu.vector_store %arg5[%c6_244, %c0_245, %c0_246], %529 {strides = array<i32>} : memref<8x8x4xf32, #tpu.memory_space<vmem>>, vector<1x8x4xf32>,
    %c6_247 = arith.constant 6 : index
    %c0_248 = arith.constant 0 : index
    %c0_249 = arith.constant 0 : index
    %530 = vector.load %arg6[%c6_247, %c0_248, %c0_249] : memref<8x8x4xf32, #tpu.memory_space<vmem>>, vector<1x8x4xf32>
    %531 = vector.shape_cast %530 : vector<1x8x4xf32> to vector<8x4xf32>
    %532 = arith.addf %531, %523 : vector<8x4xf32>
    %c6_250 = arith.constant 6 : index
    %c0_251 = arith.constant 0 : index
    %c0_252 = arith.constant 0 : index
    %533 = vector.load %arg6[%c6_250, %c0_251, %c0_252] : memref<8x8x4xf32, #tpu.memory_space<vmem>>, vector<1x8x4xf32>
    %534 = vector.shape_cast %533 : vector<1x8x4xf32> to vector<8x4xf32>
    %535 = vector.shape_cast %532 : vector<8x4xf32> to vector<1x8x4xf32>
    tpu.vector_store %arg6[%c6_250, %c0_251, %c0_252], %535 {strides = array<i32>} : memref<8x8x4xf32, #tpu.memory_space<vmem>>, vector<1x8x4xf32>,
    %536 = vector.extract_strided_slice %366 {offsets = [7, 0], sizes = [1, 4], strides = [1, 1]} : vector<8x4xf32> to vector<1x4xf32>
    %537 = vector.extract_strided_slice %367 {offsets = [7, 0], sizes = [1, 4], strides = [1, 1]} : vector<8x4xf32> to vector<1x4xf32>
    %538 = vector.broadcast %536 : vector<1x4xf32> to vector<8x4xf32>
    %539 = arith.mulf %538, %366 : vector<8x4xf32>
    %540 = vector.broadcast %537 : vector<1x4xf32> to vector<8x4xf32>
    %541 = arith.mulf %540, %367 : vector<8x4xf32>
    %542 = arith.addf %539, %541 : vector<8x4xf32>
    %543 = vector.broadcast %537 : vector<1x4xf32> to vector<8x4xf32>
    %544 = arith.mulf %543, %366 : vector<8x4xf32>
    %545 = vector.broadcast %536 : vector<1x4xf32> to vector<8x4xf32>
    %546 = arith.mulf %545, %367 : vector<8x4xf32>
    %547 = arith.subf %544, %546 : vector<8x4xf32>
    %c7_253 = arith.constant 7 : index
    %c0_254 = arith.constant 0 : index
    %c0_255 = arith.constant 0 : index
    %548 = vector.load %arg5[%c7_253, %c0_254, %c0_255] : memref<8x8x4xf32, #tpu.memory_space<vmem>>, vector<1x8x4xf32>
    %549 = vector.shape_cast %548 : vector<1x8x4xf32> to vector<8x4xf32>
    %550 = arith.addf %549, %542 : vector<8x4xf32>
    %c7_256 = arith.constant 7 : index
    %c0_257 = arith.constant 0 : index
    %c0_258 = arith.constant 0 : index
    %551 = vector.load %arg5[%c7_256, %c0_257, %c0_258] : memref<8x8x4xf32, #tpu.memory_space<vmem>>, vector<1x8x4xf32>
    %552 = vector.shape_cast %551 : vector<1x8x4xf32> to vector<8x4xf32>
    %553 = vector.shape_cast %550 : vector<8x4xf32> to vector<1x8x4xf32>
    tpu.vector_store %arg5[%c7_256, %c0_257, %c0_258], %553 {strides = array<i32>} : memref<8x8x4xf32, #tpu.memory_space<vmem>>, vector<1x8x4xf32>,
    %c7_259 = arith.constant 7 : index
    %c0_260 = arith.constant 0 : index
    %c0_261 = arith.constant 0 : index
    %554 = vector.load %arg6[%c7_259, %c0_260, %c0_261] : memref<8x8x4xf32, #tpu.memory_space<vmem>>, vector<1x8x4xf32>
    %555 = vector.shape_cast %554 : vector<1x8x4xf32> to vector<8x4xf32>
    %556 = arith.addf %555, %547 : vector<8x4xf32>
    %c7_262 = arith.constant 7 : index
    %c0_263 = arith.constant 0 : index
    %c0_264 = arith.constant 0 : index
    %557 = vector.load %arg6[%c7_262, %c0_263, %c0_264] : memref<8x8x4xf32, #tpu.memory_space<vmem>>, vector<1x8x4xf32>
    %558 = vector.shape_cast %557 : vector<1x8x4xf32> to vector<8x4xf32>
    %559 = vector.shape_cast %556 : vector<8x4xf32> to vector<1x8x4xf32>
    tpu.vector_store %arg6[%c7_262, %c0_263, %c0_264], %559 {strides = array<i32>} : memref<8x8x4xf32, #tpu.memory_space<vmem>>, vector<1x8x4xf32>,
    %c3_265 = arith.constant 3 : index
    %c0_266 = arith.constant 0 : index
    %c0_267 = arith.constant 0 : index
    %560 = vector.load %arg1[%c3_265, %c0_266, %c0_267] : memref<4x8x8xf32, #tpu.memory_space<vmem>>, vector<1x8x8xf32>
    %561 = vector.shape_cast %560 : vector<1x8x8xf32> to vector<8x8xf32>
    %c3_268 = arith.constant 3 : index
    %c0_269 = arith.constant 0 : index
    %c0_270 = arith.constant 0 : index
    %562 = vector.load %arg2[%c3_268, %c0_269, %c0_270] : memref<4x8x8xf32, #tpu.memory_space<vmem>>, vector<1x8x8xf32>
    %563 = vector.shape_cast %562 : vector<1x8x8xf32> to vector<8x8xf32>
    %cst_271 = arith.constant dense<0.000000e+00> : vector<8x4xf32>
    %564 = tpu.matmul %561, %0, %cst_271 {dimension_numbers = #tpu.dot_dimension_numbers<[1], [0], [0], [1], [0, 0, 1, 1], [], []>, precision = #tpu.contract_precision<fp32>} : vector<8x8xf32>, vector<8x4xf32>, vector<8x4xf32> -> vector<8x4xf32>
    %cst_272 = arith.constant dense<0.000000e+00> : vector<8x4xf32>
    %565 = tpu.matmul %563, %1, %cst_272 {dimension_numbers = #tpu.dot_dimension_numbers<[1], [0], [0], [1], [0, 0, 1, 1], [], []>, precision = #tpu.contract_precision<fp32>} : vector<8x8xf32>, vector<8x4xf32>, vector<8x4xf32> -> vector<8x4xf32>
    %cst_273 = arith.constant dense<0.000000e+00> : vector<8x4xf32>
    %566 = tpu.matmul %561, %1, %cst_273 {dimension_numbers = #tpu.dot_dimension_numbers<[1], [0], [0], [1], [0, 0, 1, 1], [], []>, precision = #tpu.contract_precision<fp32>} : vector<8x8xf32>, vector<8x4xf32>, vector<8x4xf32> -> vector<8x4xf32>
    %cst_274 = arith.constant dense<0.000000e+00> : vector<8x4xf32>
    %567 = tpu.matmul %563, %0, %cst_274 {dimension_numbers = #tpu.dot_dimension_numbers<[1], [0], [0], [1], [0, 0, 1, 1], [], []>, precision = #tpu.contract_precision<fp32>} : vector<8x8xf32>, vector<8x4xf32>, vector<8x4xf32> -> vector<8x4xf32>
    %568 = arith.subf %564, %565 : vector<8x4xf32>
    %569 = arith.addf %566, %567 : vector<8x4xf32>
    %570 = vector.extract_strided_slice %568 {offsets = [0, 0], sizes = [1, 4], strides = [1, 1]} : vector<8x4xf32> to vector<1x4xf32>
    %571 = vector.extract_strided_slice %569 {offsets = [0, 0], sizes = [1, 4], strides = [1, 1]} : vector<8x4xf32> to vector<1x4xf32>
    %572 = vector.broadcast %570 : vector<1x4xf32> to vector<8x4xf32>
    %573 = arith.mulf %572, %568 : vector<8x4xf32>
    %574 = vector.broadcast %571 : vector<1x4xf32> to vector<8x4xf32>
    %575 = arith.mulf %574, %569 : vector<8x4xf32>
    %576 = arith.addf %573, %575 : vector<8x4xf32>
    %577 = vector.broadcast %571 : vector<1x4xf32> to vector<8x4xf32>
    %578 = arith.mulf %577, %568 : vector<8x4xf32>
    %579 = vector.broadcast %570 : vector<1x4xf32> to vector<8x4xf32>
    %580 = arith.mulf %579, %569 : vector<8x4xf32>
    %581 = arith.subf %578, %580 : vector<8x4xf32>
    %c0_275 = arith.constant 0 : index
    %c0_276 = arith.constant 0 : index
    %c0_277 = arith.constant 0 : index
    %582 = vector.load %arg5[%c0_275, %c0_276, %c0_277] : memref<8x8x4xf32, #tpu.memory_space<vmem>>, vector<1x8x4xf32>
    %583 = vector.shape_cast %582 : vector<1x8x4xf32> to vector<8x4xf32>
    %584 = arith.addf %583, %576 : vector<8x4xf32>
    %c0_278 = arith.constant 0 : index
    %c0_279 = arith.constant 0 : index
    %c0_280 = arith.constant 0 : index
    %585 = vector.load %arg5[%c0_278, %c0_279, %c0_280] : memref<8x8x4xf32, #tpu.memory_space<vmem>>, vector<1x8x4xf32>
    %586 = vector.shape_cast %585 : vector<1x8x4xf32> to vector<8x4xf32>
    %587 = vector.shape_cast %584 : vector<8x4xf32> to vector<1x8x4xf32>
    tpu.vector_store %arg5[%c0_278, %c0_279, %c0_280], %587 {strides = array<i32>} : memref<8x8x4xf32, #tpu.memory_space<vmem>>, vector<1x8x4xf32>,
    %c0_281 = arith.constant 0 : index
    %c0_282 = arith.constant 0 : index
    %c0_283 = arith.constant 0 : index
    %588 = vector.load %arg6[%c0_281, %c0_282, %c0_283] : memref<8x8x4xf32, #tpu.memory_space<vmem>>, vector<1x8x4xf32>
    %589 = vector.shape_cast %588 : vector<1x8x4xf32> to vector<8x4xf32>
    %590 = arith.addf %589, %581 : vector<8x4xf32>
    %c0_284 = arith.constant 0 : index
    %c0_285 = arith.constant 0 : index
    %c0_286 = arith.constant 0 : index
    %591 = vector.load %arg6[%c0_284, %c0_285, %c0_286] : memref<8x8x4xf32, #tpu.memory_space<vmem>>, vector<1x8x4xf32>
    %592 = vector.shape_cast %591 : vector<1x8x4xf32> to vector<8x4xf32>
    %593 = vector.shape_cast %590 : vector<8x4xf32> to vector<1x8x4xf32>
    tpu.vector_store %arg6[%c0_284, %c0_285, %c0_286], %593 {strides = array<i32>} : memref<8x8x4xf32, #tpu.memory_space<vmem>>, vector<1x8x4xf32>,
    %594 = vector.extract_strided_slice %568 {offsets = [1, 0], sizes = [1, 4], strides = [1, 1]} : vector<8x4xf32> to vector<1x4xf32>
    %595 = vector.extract_strided_slice %569 {offsets = [1, 0], sizes = [1, 4], strides = [1, 1]} : vector<8x4xf32> to vector<1x4xf32>
    %596 = vector.broadcast %594 : vector<1x4xf32> to vector<8x4xf32>
    %597 = arith.mulf %596, %568 : vector<8x4xf32>
    %598 = vector.broadcast %595 : vector<1x4xf32> to vector<8x4xf32>
    %599 = arith.mulf %598, %569 : vector<8x4xf32>
    %600 = arith.addf %597, %599 : vector<8x4xf32>
    %601 = vector.broadcast %595 : vector<1x4xf32> to vector<8x4xf32>
    %602 = arith.mulf %601, %568 : vector<8x4xf32>
    %603 = vector.broadcast %594 : vector<1x4xf32> to vector<8x4xf32>
    %604 = arith.mulf %603, %569 : vector<8x4xf32>
    %605 = arith.subf %602, %604 : vector<8x4xf32>
    %c1_287 = arith.constant 1 : index
    %c0_288 = arith.constant 0 : index
    %c0_289 = arith.constant 0 : index
    %606 = vector.load %arg5[%c1_287, %c0_288, %c0_289] : memref<8x8x4xf32, #tpu.memory_space<vmem>>, vector<1x8x4xf32>
    %607 = vector.shape_cast %606 : vector<1x8x4xf32> to vector<8x4xf32>
    %608 = arith.addf %607, %600 : vector<8x4xf32>
    %c1_290 = arith.constant 1 : index
    %c0_291 = arith.constant 0 : index
    %c0_292 = arith.constant 0 : index
    %609 = vector.load %arg5[%c1_290, %c0_291, %c0_292] : memref<8x8x4xf32, #tpu.memory_space<vmem>>, vector<1x8x4xf32>
    %610 = vector.shape_cast %609 : vector<1x8x4xf32> to vector<8x4xf32>
    %611 = vector.shape_cast %608 : vector<8x4xf32> to vector<1x8x4xf32>
    tpu.vector_store %arg5[%c1_290, %c0_291, %c0_292], %611 {strides = array<i32>} : memref<8x8x4xf32, #tpu.memory_space<vmem>>, vector<1x8x4xf32>,
    %c1_293 = arith.constant 1 : index
    %c0_294 = arith.constant 0 : index
    %c0_295 = arith.constant 0 : index
    %612 = vector.load %arg6[%c1_293, %c0_294, %c0_295] : memref<8x8x4xf32, #tpu.memory_space<vmem>>, vector<1x8x4xf32>
    %613 = vector.shape_cast %612 : vector<1x8x4xf32> to vector<8x4xf32>
    %614 = arith.addf %613, %605 : vector<8x4xf32>
    %c1_296 = arith.constant 1 : index
    %c0_297 = arith.constant 0 : index
    %c0_298 = arith.constant 0 : index
    %615 = vector.load %arg6[%c1_296, %c0_297, %c0_298] : memref<8x8x4xf32, #tpu.memory_space<vmem>>, vector<1x8x4xf32>
    %616 = vector.shape_cast %615 : vector<1x8x4xf32> to vector<8x4xf32>
    %617 = vector.shape_cast %614 : vector<8x4xf32> to vector<1x8x4xf32>
    tpu.vector_store %arg6[%c1_296, %c0_297, %c0_298], %617 {strides = array<i32>} : memref<8x8x4xf32, #tpu.memory_space<vmem>>, vector<1x8x4xf32>,
    %618 = vector.extract_strided_slice %568 {offsets = [2, 0], sizes = [1, 4], strides = [1, 1]} : vector<8x4xf32> to vector<1x4xf32>
    %619 = vector.extract_strided_slice %569 {offsets = [2, 0], sizes = [1, 4], strides = [1, 1]} : vector<8x4xf32> to vector<1x4xf32>
    %620 = vector.broadcast %618 : vector<1x4xf32> to vector<8x4xf32>
    %621 = arith.mulf %620, %568 : vector<8x4xf32>
    %622 = vector.broadcast %619 : vector<1x4xf32> to vector<8x4xf32>
    %623 = arith.mulf %622, %569 : vector<8x4xf32>
    %624 = arith.addf %621, %623 : vector<8x4xf32>
    %625 = vector.broadcast %619 : vector<1x4xf32> to vector<8x4xf32>
    %626 = arith.mulf %625, %568 : vector<8x4xf32>
    %627 = vector.broadcast %618 : vector<1x4xf32> to vector<8x4xf32>
    %628 = arith.mulf %627, %569 : vector<8x4xf32>
    %629 = arith.subf %626, %628 : vector<8x4xf32>
    %c2_299 = arith.constant 2 : index
    %c0_300 = arith.constant 0 : index
    %c0_301 = arith.constant 0 : index
    %630 = vector.load %arg5[%c2_299, %c0_300, %c0_301] : memref<8x8x4xf32, #tpu.memory_space<vmem>>, vector<1x8x4xf32>
    %631 = vector.shape_cast %630 : vector<1x8x4xf32> to vector<8x4xf32>
    %632 = arith.addf %631, %624 : vector<8x4xf32>
    %c2_302 = arith.constant 2 : index
    %c0_303 = arith.constant 0 : index
    %c0_304 = arith.constant 0 : index
    %633 = vector.load %arg5[%c2_302, %c0_303, %c0_304] : memref<8x8x4xf32, #tpu.memory_space<vmem>>, vector<1x8x4xf32>
    %634 = vector.shape_cast %633 : vector<1x8x4xf32> to vector<8x4xf32>
    %635 = vector.shape_cast %632 : vector<8x4xf32> to vector<1x8x4xf32>
    tpu.vector_store %arg5[%c2_302, %c0_303, %c0_304], %635 {strides = array<i32>} : memref<8x8x4xf32, #tpu.memory_space<vmem>>, vector<1x8x4xf32>,
    %c2_305 = arith.constant 2 : index
    %c0_306 = arith.constant 0 : index
    %c0_307 = arith.constant 0 : index
    %636 = vector.load %arg6[%c2_305, %c0_306, %c0_307] : memref<8x8x4xf32, #tpu.memory_space<vmem>>, vector<1x8x4xf32>
    %637 = vector.shape_cast %636 : vector<1x8x4xf32> to vector<8x4xf32>
    %638 = arith.addf %637, %629 : vector<8x4xf32>
    %c2_308 = arith.constant 2 : index
    %c0_309 = arith.constant 0 : index
    %c0_310 = arith.constant 0 : index
    %639 = vector.load %arg6[%c2_308, %c0_309, %c0_310] : memref<8x8x4xf32, #tpu.memory_space<vmem>>, vector<1x8x4xf32>
    %640 = vector.shape_cast %639 : vector<1x8x4xf32> to vector<8x4xf32>
    %641 = vector.shape_cast %638 : vector<8x4xf32> to vector<1x8x4xf32>
    tpu.vector_store %arg6[%c2_308, %c0_309, %c0_310], %641 {strides = array<i32>} : memref<8x8x4xf32, #tpu.memory_space<vmem>>, vector<1x8x4xf32>,
    %642 = vector.extract_strided_slice %568 {offsets = [3, 0], sizes = [1, 4], strides = [1, 1]} : vector<8x4xf32> to vector<1x4xf32>
    %643 = vector.extract_strided_slice %569 {offsets = [3, 0], sizes = [1, 4], strides = [1, 1]} : vector<8x4xf32> to vector<1x4xf32>
    %644 = vector.broadcast %642 : vector<1x4xf32> to vector<8x4xf32>
    %645 = arith.mulf %644, %568 : vector<8x4xf32>
    %646 = vector.broadcast %643 : vector<1x4xf32> to vector<8x4xf32>
    %647 = arith.mulf %646, %569 : vector<8x4xf32>
    %648 = arith.addf %645, %647 : vector<8x4xf32>
    %649 = vector.broadcast %643 : vector<1x4xf32> to vector<8x4xf32>
    %650 = arith.mulf %649, %568 : vector<8x4xf32>
    %651 = vector.broadcast %642 : vector<1x4xf32> to vector<8x4xf32>
    %652 = arith.mulf %651, %569 : vector<8x4xf32>
    %653 = arith.subf %650, %652 : vector<8x4xf32>
    %c3_311 = arith.constant 3 : index
    %c0_312 = arith.constant 0 : index
    %c0_313 = arith.constant 0 : index
    %654 = vector.load %arg5[%c3_311, %c0_312, %c0_313] : memref<8x8x4xf32, #tpu.memory_space<vmem>>, vector<1x8x4xf32>
    %655 = vector.shape_cast %654 : vector<1x8x4xf32> to vector<8x4xf32>
    %656 = arith.addf %655, %648 : vector<8x4xf32>
    %c3_314 = arith.constant 3 : index
    %c0_315 = arith.constant 0 : index
    %c0_316 = arith.constant 0 : index
    %657 = vector.load %arg5[%c3_314, %c0_315, %c0_316] : memref<8x8x4xf32, #tpu.memory_space<vmem>>, vector<1x8x4xf32>
    %658 = vector.shape_cast %657 : vector<1x8x4xf32> to vector<8x4xf32>
    %659 = vector.shape_cast %656 : vector<8x4xf32> to vector<1x8x4xf32>
    tpu.vector_store %arg5[%c3_314, %c0_315, %c0_316], %659 {strides = array<i32>} : memref<8x8x4xf32, #tpu.memory_space<vmem>>, vector<1x8x4xf32>,
    %c3_317 = arith.constant 3 : index
    %c0_318 = arith.constant 0 : index
    %c0_319 = arith.constant 0 : index
    %660 = vector.load %arg6[%c3_317, %c0_318, %c0_319] : memref<8x8x4xf32, #tpu.memory_space<vmem>>, vector<1x8x4xf32>
    %661 = vector.shape_cast %660 : vector<1x8x4xf32> to vector<8x4xf32>
    %662 = arith.addf %661, %653 : vector<8x4xf32>
    %c3_320 = arith.constant 3 : index
    %c0_321 = arith.constant 0 : index
    %c0_322 = arith.constant 0 : index
    %663 = vector.load %arg6[%c3_320, %c0_321, %c0_322] : memref<8x8x4xf32, #tpu.memory_space<vmem>>, vector<1x8x4xf32>
    %664 = vector.shape_cast %663 : vector<1x8x4xf32> to vector<8x4xf32>
    %665 = vector.shape_cast %662 : vector<8x4xf32> to vector<1x8x4xf32>
    tpu.vector_store %arg6[%c3_320, %c0_321, %c0_322], %665 {strides = array<i32>} : memref<8x8x4xf32, #tpu.memory_space<vmem>>, vector<1x8x4xf32>,
    %666 = vector.extract_strided_slice %568 {offsets = [4, 0], sizes = [1, 4], strides = [1, 1]} : vector<8x4xf32> to vector<1x4xf32>
    %667 = vector.extract_strided_slice %569 {offsets = [4, 0], sizes = [1, 4], strides = [1, 1]} : vector<8x4xf32> to vector<1x4xf32>
    %668 = vector.broadcast %666 : vector<1x4xf32> to vector<8x4xf32>
    %669 = arith.mulf %668, %568 : vector<8x4xf32>
    %670 = vector.broadcast %667 : vector<1x4xf32> to vector<8x4xf32>
    %671 = arith.mulf %670, %569 : vector<8x4xf32>
    %672 = arith.addf %669, %671 : vector<8x4xf32>
    %673 = vector.broadcast %667 : vector<1x4xf32> to vector<8x4xf32>
    %674 = arith.mulf %673, %568 : vector<8x4xf32>
    %675 = vector.broadcast %666 : vector<1x4xf32> to vector<8x4xf32>
    %676 = arith.mulf %675, %569 : vector<8x4xf32>
    %677 = arith.subf %674, %676 : vector<8x4xf32>
    %c4_323 = arith.constant 4 : index
    %c0_324 = arith.constant 0 : index
    %c0_325 = arith.constant 0 : index
    %678 = vector.load %arg5[%c4_323, %c0_324, %c0_325] : memref<8x8x4xf32, #tpu.memory_space<vmem>>, vector<1x8x4xf32>
    %679 = vector.shape_cast %678 : vector<1x8x4xf32> to vector<8x4xf32>
    %680 = arith.addf %679, %672 : vector<8x4xf32>
    %c4_326 = arith.constant 4 : index
    %c0_327 = arith.constant 0 : index
    %c0_328 = arith.constant 0 : index
    %681 = vector.load %arg5[%c4_326, %c0_327, %c0_328] : memref<8x8x4xf32, #tpu.memory_space<vmem>>, vector<1x8x4xf32>
    %682 = vector.shape_cast %681 : vector<1x8x4xf32> to vector<8x4xf32>
    %683 = vector.shape_cast %680 : vector<8x4xf32> to vector<1x8x4xf32>
    tpu.vector_store %arg5[%c4_326, %c0_327, %c0_328], %683 {strides = array<i32>} : memref<8x8x4xf32, #tpu.memory_space<vmem>>, vector<1x8x4xf32>,
    %c4_329 = arith.constant 4 : index
    %c0_330 = arith.constant 0 : index
    %c0_331 = arith.constant 0 : index
    %684 = vector.load %arg6[%c4_329, %c0_330, %c0_331] : memref<8x8x4xf32, #tpu.memory_space<vmem>>, vector<1x8x4xf32>
    %685 = vector.shape_cast %684 : vector<1x8x4xf32> to vector<8x4xf32>
    %686 = arith.addf %685, %677 : vector<8x4xf32>
    %c4_332 = arith.constant 4 : index
    %c0_333 = arith.constant 0 : index
    %c0_334 = arith.constant 0 : index
    %687 = vector.load %arg6[%c4_332, %c0_333, %c0_334] : memref<8x8x4xf32, #tpu.memory_space<vmem>>, vector<1x8x4xf32>
    %688 = vector.shape_cast %687 : vector<1x8x4xf32> to vector<8x4xf32>
    %689 = vector.shape_cast %686 : vector<8x4xf32> to vector<1x8x4xf32>
    tpu.vector_store %arg6[%c4_332, %c0_333, %c0_334], %689 {strides = array<i32>} : memref<8x8x4xf32, #tpu.memory_space<vmem>>, vector<1x8x4xf32>,
    %690 = vector.extract_strided_slice %568 {offsets = [5, 0], sizes = [1, 4], strides = [1, 1]} : vector<8x4xf32> to vector<1x4xf32>
    %691 = vector.extract_strided_slice %569 {offsets = [5, 0], sizes = [1, 4], strides = [1, 1]} : vector<8x4xf32> to vector<1x4xf32>
    %692 = vector.broadcast %690 : vector<1x4xf32> to vector<8x4xf32>
    %693 = arith.mulf %692, %568 : vector<8x4xf32>
    %694 = vector.broadcast %691 : vector<1x4xf32> to vector<8x4xf32>
    %695 = arith.mulf %694, %569 : vector<8x4xf32>
    %696 = arith.addf %693, %695 : vector<8x4xf32>
    %697 = vector.broadcast %691 : vector<1x4xf32> to vector<8x4xf32>
    %698 = arith.mulf %697, %568 : vector<8x4xf32>
    %699 = vector.broadcast %690 : vector<1x4xf32> to vector<8x4xf32>
    %700 = arith.mulf %699, %569 : vector<8x4xf32>
    %701 = arith.subf %698, %700 : vector<8x4xf32>
    %c5_335 = arith.constant 5 : index
    %c0_336 = arith.constant 0 : index
    %c0_337 = arith.constant 0 : index
    %702 = vector.load %arg5[%c5_335, %c0_336, %c0_337] : memref<8x8x4xf32, #tpu.memory_space<vmem>>, vector<1x8x4xf32>
    %703 = vector.shape_cast %702 : vector<1x8x4xf32> to vector<8x4xf32>
    %704 = arith.addf %703, %696 : vector<8x4xf32>
    %c5_338 = arith.constant 5 : index
    %c0_339 = arith.constant 0 : index
    %c0_340 = arith.constant 0 : index
    %705 = vector.load %arg5[%c5_338, %c0_339, %c0_340] : memref<8x8x4xf32, #tpu.memory_space<vmem>>, vector<1x8x4xf32>
    %706 = vector.shape_cast %705 : vector<1x8x4xf32> to vector<8x4xf32>
    %707 = vector.shape_cast %704 : vector<8x4xf32> to vector<1x8x4xf32>
    tpu.vector_store %arg5[%c5_338, %c0_339, %c0_340], %707 {strides = array<i32>} : memref<8x8x4xf32, #tpu.memory_space<vmem>>, vector<1x8x4xf32>,
    %c5_341 = arith.constant 5 : index
    %c0_342 = arith.constant 0 : index
    %c0_343 = arith.constant 0 : index
    %708 = vector.load %arg6[%c5_341, %c0_342, %c0_343] : memref<8x8x4xf32, #tpu.memory_space<vmem>>, vector<1x8x4xf32>
    %709 = vector.shape_cast %708 : vector<1x8x4xf32> to vector<8x4xf32>
    %710 = arith.addf %709, %701 : vector<8x4xf32>
    %c5_344 = arith.constant 5 : index
    %c0_345 = arith.constant 0 : index
    %c0_346 = arith.constant 0 : index
    %711 = vector.load %arg6[%c5_344, %c0_345, %c0_346] : memref<8x8x4xf32, #tpu.memory_space<vmem>>, vector<1x8x4xf32>
    %712 = vector.shape_cast %711 : vector<1x8x4xf32> to vector<8x4xf32>
    %713 = vector.shape_cast %710 : vector<8x4xf32> to vector<1x8x4xf32>
    tpu.vector_store %arg6[%c5_344, %c0_345, %c0_346], %713 {strides = array<i32>} : memref<8x8x4xf32, #tpu.memory_space<vmem>>, vector<1x8x4xf32>,
    %714 = vector.extract_strided_slice %568 {offsets = [6, 0], sizes = [1, 4], strides = [1, 1]} : vector<8x4xf32> to vector<1x4xf32>
    %715 = vector.extract_strided_slice %569 {offsets = [6, 0], sizes = [1, 4], strides = [1, 1]} : vector<8x4xf32> to vector<1x4xf32>
    %716 = vector.broadcast %714 : vector<1x4xf32> to vector<8x4xf32>
    %717 = arith.mulf %716, %568 : vector<8x4xf32>
    %718 = vector.broadcast %715 : vector<1x4xf32> to vector<8x4xf32>
    %719 = arith.mulf %718, %569 : vector<8x4xf32>
    %720 = arith.addf %717, %719 : vector<8x4xf32>
    %721 = vector.broadcast %715 : vector<1x4xf32> to vector<8x4xf32>
    %722 = arith.mulf %721, %568 : vector<8x4xf32>
    %723 = vector.broadcast %714 : vector<1x4xf32> to vector<8x4xf32>
    %724 = arith.mulf %723, %569 : vector<8x4xf32>
    %725 = arith.subf %722, %724 : vector<8x4xf32>
    %c6_347 = arith.constant 6 : index
    %c0_348 = arith.constant 0 : index
    %c0_349 = arith.constant 0 : index
    %726 = vector.load %arg5[%c6_347, %c0_348, %c0_349] : memref<8x8x4xf32, #tpu.memory_space<vmem>>, vector<1x8x4xf32>
    %727 = vector.shape_cast %726 : vector<1x8x4xf32> to vector<8x4xf32>
    %728 = arith.addf %727, %720 : vector<8x4xf32>
    %c6_350 = arith.constant 6 : index
    %c0_351 = arith.constant 0 : index
    %c0_352 = arith.constant 0 : index
    %729 = vector.load %arg5[%c6_350, %c0_351, %c0_352] : memref<8x8x4xf32, #tpu.memory_space<vmem>>, vector<1x8x4xf32>
    %730 = vector.shape_cast %729 : vector<1x8x4xf32> to vector<8x4xf32>
    %731 = vector.shape_cast %728 : vector<8x4xf32> to vector<1x8x4xf32>
    tpu.vector_store %arg5[%c6_350, %c0_351, %c0_352], %731 {strides = array<i32>} : memref<8x8x4xf32, #tpu.memory_space<vmem>>, vector<1x8x4xf32>,
    %c6_353 = arith.constant 6 : index
    %c0_354 = arith.constant 0 : index
    %c0_355 = arith.constant 0 : index
    %732 = vector.load %arg6[%c6_353, %c0_354, %c0_355] : memref<8x8x4xf32, #tpu.memory_space<vmem>>, vector<1x8x4xf32>
    %733 = vector.shape_cast %732 : vector<1x8x4xf32> to vector<8x4xf32>
    %734 = arith.addf %733, %725 : vector<8x4xf32>
    %c6_356 = arith.constant 6 : index
    %c0_357 = arith.constant 0 : index
    %c0_358 = arith.constant 0 : index
    %735 = vector.load %arg6[%c6_356, %c0_357, %c0_358] : memref<8x8x4xf32, #tpu.memory_space<vmem>>, vector<1x8x4xf32>
    %736 = vector.shape_cast %735 : vector<1x8x4xf32> to vector<8x4xf32>
    %737 = vector.shape_cast %734 : vector<8x4xf32> to vector<1x8x4xf32>
    tpu.vector_store %arg6[%c6_356, %c0_357, %c0_358], %737 {strides = array<i32>} : memref<8x8x4xf32, #tpu.memory_space<vmem>>, vector<1x8x4xf32>,
    %738 = vector.extract_strided_slice %568 {offsets = [7, 0], sizes = [1, 4], strides = [1, 1]} : vector<8x4xf32> to vector<1x4xf32>
    %739 = vector.extract_strided_slice %569 {offsets = [7, 0], sizes = [1, 4], strides = [1, 1]} : vector<8x4xf32> to vector<1x4xf32>
    %740 = vector.broadcast %738 : vector<1x4xf32> to vector<8x4xf32>
    %741 = arith.mulf %740, %568 : vector<8x4xf32>
    %742 = vector.broadcast %739 : vector<1x4xf32> to vector<8x4xf32>
    %743 = arith.mulf %742, %569 : vector<8x4xf32>
    %744 = arith.addf %741, %743 : vector<8x4xf32>
    %745 = vector.broadcast %739 : vector<1x4xf32> to vector<8x4xf32>
    %746 = arith.mulf %745, %568 : vector<8x4xf32>
    %747 = vector.broadcast %738 : vector<1x4xf32> to vector<8x4xf32>
    %748 = arith.mulf %747, %569 : vector<8x4xf32>
    %749 = arith.subf %746, %748 : vector<8x4xf32>
    %c7_359 = arith.constant 7 : index
    %c0_360 = arith.constant 0 : index
    %c0_361 = arith.constant 0 : index
    %750 = vector.load %arg5[%c7_359, %c0_360, %c0_361] : memref<8x8x4xf32, #tpu.memory_space<vmem>>, vector<1x8x4xf32>
    %751 = vector.shape_cast %750 : vector<1x8x4xf32> to vector<8x4xf32>
    %752 = arith.addf %751, %744 : vector<8x4xf32>
    %c7_362 = arith.constant 7 : index
    %c0_363 = arith.constant 0 : index
    %c0_364 = arith.constant 0 : index
    %753 = vector.load %arg5[%c7_362, %c0_363, %c0_364] : memref<8x8x4xf32, #tpu.memory_space<vmem>>, vector<1x8x4xf32>
    %754 = vector.shape_cast %753 : vector<1x8x4xf32> to vector<8x4xf32>
    %755 = vector.shape_cast %752 : vector<8x4xf32> to vector<1x8x4xf32>
    tpu.vector_store %arg5[%c7_362, %c0_363, %c0_364], %755 {strides = array<i32>} : memref<8x8x4xf32, #tpu.memory_space<vmem>>, vector<1x8x4xf32>,
    %c7_365 = arith.constant 7 : index
    %c0_366 = arith.constant 0 : index
    %c0_367 = arith.constant 0 : index
    %756 = vector.load %arg6[%c7_365, %c0_366, %c0_367] : memref<8x8x4xf32, #tpu.memory_space<vmem>>, vector<1x8x4xf32>
    %757 = vector.shape_cast %756 : vector<1x8x4xf32> to vector<8x4xf32>
    %758 = arith.addf %757, %749 : vector<8x4xf32>
    %c7_368 = arith.constant 7 : index
    %c0_369 = arith.constant 0 : index
    %c0_370 = arith.constant 0 : index
    %759 = vector.load %arg6[%c7_368, %c0_369, %c0_370] : memref<8x8x4xf32, #tpu.memory_space<vmem>>, vector<1x8x4xf32>
    %760 = vector.shape_cast %759 : vector<1x8x4xf32> to vector<8x4xf32>
    %761 = vector.shape_cast %758 : vector<8x4xf32> to vector<1x8x4xf32>
    tpu.vector_store %arg6[%c7_368, %c0_369, %c0_370], %761 {strides = array<i32>} : memref<8x8x4xf32, #tpu.memory_space<vmem>>, vector<1x8x4xf32>,
    return
  }
  func.func @transform_0(%arg0: i32) -> (i32, i32, i32) {
    %c0_i32 = arith.constant 0 : i32
    %c0_i32_0 = arith.constant 0 : i32
    %c0_i32_1 = arith.constant 0 : i32
    %c0_i32_2 = arith.constant 0 : i32
    return %c0_i32, %c0_i32_0, %c0_i32_1 : i32, i32, i32
  }
  func.func @transform_1(%arg0: i32) -> (i32, i32, i32) {
    %c0_i32 = arith.constant 0 : i32
    %c0_i32_0 = arith.constant 0 : i32
    %c0_i32_1 = arith.constant 0 : i32
    %c0_i32_2 = arith.constant 0 : i32
    return %c0_i32, %c0_i32_0, %c0_i32_1 : i32, i32, i32
  }
  func.func @transform_2(%arg0: i32) -> (i32, i32) {
    %c0_i32 = arith.constant 0 : i32
    %c0_i32_0 = arith.constant 0 : i32
    return %c0_i32, %arg0 : i32, i32
  }
  func.func @transform_3(%arg0: i32) -> (i32, i32) {
    %c0_i32 = arith.constant 0 : i32
    %c0_i32_0 = arith.constant 0 : i32
    return %c0_i32, %arg0 : i32, i32
  }
  func.func @transform_4(%arg0: i32) -> (i32, i32, i32) {
    %c0_i32 = arith.constant 0 : i32
    %c0_i32_0 = arith.constant 0 : i32
    %c0_i32_1 = arith.constant 0 : i32
    return %c0_i32, %c0_i32_0, %arg0 : i32, i32, i32
  }
  func.func @transform_5(%arg0: i32) -> (i32, i32, i32) {
    %c0_i32 = arith.constant 0 : i32
    %c0_i32_0 = arith.constant 0 : i32
    %c0_i32_1 = arith.constant 0 : i32
    return %c0_i32, %c0_i32_0, %arg0 : i32, i32, i32
  }
}

</mosaic_0001>

<bundles_post_ra>
// kernel: tpu_custom_call.1
= control target key start
LH: loop header
LB: loop body
LE: loop exit
PB: predicated region body
PF: predicated region fallthrough
CT: control target
= control target key end

     0   :  { %11 = vsyncpa [#allocation3], 0  ;;  %s10115_s0 = inlined_call_operand.hbm [shape: f32[4,8,8], index: 0, kind: input, shape index: {}]   ;;  %s10116_s1 = inlined_call_operand.hbm [shape: f32[4,8,8], index: 1, kind: input, shape index: {}]   ;;  %s10117_s2 = inlined_call_operand.vmem [shape: f32[8,4], index: 2, kind: input, shape index: {}]   ;;  %s10118_s3 = inlined_call_operand.vmem [shape: f32[8,4], index: 3, kind: input, shape index: {}]   ;;  %s10119_s4 = inlined_call_operand.vmem [shape: f32[8,8,4], index: 4, kind: output, shape index: {0}]   ;;  %s10120_s5 = inlined_call_operand.vmem [shape: f32[8,8,4], index: 5, kind: output, shape index: {1}]  }
   0x1   :  { %12 = vsyncpa [#allocation5], 0  ;;  %s8681_s18 = smov [#allocation2]  }
   0x2   :  { %s18_s19 = sshll.u32 %s8681_s18, 4  ;;  %s19_s19 = int_to_ptr.vmem [resolvable:$true] %s18_s19 }
   0x3   :  { %s8645_s20 = scalar_lea.vmem %s19_s19, 512  ;;  %p8650_p1 = scmp.lt.s32.totalorder %s19_s19, %s19_s19 }
   0x4   :  { %p8646_p0 = scmp.ne.s32.totalorder %s19_s19, %s8645_s20  ;;  %p8651_p2 = scmp.lt.s32.totalorder %s8645_s20, %s8645_s20 }
   0x6   :  { %p8652_p3 = por %p8651_p2, %p8650_p1 }
   0x8   :  { %p8653_p4 = pnand %p8652_p3, %p8646_p0 }
   0xa   :  { %8656 = shalt.err (!%p8653_p4)
}
   0xb   :  { %s8682_s21 = smov 128   ;;  %s8683_s22 = smov 8  }
   0xc   :  { %24 = dma.hbm_to_vmem [thread:$0]  %s10115_s0, 512, %s19_s19, [#allocation3], %s8682_s21, %s8682_s21, %s8683_s22  }
   0xd   :  { %s8684_s25 = smov [#allocation4]  }
   0xe   :  { %s30_s26 = sshll.u32 %s8684_s25, 4  ;;  %s31_s26 = int_to_ptr.vmem [resolvable:$true] %s30_s26 }
   0xf   :  { %s8665_s27 = scalar_lea.vmem %s31_s26, 512  ;;  %p8670_p6 = scmp.lt.s32.totalorder %s31_s26, %s31_s26 }
  0x10   :  { %p8666_p5 = scmp.ne.s32.totalorder %s31_s26, %s8665_s27  ;;  %p8671_p7 = scmp.lt.s32.totalorder %s8665_s27, %s8665_s27 }
  0x12   :  { %p8672_p8 = por %p8671_p7, %p8670_p6 }
  0x14   :  { %p8673_p9 = pnand %p8672_p8, %p8666_p5 }
  0x16   :  { %8676 = shalt.err (!%p8673_p9)
}
  0x17   :  { %36 = dma.hbm_to_vmem [thread:$0]  %s10116_s1, 512, %s31_s26, [#allocation5], %s8682_s21, %s8682_s21, %s8683_s22  }
  0x18   :  { %8677 = dma.done.wait [#allocation3], 512  }
  0x19   :  { %8678 = vsyncadd [#allocation3], 4294966784 }
  0x1a   :  { %8679 = dma.done.wait [#allocation5], 512  }
  0x1b   :  { %8680 = vsyncadd [#allocation5], 4294966784  ;;  %v8685_v0 = vmov 0.0   ;;  %vm8686_vm0 = vmmov 0   ;;  %vm51_vm1 = vcmask 64512   ;;  %v47_v1 = vld [vmem:[%s10117_s2] sm:$0xff] }
  0x1c   :  { %8151 = vmatprep.subr.mxu0 %v8685_v0  ;;  %8156 = vmatprep.subr.mxu1 %v8685_v0  ;;  %v49_v2 = vld [vmem:[#allocation2] sm:$0xff]  ;;  %v8735_v4 = vand.u32 4294901760, %v47_v1  ;;  %v1987_v27 = vld [vmem:[#allocation2 + $0x8] sm:$0xff]  ;;  %v3942_v41 = vld [vmem:[#allocation2 + $0x10] sm:$0xff]  ;;  %vm1857_vm2 = vcmask 31744  }
  0x1d   :  { %8153 = vmatprep.mubr.msk.f32.mxu0 %vm8686_vm0, %v8685_v0  ;;  %8158 = vmatprep.mubr.msk.f32.mxu1 %vm8686_vm0, %v8685_v0  ;;  %v48_v3 = vld [vmem:[%s10118_s3] sm:$0xff]  ;;  %v53_v5 = vsel %vm51_vm1, %v49_v2, 0  ;;  %v1991_v28 = vsel %vm51_vm1, %v1987_v27, 0  ;;  %v1989_v31 = vld [vmem:[#allocation4 + $0x8] sm:$0xff]  ;;  %v3946_v42 = vsel %vm51_vm1, %v3942_v41, 0  ;;  %v3944_v45 = vld [vmem:[#allocation4 + $0x10] sm:$0xff] }
  0x1e   :  { %v50_v6 = vld [vmem:[#allocation4] sm:$0xff]  ;;  %v8738_v7 = vand.u32 4294901760, %v53_v5  ;;  %v8740_v8 = vand.u32 4294901760, %v48_v3  ;;  %8152 = vmatpush3.msra.mxu0 %v8735_v4  ;;  %v8745_v10 = vsub.f32 %v47_v1, %v8735_v4  ;;  %v8852_v29 = vand.u32 4294901760, %v1991_v28  ;;  %v5897_v55 = vld [vmem:[#allocation2 + $0x18] sm:$0xff] }
  0x1f   :  { %v502_v9 = vsel %vm51_vm1, %v50_v6, 0  ;;  %8161 = vmatprep.subr.mxu0 %v8685_v0  ;;  %v2440_v33 = vsel %vm51_vm1, %v1989_v31, 0  ;;  %v8989_v43 = vand.u32 4294901760, %v3946_v42  ;;  %v4395_v47 = vsel %vm51_vm1, %v3944_v45, 0  ;;  %v5899_v59 = vld [vmem:[#allocation4 + $0x18] sm:$0xff] }
  0x20   :  { %v8749_v11 = vsub.f32 %v53_v5, %v8738_v7  ;;  %v8751_v12 = vand.u32 4294901760, %v502_v9  ;;  %v8754_v13 = vand.u32 4294901760, %v8745_v10  ;;  %v8760_v15 = vsub.f32 %v48_v3, %v8740_v8 }
  0x21   :  { %v8865_v30 = vsub.f32 %v1991_v28, %v8852_v29  ;;  %v8893_v35 = vand.u32 4294901760, %v2440_v33  ;;  %v9002_v44 = vsub.f32 %v3946_v42, %v8989_v43  ;;  %v9030_v49 = vand.u32 4294901760, %v4395_v47 }
  0x22   :  { %v8757_v14 = vand.u32 4294901760, %v8749_v11  ;;  %v165_v16 = vsub.f32 %v8745_v10, %v8754_v13  ;;  %v8767_v18 = vsub.f32 %v502_v9, %v8751_v12  ;;  %v8774_v21 = vand.u32 4294901760, %v8760_v15 }
  0x23   :  { %v8878_v32 = vand.u32 4294901760, %v8865_v30  ;;  %v8908_v37 = vsub.f32 %v2440_v33, %v8893_v35  ;;  %v9015_v46 = vand.u32 4294901760, %v9002_v44  ;;  %v9045_v51 = vsub.f32 %v4395_v47, %v9030_v49 }
  0x24   :  { %v124_v17 = vsub.f32 %v8749_v11, %v8757_v14  ;;  %v8769_v19 = vand.u32 4294901760, %v165_v16  ;;  %v572_v22 = vand.u32 4294901760, %v8767_v18  ;;  %v614_v23 = vsub.f32 %v8760_v15, %v8774_v21 }
  0x25   :  { %v2062_v34 = vsub.f32 %v8865_v30, %v8878_v32  ;;  %v2510_v38 = vand.u32 4294901760, %v8908_v37  ;;  %v4017_v48 = vsub.f32 %v9002_v44, %v9015_v46  ;;  %v4465_v52 = vand.u32 4294901760, %v9045_v51 }
  0x26   :  { %v8771_v20 = vand.u32 4294901760, %v124_v17  ;;  %8157 = vmatpush3.msra.mxu1 %v8769_v19  ;;  %v573_v24 = vsub.f32 %v8767_v18, %v572_v22  ;;  %v8798_v25 = vand.u32 4294901760, %v614_v23  ;;  %v5901_v56 = vsel %vm51_vm1, %v5897_v55, 0 }
  0x27   :  { %8159 = vmatmul.mubr.f32.vlgmr.msra.gmra.mxu1 %v8738_v7  ;;  %8166 = vmatprep.subr.mxu1 %v8685_v0  ;;  %v8905_v36 = vand.u32 4294901760, %v2062_v34  ;;  %v2511_v39 = vsub.f32 %v8908_v37, %v2510_v38  ;;  %v9042_v50 = vand.u32 4294901760, %v4017_v48  ;;  %v4466_v53 = vsub.f32 %v9045_v51, %v4465_v52 }
  0x28   :  { %8154 = vmatmul.mubr.f32.vlgmr.msra.gmra.mxu0 %v8771_v20  ;;  %8167 = vmatpush3.msra.mxu1 %v8735_v4  ;;  %v574_v26 = vand.u32 4294901760, %v573_v24  ;;  %v9126_v57 = vand.u32 4294901760, %v5901_v56  ;;  %v6350_v61 = vsel %vm51_vm1, %v5899_v59, 0 }
  0x29   :  { %8162 = vmatpush3.msra.mxu0 %v8745_v10  ;;  %8163 = vmatprep.mubr.msk.f32.mxu0 %vm8686_vm0, %v8685_v0  ;;  %v2512_v40 = vand.u32 4294901760, %v2511_v39  ;;  %v4467_v54 = vand.u32 4294901760, %v4466_v53  ;;  %v9167_v63 = vand.u32 4294901760, %v6350_v61 }
  0x2a   :  { %8168 = vmatprep.mubr.msk.f32.mxu1 %vm8686_vm0, %v8685_v0  ;;  %8171 = vmatprep.subr.mxu0 %v8685_v0  ;;  %v9139_v58 = vsub.f32 %v5901_v56, %v9126_v57 }
  0x2b   :  { %8169 = vmatmul.mubr.f32.vlgmr.msra.gmra.mxu1 %v8757_v14  ;;  %8176 = vmatprep.subr.mxu1 %v8685_v0  ;;  %v9182_v2 = vsub.f32 %v6350_v61, %v9167_v63 }
  0x2c   :  { %8164 = vmatmul.mubr.f32.vlgmr.msra.gmra.mxu0 %v8749_v11  ;;  %8177 = vmatpush3.msra.mxu1 %v8735_v4  ;;  %v9152_v60 = vand.u32 4294901760, %v9139_v58 }
  0x2d   :  { %8172 = vmatpush3.msra.mxu0 %v8754_v13  ;;  %8173 = vmatprep.mubr.msk.f32.mxu0 %vm8686_vm0, %v8685_v0  ;;  %v6420_v3 = vand.u32 4294901760, %v9182_v2 }
  0x2e   :  { %8178 = vmatprep.mubr.msk.f32.mxu1 %vm8686_vm0, %v8685_v0  ;;  %8181 = vmatprep.subr.mxu0 %v8685_v0  ;;  %v5972_v62 = vsub.f32 %v9139_v58, %v9152_v60 }
  0x2f   :  { %8179 = vmatmul.mubr.f32.vlgmr.msra.gmra.mxu1 %v8738_v7  ;;  %8186 = vmatprep.subr.mxu1 %v8685_v0  ;;  %v6421_v5 = vsub.f32 %v9182_v2, %v6420_v3 }
  0x30   :  { %8174 = vmatmul.mubr.f32.vlgmr.msra.gmra.mxu0 %v8738_v7  ;;  %8187 = vmatpush3.msra.mxu1 %v8798_v25  ;;  %v9179_v1 = vand.u32 4294901760, %v5972_v62 }
  0x31   :  { %8182 = vmatpush3.msra.mxu0 %v8740_v8  ;;  %8183 = vmatprep.mubr.msk.f32.mxu0 %vm8686_vm0, %v8685_v0  ;;  %v6422_v6 = vand.u32 4294901760, %v6421_v5 }
  0x32   :  { %8188 = vmatprep.mubr.msk.f32.mxu1 %vm8686_vm0, %v8685_v0  ;;  %8191 = vmatprep.subr.mxu0 %v8685_v0 }
  0x33   :  { %8189 = vmatmul.mubr.f32.vlgmr.msra.gmra.mxu1 %v8751_v12  ;;  %8196 = vmatprep.subr.mxu1 %v8685_v0 }
  0x34   :  { %8184 = vmatmul.mubr.f32.vlgmr.msra.gmra.mxu0 %v574_v26  ;;  %8197 = vmatpush3.msra.mxu1 %v8740_v8 }
  0x35   :  { %8192 = vmatpush3.msra.mxu0 %v8760_v15  ;;  %8193 = vmatprep.mubr.msk.f32.mxu0 %vm8686_vm0, %v8685_v0 }
  0x36   :  { %8198 = vmatprep.mubr.msk.f32.mxu1 %vm8686_vm0, %v8685_v0  ;;  %8201 = vmatprep.subr.mxu0 %v8685_v0 }
  0x37   :  { %8199 = vmatmul.mubr.f32.vlgmr.msra.gmra.mxu1 %v572_v22  ;;  %8206 = vmatprep.subr.mxu1 %v8685_v0 }
  0x38   :  { %8194 = vmatmul.mubr.f32.vlgmr.msra.gmra.mxu0 %v8767_v18  ;;  %8207 = vmatpush3.msra.mxu1 %v8740_v8 }
  0x39   :  { %8202 = vmatpush3.msra.mxu0 %v8774_v21  ;;  %8203 = vmatprep.mubr.msk.f32.mxu0 %vm8686_vm0, %v8685_v0 }
  0x3a   :  { %8208 = vmatprep.mubr.msk.f32.mxu1 %vm8686_vm0, %v8685_v0  ;;  %8211 = vmatprep.subr.mxu0 %v8685_v0 }
  0x3b   :  { %8209 = vmatmul.mubr.f32.vlgmr.msra.gmra.mxu1 %v8751_v12  ;;  %8216 = vmatprep.subr.mxu1 %v8685_v0 }
  0x3c   :  { %8204 = vmatmul.mubr.f32.vlgmr.msra.gmra.mxu0 %v8751_v12  ;;  %8217 = vmatpush3.msra.mxu1 %v8769_v19 }
  0x3d   :  { %8212 = vmatpush3.msra.mxu0 %v8735_v4  ;;  %8213 = vmatprep.mubr.msk.f32.mxu0 %vm8686_vm0, %v8685_v0 }
  0x3e   :  { %8218 = vmatprep.mubr.msk.f32.mxu1 %vm8686_vm0, %v8685_v0  ;;  %8221 = vmatprep.subr.mxu0 %v8685_v0 }
  0x3f   :  { %8219 = vmatmul.mubr.f32.vlgmr.msra.gmra.mxu1 %v8751_v12  ;;  %8226 = vmatprep.subr.mxu1 %v8685_v0 }
  0x40   :  { %8214 = vmatmul.mubr.f32.vlgmr.msra.gmra.mxu0 %v574_v26  ;;  %8227 = vmatpush3.msra.mxu1 %v8735_v4 }
  0x41   :  { %8222 = vmatpush3.msra.mxu0 %v8745_v10  ;;  %8223 = vmatprep.mubr.msk.f32.mxu0 %vm8686_vm0, %v8685_v0 }
  0x42   :  { %8228 = vmatprep.mubr.msk.f32.mxu1 %vm8686_vm0, %v8685_v0  ;;  %8231 = vmatprep.subr.mxu0 %v8685_v0 }
  0x43   :  { %8229 = vmatmul.mubr.f32.vlgmr.msra.gmra.mxu1 %v572_v22  ;;  %8236 = vmatprep.subr.mxu1 %v8685_v0 }
  0x44   :  { %8224 = vmatmul.mubr.f32.vlgmr.msra.gmra.mxu0 %v8767_v18  ;;  %8237 = vmatpush3.msra.mxu1 %v8735_v4 }
  0x45   :  { %8232 = vmatpush3.msra.mxu0 %v8754_v13  ;;  %8233 = vmatprep.mubr.msk.f32.mxu0 %vm8686_vm0, %v8685_v0 }
  0x46   :  { %8238 = vmatprep.mubr.msk.f32.mxu1 %vm8686_vm0, %v8685_v0  ;;  %8241 = vmatprep.subr.mxu0 %v8685_v0 }
  0x47   :  { %8239 = vmatmul.mubr.f32.vlgmr.msra.gmra.mxu1 %v8751_v12  ;;  %8246 = vmatprep.subr.mxu1 %v8685_v0 }
  0x48   :  { %8234 = vmatmul.mubr.f32.vlgmr.msra.gmra.mxu0 %v8751_v12  ;;  %8247 = vmatpush3.msra.mxu1 %v8798_v25 }
  0x49   :  { %8242 = vmatpush3.msra.mxu0 %v8740_v8  ;;  %8243 = vmatprep.mubr.msk.f32.mxu0 %vm8686_vm0, %v8685_v0 }
  0x4a   :  { %8248 = vmatprep.mubr.msk.f32.mxu1 %vm8686_vm0, %v8685_v0  ;;  %8251 = vmatprep.subr.mxu0 %v8685_v0 }
  0x4b   :  { %8249 = vmatmul.mubr.f32.vlgmr.msra.gmra.mxu1 %v8738_v7  ;;  %8256 = vmatprep.subr.mxu1 %v8685_v0 }
  0x4c   :  { %8244 = vmatmul.mubr.f32.vlgmr.msra.gmra.mxu0 %v8771_v20  ;;  %8257 = vmatpush3.msra.mxu1 %v8740_v8 }
  0x4d   :  { %8252 = vmatpush3.msra.mxu0 %v8760_v15  ;;  %8253 = vmatprep.mubr.msk.f32.mxu0 %vm8686_vm0, %v8685_v0 }
  0x4e   :  { %8258 = vmatprep.mubr.msk.f32.mxu1 %vm8686_vm0, %v8685_v0  ;;  %8261 = vmatprep.subr.mxu0 %v8685_v0 }
  0x4f   :  { %8259 = vmatmul.mubr.f32.vlgmr.msra.gmra.mxu1 %v8757_v14  ;;  %8266 = vmatprep.subr.mxu1 %v8685_v0 }
  0x50   :  { %8254 = vmatmul.mubr.f32.vlgmr.msra.gmra.mxu0 %v8749_v11  ;;  %8267 = vmatpush3.msra.mxu1 %v8740_v8 }
  0x51   :  { %8262 = vmatpush3.msra.mxu0 %v8774_v21  ;;  %8263 = vmatprep.mubr.msk.f32.mxu0 %vm8686_vm0, %v8685_v0 }
  0x52   :  { %8268 = vmatprep.mubr.msk.f32.mxu1 %vm8686_vm0, %v8685_v0  ;;  %8271 = vmatprep.subr.mxu0 %v8685_v0 }
  0x53   :  { %8269 = vmatmul.mubr.f32.vlgmr.msra.gmra.mxu1 %v8738_v7  ;;  %8276 = vmatprep.subr.mxu1 %v8685_v0 }
  0x54   :  { %8264 = vmatmul.mubr.f32.vlgmr.msra.gmra.mxu0 %v8738_v7  ;;  %8277 = vmatpush3.msra.mxu1 %v8769_v19 }
  0x55   :  { %8272 = vmatpush3.msra.mxu0 %v8735_v4  ;;  %8273 = vmatprep.mubr.msk.f32.mxu0 %vm8686_vm0, %v8685_v0 }
  0x56   :  { %8278 = vmatprep.mubr.msk.f32.mxu1 %vm8686_vm0, %v8685_v0  ;;  %8281 = vmatprep.subr.mxu0 %v8685_v0 }
  0x57   :  { %8279 = vmatmul.mubr.f32.vlgmr.msra.gmra.mxu1 %v8852_v29  ;;  %8286 = vmatprep.subr.mxu1 %v8685_v0 }
  0x58   :  { %8274 = vmatmul.mubr.f32.vlgmr.msra.gmra.mxu0 %v8905_v36  ;;  %8287 = vmatpush3.msra.mxu1 %v8735_v4 }
  0x59   :  { %8282 = vmatpush3.msra.mxu0 %v8745_v10  ;;  %8283 = vmatprep.mubr.msk.f32.mxu0 %vm8686_vm0, %v8685_v0 }
  0x5a   :  { %8288 = vmatprep.mubr.msk.f32.mxu1 %vm8686_vm0, %v8685_v0  ;;  %8291 = vmatprep.subr.mxu0 %v8685_v0 }
  0x5b   :  { %8289 = vmatmul.mubr.f32.vlgmr.msra.gmra.mxu1 %v8878_v32  ;;  %8296 = vmatprep.subr.mxu1 %v8685_v0 }
  0x5c   :  { %8284 = vmatmul.mubr.f32.vlgmr.msra.gmra.mxu0 %v8865_v30  ;;  %8297 = vmatpush3.msra.mxu1 %v8735_v4 }
  0x5d   :  { %8292 = vmatpush3.msra.mxu0 %v8754_v13  ;;  %8293 = vmatprep.mubr.msk.f32.mxu0 %vm8686_vm0, %v8685_v0 }
  0x5e   :  { %8298 = vmatprep.mubr.msk.f32.mxu1 %vm8686_vm0, %v8685_v0  ;;  %8301 = vmatprep.subr.mxu0 %v8685_v0 }
  0x5f   :  { %8299 = vmatmul.mubr.f32.vlgmr.msra.gmra.mxu1 %v8852_v29  ;;  %8306 = vmatprep.subr.mxu1 %v8685_v0 }
  0x60   :  { %8294 = vmatmul.mubr.f32.vlgmr.msra.gmra.mxu0 %v8852_v29  ;;  %8307 = vmatpush3.msra.mxu1 %v8798_v25 }
  0x61   :  { %8302 = vmatpush3.msra.mxu0 %v8740_v8  ;;  %8303 = vmatprep.mubr.msk.f32.mxu0 %vm8686_vm0, %v8685_v0 }
  0x62   :  { %8308 = vmatprep.mubr.msk.f32.mxu1 %vm8686_vm0, %v8685_v0  ;;  %8311 = vmatprep.subr.mxu0 %v8685_v0 }
  0x63   :  { %8309 = vmatmul.mubr.f32.vlgmr.msra.gmra.mxu1 %v8893_v35  ;;  %8316 = vmatprep.subr.mxu1 %v8685_v0 }
  0x64   :  { %8304 = vmatmul.mubr.f32.vlgmr.msra.gmra.mxu0 %v2512_v40  ;;  %8317 = vmatpush3.msra.mxu1 %v8740_v8 }
  0x65   :  { %8312 = vmatpush3.msra.mxu0 %v8760_v15  ;;  %8313 = vmatprep.mubr.msk.f32.mxu0 %vm8686_vm0, %v8685_v0 }
  0x66   :  { %8318 = vmatprep.mubr.msk.f32.mxu1 %vm8686_vm0, %v8685_v0  ;;  %8321 = vmatprep.subr.mxu0 %v8685_v0 }
  0x67   :  { %8319 = vmatmul.mubr.f32.vlgmr.msra.gmra.mxu1 %v2510_v38  ;;  %8326 = vmatprep.subr.mxu1 %v8685_v0 }
  0x68   :  { %8314 = vmatmul.mubr.f32.vlgmr.msra.gmra.mxu0 %v8908_v37  ;;  %8327 = vmatpush3.msra.mxu1 %v8740_v8 }
  0x69   :  { %8322 = vmatpush3.msra.mxu0 %v8774_v21  ;;  %8323 = vmatprep.mubr.msk.f32.mxu0 %vm8686_vm0, %v8685_v0 }
  0x6a   :  { %8328 = vmatprep.mubr.msk.f32.mxu1 %vm8686_vm0, %v8685_v0  ;;  %8331 = vmatprep.subr.mxu0 %v8685_v0 }
  0x6b   :  { %8329 = vmatmul.mubr.f32.vlgmr.msra.gmra.mxu1 %v8893_v35  ;;  %8336 = vmatprep.subr.mxu1 %v8685_v0 }
  0x6c   :  { %8324 = vmatmul.mubr.f32.vlgmr.msra.gmra.mxu0 %v8893_v35  ;;  %8337 = vmatpush3.msra.mxu1 %v8769_v19 }
  0x6d   :  { %8332 = vmatpush3.msra.mxu0 %v8735_v4  ;;  %8333 = vmatprep.mubr.msk.f32.mxu0 %vm8686_vm0, %v8685_v0 }
  0x6e   :  { %8338 = vmatprep.mubr.msk.f32.mxu1 %vm8686_vm0, %v8685_v0  ;;  %8341 = vmatprep.subr.mxu0 %v8685_v0 }
  0x6f   :  { %8339 = vmatmul.mubr.f32.vlgmr.msra.gmra.mxu1 %v8893_v35  ;;  %8346 = vmatprep.subr.mxu1 %v8685_v0 }
  0x70   :  { %8334 = vmatmul.mubr.f32.vlgmr.msra.gmra.mxu0 %v2512_v40  ;;  %8347 = vmatpush3.msra.mxu1 %v8735_v4 }
  0x71   :  { %8342 = vmatpush3.msra.mxu0 %v8745_v10  ;;  %8343 = vmatprep.mubr.msk.f32.mxu0 %vm8686_vm0, %v8685_v0 }
  0x72   :  { %8348 = vmatprep.mubr.msk.f32.mxu1 %vm8686_vm0, %v8685_v0  ;;  %8351 = vmatprep.subr.mxu0 %v8685_v0 }
  0x73   :  { %8349 = vmatmul.mubr.f32.vlgmr.msra.gmra.mxu1 %v2510_v38  ;;  %8356 = vmatprep.subr.mxu1 %v8685_v0 }
  0x74   :  { %8344 = vmatmul.mubr.f32.vlgmr.msra.gmra.mxu0 %v8908_v37  ;;  %8357 = vmatpush3.msra.mxu1 %v8735_v4 }
  0x75   :  { %8352 = vmatpush3.msra.mxu0 %v8754_v13  ;;  %8353 = vmatprep.mubr.msk.f32.mxu0 %vm8686_vm0, %v8685_v0 }
  0x76   :  { %8358 = vmatprep.mubr.msk.f32.mxu1 %vm8686_vm0, %v8685_v0  ;;  %8361 = vmatprep.subr.mxu0 %v8685_v0 }
  0x77   :  { %8359 = vmatmul.mubr.f32.vlgmr.msra.gmra.mxu1 %v8893_v35  ;;  %8366 = vmatprep.subr.mxu1 %v8685_v0 }
  0x78   :  { %8354 = vmatmul.mubr.f32.vlgmr.msra.gmra.mxu0 %v8893_v35  ;;  %8367 = vmatpush3.msra.mxu1 %v8798_v25 }
  0x79   :  { %8362 = vmatpush3.msra.mxu0 %v8740_v8  ;;  %8363 = vmatprep.mubr.msk.f32.mxu0 %vm8686_vm0, %v8685_v0 }
  0x7a   :  { %8368 = vmatprep.mubr.msk.f32.mxu1 %vm8686_vm0, %v8685_v0  ;;  %8371 = vmatprep.subr.mxu0 %v8685_v0 }
  0x7b   :  { %8369 = vmatmul.mubr.f32.vlgmr.msra.gmra.mxu1 %v8852_v29  ;;  %8376 = vmatprep.subr.mxu1 %v8685_v0 }
  0x7c   :  { %8364 = vmatmul.mubr.f32.vlgmr.msra.gmra.mxu0 %v8905_v36  ;;  %8377 = vmatpush3.msra.mxu1 %v8740_v8 }
  0x7d   :  { %8372 = vmatpush3.msra.mxu0 %v8760_v15  ;;  %8373 = vmatprep.mubr.msk.f32.mxu0 %vm8686_vm0, %v8685_v0 }
  0x7e   :  { %8378 = vmatprep.mubr.msk.f32.mxu1 %vm8686_vm0, %v8685_v0  ;;  %8381 = vmatprep.subr.mxu0 %v8685_v0 }
  0x7f   :  { %8379 = vmatmul.mubr.f32.vlgmr.msra.gmra.mxu1 %v8878_v32  ;;  %8386 = vmatprep.subr.mxu1 %v8685_v0 }
  0x80   :  { %8374 = vmatmul.mubr.f32.vlgmr.msra.gmra.mxu0 %v8865_v30  ;;  %8387 = vmatpush3.msra.mxu1 %v8740_v8 }
  0x81   :  { %8382 = vmatpush3.msra.mxu0 %v8774_v21  ;;  %8383 = vmatprep.mubr.msk.f32.mxu0 %vm8686_vm0, %v8685_v0 }
  0x82   :  { %8388 = vmatprep.mubr.msk.f32.mxu1 %vm8686_vm0, %v8685_v0  ;;  %8391 = vmatprep.subr.mxu0 %v8685_v0 }
  0x83   :  { %8389 = vmatmul.mubr.f32.vlgmr.msra.gmra.mxu1 %v8852_v29  ;;  %8396 = vmatprep.subr.mxu1 %v8685_v0 }
  0x84   :  { %8384 = vmatmul.mubr.f32.vlgmr.msra.gmra.mxu0 %v8852_v29  ;;  %8397 = vmatpush3.msra.mxu1 %v8769_v19 }
  0x85   :  { %8392 = vmatpush3.msra.mxu0 %v8735_v4  ;;  %8393 = vmatprep.mubr.msk.f32.mxu0 %vm8686_vm0, %v8685_v0 }
  0x86   :  { %8398 = vmatprep.mubr.msk.f32.mxu1 %vm8686_vm0, %v8685_v0  ;;  %8401 = vmatprep.subr.mxu0 %v8685_v0 }
  0x87   :  { %8399 = vmatmul.mubr.f32.vlgmr.msra.gmra.mxu1 %v8989_v43  ;;  %8406 = vmatprep.subr.mxu1 %v8685_v0 }
  0x88   :  { %8394 = vmatmul.mubr.f32.vlgmr.msra.gmra.mxu0 %v9042_v50  ;;  %8407 = vmatpush3.msra.mxu1 %v8735_v4 }
  0x89   :  { %8402 = vmatpush3.msra.mxu0 %v8745_v10  ;;  %8403 = vmatprep.mubr.msk.f32.mxu0 %vm8686_vm0, %v8685_v0 }
  0x8a   :  { %8408 = vmatprep.mubr.msk.f32.mxu1 %vm8686_vm0, %v8685_v0  ;;  %8411 = vmatprep.subr.mxu0 %v8685_v0 }
  0x8b   :  { %8409 = vmatmul.mubr.f32.vlgmr.msra.gmra.mxu1 %v9015_v46  ;;  %8416 = vmatprep.subr.mxu1 %v8685_v0 }
  0x8c   :  { %8404 = vmatmul.mubr.f32.vlgmr.msra.gmra.mxu0 %v9002_v44  ;;  %8417 = vmatpush3.msra.mxu1 %v8735_v4 }
  0x8d   :  { %8412 = vmatpush3.msra.mxu0 %v8754_v13  ;;  %8413 = vmatprep.mubr.msk.f32.mxu0 %vm8686_vm0, %v8685_v0 }
  0x8e   :  { %8418 = vmatprep.mubr.msk.f32.mxu1 %vm8686_vm0, %v8685_v0  ;;  %8421 = vmatprep.subr.mxu0 %v8685_v0 }
  0x8f   :  { %8419 = vmatmul.mubr.f32.vlgmr.msra.gmra.mxu1 %v8989_v43  ;;  %8426 = vmatprep.subr.mxu1 %v8685_v0 }
  0x90   :  { %8414 = vmatmul.mubr.f32.vlgmr.msra.gmra.mxu0 %v8989_v43  ;;  %8427 = vmatpush3.msra.mxu1 %v8798_v25 }
  0x91   :  { %8422 = vmatpush3.msra.mxu0 %v8740_v8  ;;  %8423 = vmatprep.mubr.msk.f32.mxu0 %vm8686_vm0, %v8685_v0 }
  0x92   :  { %8428 = vmatprep.mubr.msk.f32.mxu1 %vm8686_vm0, %v8685_v0  ;;  %8431 = vmatprep.subr.mxu0 %v8685_v0 }
  0x93   :  { %8429 = vmatmul.mubr.f32.vlgmr.msra.gmra.mxu1 %v9030_v49  ;;  %8436 = vmatprep.subr.mxu1 %v8685_v0 }
  0x94   :  { %8424 = vmatmul.mubr.f32.vlgmr.msra.gmra.mxu0 %v4467_v54  ;;  %8437 = vmatpush3.msra.mxu1 %v8740_v8 }
  0x95   :  { %8432 = vmatpush3.msra.mxu0 %v8760_v15  ;;  %8433 = vmatprep.mubr.msk.f32.mxu0 %vm8686_vm0, %v8685_v0 }
  0x96   :  { %8438 = vmatprep.mubr.msk.f32.mxu1 %vm8686_vm0, %v8685_v0  ;;  %8441 = vmatprep.subr.mxu0 %v8685_v0 }
  0x97   :  { %8439 = vmatmul.mubr.f32.vlgmr.msra.gmra.mxu1 %v4465_v52  ;;  %8446 = vmatprep.subr.mxu1 %v8685_v0 }
  0x98   :  { %8434 = vmatmul.mubr.f32.vlgmr.msra.gmra.mxu0 %v9045_v51  ;;  %8447 = vmatpush3.msra.mxu1 %v8740_v8 }
  0x99   :  { %8442 = vmatpush3.msra.mxu0 %v8774_v21  ;;  %8443 = vmatprep.mubr.msk.f32.mxu0 %vm8686_vm0, %v8685_v0 }
  0x9a   :  { %8448 = vmatprep.mubr.msk.f32.mxu1 %vm8686_vm0, %v8685_v0  ;;  %8451 = vmatprep.subr.mxu0 %v8685_v0 }
  0x9b   :  { %8449 = vmatmul.mubr.f32.vlgmr.msra.gmra.mxu1 %v9030_v49  ;;  %8456 = vmatprep.subr.mxu1 %v8685_v0 }
  0x9c   :  { %8444 = vmatmul.mubr.f32.vlgmr.msra.gmra.mxu0 %v9030_v49  ;;  %8457 = vmatpush3.msra.mxu1 %v8769_v19 }
  0x9d   :  { %8452 = vmatpush3.msra.mxu0 %v8735_v4  ;;  %8453 = vmatprep.mubr.msk.f32.mxu0 %vm8686_vm0, %v8685_v0 }
  0x9e   :  { %8458 = vmatprep.mubr.msk.f32.mxu1 %vm8686_vm0, %v8685_v0  ;;  %8461 = vmatprep.subr.mxu0 %v8685_v0 }
  0x9f   :  { %8459 = vmatmul.mubr.f32.vlgmr.msra.gmra.mxu1 %v9030_v49  ;;  %8466 = vmatprep.subr.mxu1 %v8685_v0 }
  0xa0   :  { %8454 = vmatmul.mubr.f32.vlgmr.msra.gmra.mxu0 %v4467_v54  ;;  %8467 = vmatpush3.msra.mxu1 %v8735_v4 }
  0xa1   :  { %8462 = vmatpush3.msra.mxu0 %v8745_v10  ;;  %8463 = vmatprep.mubr.msk.f32.mxu0 %vm8686_vm0, %v8685_v0 }
  0xa2   :  { %8468 = vmatprep.mubr.msk.f32.mxu1 %vm8686_vm0, %v8685_v0  ;;  %8471 = vmatprep.subr.mxu0 %v8685_v0 }
  0xa3   :  { %8469 = vmatmul.mubr.f32.vlgmr.msra.gmra.mxu1 %v4465_v52  ;;  %8476 = vmatprep.subr.mxu1 %v8685_v0 }
  0xa4   :  { %8464 = vmatmul.mubr.f32.vlgmr.msra.gmra.mxu0 %v9045_v51  ;;  %8477 = vmatpush3.msra.mxu1 %v8735_v4 }
  0xa5   :  { %8472 = vmatpush3.msra.mxu0 %v8754_v13  ;;  %8473 = vmatprep.mubr.msk.f32.mxu0 %vm8686_vm0, %v8685_v0 }
  0xa6   :  { %8478 = vmatprep.mubr.msk.f32.mxu1 %vm8686_vm0, %v8685_v0  ;;  %8481 = vmatprep.subr.mxu0 %v8685_v0 }
  0xa7   :  { %8479 = vmatmul.mubr.f32.vlgmr.msra.gmra.mxu1 %v9030_v49  ;;  %8486 = vmatprep.subr.mxu1 %v8685_v0 }
  0xa8   :  { %8474 = vmatmul.mubr.f32.vlgmr.msra.gmra.mxu0 %v9030_v49  ;;  %8487 = vmatpush3.msra.mxu1 %v8798_v25 }
  0xa9   :  { %8482 = vmatpush3.msra.mxu0 %v8740_v8  ;;  %8483 = vmatprep.mubr.msk.f32.mxu0 %vm8686_vm0, %v8685_v0 }
  0xaa   :  { %8488 = vmatprep.mubr.msk.f32.mxu1 %vm8686_vm0, %v8685_v0  ;;  %8491 = vmatprep.subr.mxu0 %v8685_v0 }
  0xab   :  { %8489 = vmatmul.mubr.f32.vlgmr.msra.gmra.mxu1 %v8989_v43  ;;  %8496 = vmatprep.subr.mxu1 %v8685_v0 }
  0xac   :  { %8484 = vmatmul.mubr.f32.vlgmr.msra.gmra.mxu0 %v9042_v50  ;;  %8497 = vmatpush3.msra.mxu1 %v8740_v8 }
  0xad   :  { %8492 = vmatpush3.msra.mxu0 %v8760_v15  ;;  %8493 = vmatprep.mubr.msk.f32.mxu0 %vm8686_vm0, %v8685_v0 }
  0xae   :  { %8498 = vmatprep.mubr.msk.f32.mxu1 %vm8686_vm0, %v8685_v0  ;;  %8501 = vmatprep.subr.mxu0 %v8685_v0 }
  0xaf   :  { %8499 = vmatmul.mubr.f32.vlgmr.msra.gmra.mxu1 %v9015_v46  ;;  %8506 = vmatprep.subr.mxu1 %v8685_v0  ;;  %v1843_v46 = vlaneseq }
  0xb0   :  { %8494 = vmatmul.mubr.f32.vlgmr.msra.gmra.mxu0 %v9002_v44  ;;  %8507 = vmatpush3.msra.mxu1 %v8740_v8 }
  0xb1   :  { %8502 = vmatpush3.msra.mxu0 %v8774_v21  ;;  %8503 = vmatprep.mubr.msk.f32.mxu0 %vm8686_vm0, %v8685_v0  ;;  %v1844_v55 = vshrl.u32 %v1843_v46, 7 }
  0xb2   :  { %8508 = vmatprep.mubr.msk.f32.mxu1 %vm8686_vm0, %v8685_v0  ;;  %8511 = vmatprep.subr.mxu0 %v8685_v0 }
  0xb3   :  { %8509 = vmatmul.mubr.f32.vlgmr.msra.gmra.mxu1 %v8989_v43  ;;  %8516 = vmatprep.subr.mxu1 %v8685_v0  ;;  %v9305_v5 = vsub.s32 1, %v1844_v55 }
  0xb4   :  { %8504 = vmatmul.mubr.f32.vlgmr.msra.gmra.mxu0 %v8989_v43  ;;  %8517 = vmatpush3.msra.mxu1 %v8769_v19 }
  0xb5   :  { %8512 = vmatpush3.msra.mxu0 %v8735_v4  ;;  %8513 = vmatprep.mubr.msk.f32.mxu0 %vm8686_vm0, %v8685_v0 }
  0xb6   :  { %8518 = vmatprep.mubr.msk.f32.mxu1 %vm8686_vm0, %v8685_v0  ;;  %8521 = vmatprep.subr.mxu0 %v8685_v0 }
  0xb7   :  { %8519 = vmatmul.mubr.f32.vlgmr.msra.gmra.mxu1 %v9126_v57  ;;  %8526 = vmatprep.subr.mxu1 %v8685_v0 }
  0xb8   :  { %8514 = vmatmul.mubr.f32.vlgmr.msra.gmra.mxu0 %v9179_v1  ;;  %8527 = vmatpush3.msra.mxu1 %v8735_v4 }
  0xb9   :  { %8522 = vmatpush3.msra.mxu0 %v8745_v10  ;;  %8523 = vmatprep.mubr.msk.f32.mxu0 %vm8686_vm0, %v8685_v0 }
  0xba   :  { %8528 = vmatprep.mubr.msk.f32.mxu1 %vm8686_vm0, %v8685_v0  ;;  %8531 = vmatprep.subr.mxu0 %v8685_v0 }
  0xbb   :  { %8529 = vmatmul.mubr.f32.vlgmr.msra.gmra.mxu1 %v9152_v60  ;;  %8536 = vmatprep.subr.mxu1 %v8685_v0 }
  0xbc   :  { %8524 = vmatmul.mubr.f32.vlgmr.msra.gmra.mxu0 %v9139_v58  ;;  %8537 = vmatpush3.msra.mxu1 %v8735_v4 }
  0xbd   :  { %8532 = vmatpush3.msra.mxu0 %v8754_v13  ;;  %8533 = vmatprep.mubr.msk.f32.mxu0 %vm8686_vm0, %v8685_v0 }
  0xbe   :  { %8538 = vmatprep.mubr.msk.f32.mxu1 %vm8686_vm0, %v8685_v0  ;;  %8541 = vmatprep.subr.mxu0 %v8685_v0 }
  0xbf   :  { %8539 = vmatmul.mubr.f32.vlgmr.msra.gmra.mxu1 %v9126_v57  ;;  %8546 = vmatprep.subr.mxu1 %v8685_v0 }
  0xc0   :  { %8534 = vmatmul.mubr.f32.vlgmr.msra.gmra.mxu0 %v9126_v57  ;;  %8547 = vmatpush3.msra.mxu1 %v8798_v25 }
  0xc1   :  { %8542 = vmatpush3.msra.mxu0 %v8740_v8  ;;  %8543 = vmatprep.mubr.msk.f32.mxu0 %vm8686_vm0, %v8685_v0 }
  0xc2   :  { %8548 = vmatprep.mubr.msk.f32.mxu1 %vm8686_vm0, %v8685_v0  ;;  %8551 = vmatprep.subr.mxu0 %v8685_v0 }
  0xc3   :  { %8549 = vmatmul.mubr.f32.vlgmr.msra.gmra.mxu1 %v9167_v63  ;;  %8556 = vmatprep.subr.mxu1 %v8685_v0 }
  0xc4   :  { %8544 = vmatmul.mubr.f32.vlgmr.msra.gmra.mxu0 %v6422_v6  ;;  %8557 = vmatpush3.msra.mxu1 %v8740_v8 }
  0xc5   :  { %8552 = vmatpush3.msra.mxu0 %v8760_v15  ;;  %8553 = vmatprep.mubr.msk.f32.mxu0 %vm8686_vm0, %v8685_v0 }
  0xc6   :  { %8558 = vmatprep.mubr.msk.f32.mxu1 %vm8686_vm0, %v8685_v0  ;;  %8561 = vmatprep.subr.mxu0 %v8685_v0 }
  0xc7   :  { %8559 = vmatmul.mubr.f32.vlgmr.msra.gmra.mxu1 %v6420_v3  ;;  %8566 = vmatprep.subr.mxu1 %v8685_v0 }
  0xc8   :  { %8554 = vmatmul.mubr.f32.vlgmr.msra.gmra.mxu0 %v9182_v2  ;;  %8567 = vmatpush3.msra.mxu1 %v8740_v8 }
  0xc9   :  { %8562 = vmatpush3.msra.mxu0 %v8774_v21  ;;  %8563 = vmatprep.mubr.msk.f32.mxu0 %vm8686_vm0, %v8685_v0 }
  0xca   :  { %8568 = vmatprep.mubr.msk.f32.mxu1 %vm8686_vm0, %v8685_v0  ;;  %8571 = vmatprep.subr.mxu0 %v8685_v0 }
  0xcb   :  { %8569 = vmatmul.mubr.f32.vlgmr.msra.gmra.mxu1 %v9167_v63  ;;  %8576 = vmatprep.subr.mxu1 %v8685_v0 }
  0xcc   :  { %8564 = vmatmul.mubr.f32.vlgmr.msra.gmra.mxu0 %v9167_v63  ;;  %8577 = vmatpush3.msra.mxu1 %v8769_v19 }
  0xcd   :  { %8572 = vmatpush3.msra.mxu0 %v8735_v4  ;;  %8573 = vmatprep.mubr.msk.f32.mxu0 %vm8686_vm0, %v8685_v0 }
  0xce   :  { %8578 = vmatprep.mubr.msk.f32.mxu1 %vm8686_vm0, %v8685_v0  ;;  %8581 = vmatprep.subr.mxu0 %v8685_v0 }
  0xcf   :  { %8579 = vmatmul.mubr.f32.vlgmr.msra.gmra.mxu1 %v9167_v63  ;;  %8586 = vmatprep.subr.mxu1 %v8685_v0 }
  0xd0   :  { %8574 = vmatmul.mubr.f32.vlgmr.msra.gmra.mxu0 %v6422_v6  ;;  %8587 = vmatpush3.msra.mxu1 %v8735_v4  ;;  %v9307_v6 = vsub.s32 2, %v1844_v55 }
  0xd1   :  { %8582 = vmatpush3.msra.mxu0 %v8745_v10  ;;  %8583 = vmatprep.mubr.msk.f32.mxu0 %vm8686_vm0, %v8685_v0 }
  0xd2   :  { %8588 = vmatprep.mubr.msk.f32.mxu1 %vm8686_vm0, %v8685_v0  ;;  %8591 = vmatprep.subr.mxu0 %v8685_v0 }
  0xd3   :  { %8589 = vmatmul.mubr.f32.vlgmr.msra.gmra.mxu1 %v6420_v3  ;;  %8596 = vmatprep.subr.mxu1 %v8685_v0 }
  0xd4   :  { %8584 = vmatmul.mubr.f32.vlgmr.msra.gmra.mxu0 %v9182_v2  ;;  %8597 = vmatpush3.msra.mxu1 %v8735_v4 }
  0xd5   :  { %8592 = vmatpush3.msra.mxu0 %v8754_v13  ;;  %8593 = vmatprep.mubr.msk.f32.mxu0 %vm8686_vm0, %v8685_v0 }
  0xd6   :  { %8598 = vmatprep.mubr.msk.f32.mxu1 %vm8686_vm0, %v8685_v0  ;;  %8601 = vmatprep.subr.mxu0 %v8685_v0 }
  0xd7   :  { %8599 = vmatmul.mubr.f32.vlgmr.msra.gmra.mxu1 %v9167_v63  ;;  %8606 = vmatprep.subr.mxu1 %v8685_v0 }
  0xd8   :  { %8594 = vmatmul.mubr.f32.vlgmr.msra.gmra.mxu0 %v9167_v63  ;;  %8607 = vmatpush3.msra.mxu1 %v8798_v25 }
  0xd9   :  { %8602 = vmatpush3.msra.mxu0 %v8740_v8  ;;  %8603 = vmatprep.mubr.msk.f32.mxu0 %vm8686_vm0, %v8685_v0 }
  0xda   :  { %8608 = vmatprep.mubr.msk.f32.mxu1 %vm8686_vm0, %v8685_v0  ;;  %8611 = vmatprep.subr.mxu0 %v8685_v0 }
  0xdb   :  { %8609 = vmatmul.mubr.f32.vlgmr.msra.gmra.mxu1 %v9126_v57  ;;  %8616 = vmatprep.subr.mxu1 %v8685_v0 }
  0xdc   :  { %8604 = vmatmul.mubr.f32.vlgmr.msra.gmra.mxu0 %v9179_v1  ;;  %8617 = vmatpush3.msra.mxu1 %v8740_v8  ;;  %v9303_v1 = vsub.s32 0, %v1844_v55 }
  0xdd   :  { %8612 = vmatpush3.msra.mxu0 %v8760_v15  ;;  %8613 = vmatprep.mubr.msk.f32.mxu0 %vm8686_vm0, %v8685_v0 }
  0xde   :  { %8618 = vmatprep.mubr.msk.f32.mxu1 %vm8686_vm0, %v8685_v0  ;;  %8621 = vmatprep.subr.mxu0 %v8685_v0 }
  0xdf   :  { %8619 = vmatmul.mubr.f32.vlgmr.msra.gmra.mxu1 %v9152_v60  ;;  %8626 = vmatprep.subr.mxu1 %v8685_v0 }
  0xe0   :  { %8614 = vmatmul.mubr.f32.vlgmr.msra.gmra.mxu0 %v9139_v58  ;;  %8627 = vmatpush3.msra.mxu1 %v8740_v8 }
  0xe1   :  { %8622 = vmatpush3.msra.mxu0 %v8774_v21  ;;  %8623 = vmatprep.mubr.msk.f32.mxu0 %vm8686_vm0, %v8685_v0 }
  0xe2   :  { %8628 = vmatprep.mubr.msk.f32.mxu1 %vm8686_vm0, %v8685_v0 }
  0xe3   :  { %8629 = vmatmul.mubr.f32.vlgmr.msra.gmra.mxu1 %v9126_v57 }
  0xe4   :  { %8624 = vmatmul.mubr.f32.vlgmr.msra.gmra.mxu0 %v9126_v57 }
  0xe7   :  { %v203_v7 = vpop.f32.mrf.mxu1 }
  0xe8   :  { %v127_v4 = vpop.f32.mrf.mxu0 }
  0xe9   :  { %v8160_v10 = vpop.f32.mrf.mxu1  ;;  %v204_v30 = vadd.f32 %v203_v7, %v127_v4  ;;  %v9309_v4 = vsub.s32 3, %v1844_v55 }
  0xea   :  { %v8155_v9 = vpop.f32.mrf.mxu0  ;;  %v9313_v10 = vsub.s32 5, %v1844_v55 }
  0xeb   :  { %v351_v12 = vpop.f32.mrf.mxu1  ;;  %v9311_v9 = vsub.s32 4, %v1844_v55 }
  0xec   :  { %v277_v11 = vpop.f32.mrf.mxu0 }
  0xed   :  { %v8170_v14 = vpop.f32.mrf.mxu1  ;;  %v278_v34 = vadd.f32 %v277_v11, %v204_v30  ;;  %v9315_v11 = vsub.s32 6, %v1844_v55 }
  0xee   :  { %v8165_v13 = vpop.f32.mrf.mxu0 }
  0xef   :  { %v497_v8 = vpop.f32.mrf.mxu1  ;;  %v352_v41 = vadd.f32 %v351_v12, %v278_v34  ;;  %v9317_v12 = vsub.s32 7, %v1844_v55 }
  0xf0   :  { %v425_v15 = vpop.f32.mrf.mxu0 }
  0xf1   :  { %v8180_v17 = vpop.f32.mrf.mxu1  ;;  %v426_v50 = vadd.f32 %v425_v15, %v352_v41 }
  0xf2   :  { %v8175_v16 = vpop.f32.mrf.mxu0 }
  0xf3   :  { %v652_v19 = vpop.f32.mrf.mxu1  ;;  %v498_v59 = vadd.f32 %v497_v8, %v426_v50 }
  0xf4   :  { %v576_v18 = vpop.f32.mrf.mxu0 }
  0xf5   :  { %v8190_v0 = vpop.f32.mrf.mxu1  ;;  %v653_v27 = vadd.f32 %v652_v19, %v576_v18 }
  0xf6   :  { %v8185_v20 = vpop.f32.mrf.mxu0 }
  0xf7   :  { %v800_v22 = vpop.f32.mrf.mxu1 }
  0xf8   :  { %v726_v21 = vpop.f32.mrf.mxu0 }
  0xf9   :  { %v8200_v24 = vpop.f32.mrf.mxu1  ;;  %v727_v31 = vadd.f32 %v726_v21, %v653_v27 }
  0xfa   :  { %v8195_v23 = vpop.f32.mrf.mxu0 }
  0xfb   :  { %v946_v26 = vpop.f32.mrf.mxu1  ;;  %v801_v37 = vadd.f32 %v800_v22, %v727_v31 }
  0xfc   :  { %v874_v25 = vpop.f32.mrf.mxu0 }
  0xfd   :  { %v8210_v29 = vpop.f32.mrf.mxu1  ;;  %v875_v45 = vadd.f32 %v874_v25, %v801_v37 }
  0xfe   :  { %v8205_v28 = vpop.f32.mrf.mxu0 }
  0xff   :  { %v1098_v33 = vpop.f32.mrf.mxu1  ;;  %v947_v54 = vadd.f32 %v946_v26, %v875_v45 }
 0x100   :  { %v1022_v32 = vpop.f32.mrf.mxu0 }
 0x101   :  { %v8220_v36 = vpop.f32.mrf.mxu1  ;;  %v1099_v40 = vadd.f32 %v1098_v33, %v1022_v32  ;;  %v9301_v63 = vsub.f32 %v498_v59, %v947_v54 }
 0x102   :  { %v8215_v35 = vpop.f32.mrf.mxu0 }
 0x103   :  { %v1246_v39 = vpop.f32.mrf.mxu1  ;;  %v1846_v8 = vrot.slane %v9301_v63, %v9303_v1  ;;  %v1863_v18 = vrot.slane %v9301_v63, %v9305_v5  ;;  %v1881_v19 = vrot.slane %v9301_v63, %v9307_v6  ;;  %v1899_v20 = vrot.slane %v9301_v63, %v9309_v4 }
 0x104   :  { %v1172_v38 = vpop.f32.mrf.mxu0  ;;  %v1917_v21 = vrot.slane %v9301_v63, %v9311_v9  ;;  %v1935_v22 = vrot.slane %v9301_v63, %v9313_v10  ;;  %v1953_v23 = vrot.slane %v9301_v63, %v9315_v11  ;;  %v9335_v24 = vrot.slane %v9301_v63, %v9317_v12 }
 0x105   :  { %v8230_v43 = vpop.f32.mrf.mxu1  ;;  %v1173_v44 = vadd.f32 %v1172_v38, %v1099_v40  ;;  %v1847_v28 = vmul.f32 %v1846_v8, %v9301_v63  ;;  %v1864_v31 = vmul.f32 %v1863_v18, %v9301_v63  ;;  %v1882_v32 = vmul.f32 %v1881_v19, %v9301_v63 }
 0x106   :  { %v8225_v42 = vpop.f32.mrf.mxu0  ;;  %v1900_v33 = vmul.f32 %v1899_v20, %v9301_v63  ;;  %v9346_v35 = vmul.f32 %v1917_v21, %v9301_v63  ;;  %v9349_v36 = vmul.f32 %v1935_v22, %v9301_v63  ;;  %v9352_v37 = vmul.f32 %v1953_v23, %v9301_v63 }
 0x107   :  { %v1392_v48 = vpop.f32.mrf.mxu1  ;;  %v1247_v49 = vadd.f32 %v1246_v39, %v1173_v44  ;;  %v9356_v38 = vmul.f32 %v9335_v24, %v9301_v63 }
 0x108   :  { %v1320_v47 = vpop.f32.mrf.mxu0 }
 0x109   :  { %v8240_v52 = vpop.f32.mrf.mxu1  ;;  %v1321_v53 = vadd.f32 %v1320_v47, %v1247_v49 }
 0x10a   :  { %v8235_v51 = vpop.f32.mrf.mxu0 }
 0x10b   :  { %v1545_v57 = vpop.f32.mrf.mxu1  ;;  %v1393_v58 = vadd.f32 %v1392_v48, %v1321_v53 }
 0x10c   :  { %v1469_v56 = vpop.f32.mrf.mxu0 }
 0x10d   :  { %v8250_v61 = vpop.f32.mrf.mxu1  ;;  %v1470_v62 = vadd.f32 %v1469_v56, %v1393_v58 }
 0x10e   :  { %v8245_v60 = vpop.f32.mrf.mxu0 }
 0x10f   :  { %v1693_v3 = vpop.f32.mrf.mxu1  ;;  %v1546_v7 = vadd.f32 %v1545_v57, %v1470_v62 }
 0x110   :  { %v1619_v2 = vpop.f32.mrf.mxu0 }
 0x111   :  { %v8260_v14 = vpop.f32.mrf.mxu1  ;;  %v1620_v15 = vadd.f32 %v1619_v2, %v1546_v7 }
 0x112   :  { %v8255_v13 = vpop.f32.mrf.mxu0 }
 0x113   :  { %v1839_v17 = vpop.f32.mrf.mxu1  ;;  %v1694_v0 = vadd.f32 %v1693_v3, %v1620_v15 }
 0x114   :  { %v1767_v16 = vpop.f32.mrf.mxu0 }
 0x115   :  { %v8270_v26 = vpop.f32.mrf.mxu1  ;;  %v1768_v27 = vadd.f32 %v1767_v16, %v1694_v0 }
 0x116   :  { %v8265_v25 = vpop.f32.mrf.mxu0 }
 0x117   :  { %v9340_v30 = vpop.f32.mrf.mxu1  ;;  %v1840_v34 = vadd.f32 %v1839_v17, %v1768_v27 }
 0x118   :  { %v9338_v29 = vpop.f32.mrf.mxu0 }
 0x119   :  { %v8280_v40 = vpop.f32.mrf.mxu1  ;;  %v1851_v41 = vrot.slane %v1840_v34, %v9303_v1  ;;  %v1855_v42 = vmul.f32 %v1846_v8, %v1840_v34  ;;  %v1868_v43 = vrot.slane %v1840_v34, %v9305_v5  ;;  %v1872_v44 = vmul.f32 %v1863_v18, %v1840_v34 }
 0x11a   :  { %v8275_v39 = vpop.f32.mrf.mxu0  ;;  %v1886_v45 = vrot.slane %v1840_v34, %v9307_v6  ;;  %v1890_v46 = vmul.f32 %v1881_v19, %v1840_v34  ;;  %v1904_v47 = vrot.slane %v1840_v34, %v9309_v4  ;;  %v1908_v48 = vmul.f32 %v1899_v20, %v1840_v34 }
 0x11b   :  { %v9364_v50 = vpop.f32.mrf.mxu1  ;;  %v1852_v51 = vmul.f32 %v1851_v41, %v1840_v34  ;;  %v1854_v52 = vmul.f32 %v1851_v41, %v9301_v63  ;;  %v1869_v53 = vmul.f32 %v1868_v43, %v1840_v34  ;;  %v1871_v54 = vmul.f32 %v1868_v43, %v9301_v63 }
 0x11c   :  { %v9362_v49 = vpop.f32.mrf.mxu0  ;;  %v1887_v55 = vmul.f32 %v1886_v45, %v1840_v34  ;;  %v1889_v56 = vmul.f32 %v1886_v45, %v9301_v63  ;;  %v1905_v57 = vmul.f32 %v1904_v47, %v1840_v34  ;;  %v1907_v58 = vmul.f32 %v1904_v47, %v9301_v63 }
 0x11d   :  { %v8290_v60 = vpop.f32.mrf.mxu1  ;;  %v1853_v61 = vadd.f32 %v1852_v51, %v1847_v28  ;;  %v1856_v62 = vsub.f32 %v1854_v52, %v1855_v42  ;;  %v1870_v2 = vadd.f32 %v1869_v53, %v1864_v31  ;;  %v1873_v3 = vsub.f32 %v1871_v54, %v1872_v44 }
 0x11e   :  { %v8285_v59 = vpop.f32.mrf.mxu0  ;;  %v1888_v7 = vadd.f32 %v1887_v55, %v1882_v32  ;;  %v1891_v13 = vsub.f32 %v1889_v56, %v1890_v46  ;;  %v1906_v14 = vadd.f32 %v1905_v57, %v1900_v33  ;;  %v1909_v15 = vsub.f32 %v1907_v58, %v1908_v48 }
 0x11f   :  { %v9372_v16 = vpop.f32.mrf.mxu1  ;;  %1858 = vst.msk [vmem:[%s10119_s4] sm:$0xff] %vm1857_vm2, %v1853_v61  ;;  %1859 = vst.msk [vmem:[%s10120_s5] sm:$0xff] %vm1857_vm2, %v1856_v62  ;;  %v1922_v17 = vrot.slane %v1840_v34, %v9311_v9  ;;  %v1926_v18 = vmul.f32 %v1917_v21, %v1840_v34  ;;  %v1940_v19 = vrot.slane %v1840_v34, %v9313_v10 }
 0x120   :  { %v9370_v8 = vpop.f32.mrf.mxu0  ;;  %7861 = vst.msk [vmem:[%s10119_s4 + $0x8] sm:$0xff] %vm1857_vm2, %v1870_v2  ;;  %7862 = vst.msk [vmem:[%s10120_s5 + $0x8] sm:$0xff] %vm1857_vm2, %v1873_v3  ;;  %v1944_v20 = vmul.f32 %v1935_v22, %v1840_v34  ;;  %v1958_v0 = vrot.slane %v1840_v34, %v9315_v11  ;;  %v1962_v21 = vmul.f32 %v1953_v23, %v1840_v34 }
 0x121   :  { %7863 = vst.msk [vmem:[%s10119_s4 + $0x10] sm:$0xff] %vm1857_vm2, %v1888_v7  ;;  %7864 = vst.msk [vmem:[%s10120_s5 + $0x10] sm:$0xff] %vm1857_vm2, %v1891_v13  ;;  %v1976_v22 = vrot.slane %v1840_v34, %v9317_v12  ;;  %v1980_v25 = vmul.f32 %v9335_v24, %v1840_v34  ;;  %v8300_v27 = vpop.f32.mrf.mxu1  ;;  %v1923_v28 = vmul.f32 %v1922_v17, %v1840_v34 }
 0x122   :  { %7865 = vst.msk [vmem:[%s10119_s4 + $0x18] sm:$0xff] %vm1857_vm2, %v1906_v14  ;;  %7866 = vst.msk [vmem:[%s10120_s5 + $0x18] sm:$0xff] %vm1857_vm2, %v1909_v15  ;;  %v8295_v26 = vpop.f32.mrf.mxu0  ;;  %v1925_v31 = vmul.f32 %v1922_v17, %v9301_v63  ;;  %v1941_v32 = vmul.f32 %v1940_v19, %v1840_v34  ;;  %v1943_v33 = vmul.f32 %v1940_v19, %v9301_v63 }
 0x123   :  { %v1959_v39 = vmul.f32 %v1958_v0, %v1840_v34  ;;  %v1961_v40 = vmul.f32 %v1958_v0, %v9301_v63  ;;  %v1977_v41 = vmul.f32 %v1976_v22, %v1840_v34  ;;  %v1979_v42 = vmul.f32 %v1976_v22, %v9301_v63  ;;  %v2590_v23 = vpop.f32.mrf.mxu1 }
 0x124   :  { %v2514_v43 = vpop.f32.mrf.mxu0  ;;  %v1924_v44 = vadd.f32 %v1923_v28, %v9346_v35  ;;  %v1927_v45 = vsub.f32 %v1925_v31, %v1926_v18  ;;  %v1942_v24 = vadd.f32 %v1941_v32, %v9349_v36  ;;  %v1945_v46 = vsub.f32 %v1943_v33, %v1944_v20 }
 0x125   :  { %v1960_v47 = vadd.f32 %v1959_v39, %v9352_v37  ;;  %v1963_v48 = vsub.f32 %v1961_v40, %v1962_v21  ;;  %v1978_v51 = vadd.f32 %v1977_v41, %v9356_v38  ;;  %v1981_v52 = vsub.f32 %v1979_v42, %v1980_v25  ;;  %v8310_v54 = vpop.f32.mrf.mxu1 }
 0x126   :  { %v8305_v53 = vpop.f32.mrf.mxu0  ;;  %7867 = vst.msk [vmem:[%s10119_s4 + $0x20] sm:$0xff] %vm1857_vm2, %v1924_v44  ;;  %7868 = vst.msk [vmem:[%s10120_s5 + $0x20] sm:$0xff] %vm1857_vm2, %v1927_v45  ;;  %v2591_v55 = vadd.f32 %v2590_v23, %v2514_v43  ;;  %v2142_v58 = vadd.f32 %v9340_v30, %v9338_v29 }
 0x127   :  { %7869 = vst.msk [vmem:[%s10119_s4 + $0x28] sm:$0xff] %vm1857_vm2, %v1942_v24  ;;  %7870 = vst.msk [vmem:[%s10120_s5 + $0x28] sm:$0xff] %vm1857_vm2, %v1945_v46  ;;  %v2738_v34 = vpop.f32.mrf.mxu1 }
 0x128   :  { %7871 = vst.msk [vmem:[%s10119_s4 + $0x30] sm:$0xff] %vm1857_vm2, %v1960_v47  ;;  %7872 = vst.msk [vmem:[%s10120_s5 + $0x30] sm:$0xff] %vm1857_vm2, %v1963_v48  ;;  %v2664_v63 = vpop.f32.mrf.mxu0  ;;  %v2216_v62 = vadd.f32 %v9362_v49, %v2142_v58 }
 0x129   :  { %7873 = vst.msk [vmem:[%s10119_s4 + $0x38] sm:$0xff] %vm1857_vm2, %v1978_v51  ;;  %7874 = vst.msk [vmem:[%s10120_s5 + $0x38] sm:$0xff] %vm1857_vm2, %v1981_v52  ;;  %v8320_v36 = vpop.f32.mrf.mxu1  ;;  %v2665_v59 = vadd.f32 %v2664_v63, %v2591_v55 }
 0x12a   :  { %v8315_v35 = vpop.f32.mrf.mxu0  ;;  %v2290_v17 = vadd.f32 %v9364_v50, %v2216_v62 }
 0x12b   :  { %v2884_v38 = vpop.f32.mrf.mxu1  ;;  %v2739_v7 = vadd.f32 %v2738_v34, %v2665_v59 }
 0x12c   :  { %v2812_v37 = vpop.f32.mrf.mxu0  ;;  %v2364_v30 = vadd.f32 %v9370_v8, %v2290_v17 }
 0x12d   :  { %v8330_v57 = vpop.f32.mrf.mxu1  ;;  %v2813_v0 = vadd.f32 %v2812_v37, %v2739_v7 }
 0x12e   :  { %v8325_v56 = vpop.f32.mrf.mxu0  ;;  %v2436_v33 = vadd.f32 %v9372_v16, %v2364_v30 }
 0x12f   :  { %v3036_v61 = vpop.f32.mrf.mxu1  ;;  %v2885_v27 = vadd.f32 %v2884_v38, %v2813_v0 }
 0x130   :  { %v2960_v60 = vpop.f32.mrf.mxu0 }
 0x131   :  { %v8340_v3 = vpop.f32.mrf.mxu1  ;;  %v3037_v15 = vadd.f32 %v3036_v61, %v2960_v60  ;;  %v9457_v41 = vsub.f32 %v2436_v33, %v2885_v27 }
 0x132   :  { %v8335_v2 = vpop.f32.mrf.mxu0 }
 0x133   :  { %v3184_v14 = vpop.f32.mrf.mxu1  ;;  %v3784_v24 = vrot.slane %v9457_v41, %v9303_v1  ;;  %v3804_v48 = vrot.slane %v9457_v41, %v9305_v5  ;;  %v3824_v16 = vrot.slane %v9457_v41, %v9307_v6  ;;  %v3844_v51 = vrot.slane %v9457_v41, %v9309_v4 }
 0x134   :  { %v3110_v13 = vpop.f32.mrf.mxu0  ;;  %v9469_v53 = vrot.slane %v9457_v41, %v9311_v9  ;;  %v9473_v54 = vrot.slane %v9457_v41, %v9313_v10  ;;  %v9477_v63 = vrot.slane %v9457_v41, %v9315_v11  ;;  %v9481_v34 = vrot.slane %v9457_v41, %v9317_v12 }
 0x135   :  { %v8350_v19 = vpop.f32.mrf.mxu1  ;;  %v3111_v20 = vadd.f32 %v3110_v13, %v3037_v15  ;;  %v3785_v38 = vmul.f32 %v3784_v24, %v9457_v41  ;;  %v3805_v57 = vmul.f32 %v3804_v48, %v9457_v41  ;;  %v3825_v58 = vmul.f32 %v3824_v16, %v9457_v41 }
 0x136   :  { %v8345_v18 = vpop.f32.mrf.mxu0  ;;  %v3845_v59 = vmul.f32 %v3844_v51, %v9457_v41  ;;  %v9495_v61 = vmul.f32 %v9469_v53, %v9457_v41  ;;  %v9499_v62 = vmul.f32 %v9473_v54, %v9457_v41  ;;  %v9503_v2 = vmul.f32 %v9477_v63, %v9457_v41 }
 0x137   :  { %v3330_v22 = vpop.f32.mrf.mxu1  ;;  %v3185_v29 = vadd.f32 %v3184_v14, %v3111_v20  ;;  %v9507_v3 = vmul.f32 %v9481_v34, %v9457_v41 }
 0x138   :  { %v3258_v21 = vpop.f32.mrf.mxu0 }
 0x139   :  { %v8360_v26 = vpop.f32.mrf.mxu1  ;;  %v3259_v49 = vadd.f32 %v3258_v21, %v3185_v29 }
 0x13a   :  { %v8355_v25 = vpop.f32.mrf.mxu0 }
 0x13b   :  { %v3483_v31 = vpop.f32.mrf.mxu1  ;;  %v3331_v32 = vadd.f32 %v3330_v22, %v3259_v49 }
 0x13c   :  { %v3407_v28 = vpop.f32.mrf.mxu0 }
 0x13d   :  { %v8370_v50 = vpop.f32.mrf.mxu1  ;;  %v3408_v40 = vadd.f32 %v3407_v28, %v3331_v32 }
 0x13e   :  { %v8365_v39 = vpop.f32.mrf.mxu0 }
 0x13f   :  { %v3631_v43 = vpop.f32.mrf.mxu1  ;;  %v3484_v23 = vadd.f32 %v3483_v31, %v3408_v40 }
 0x140   :  { %v3557_v42 = vpop.f32.mrf.mxu0 }
 0x141   :  { %v8380_v45 = vpop.f32.mrf.mxu1  ;;  %v3558_v8 = vadd.f32 %v3557_v42, %v3484_v23  ;;  %v3795_v42 = vld [vmem:[%s10119_s4] sm:$0xff] }
 0x142   :  { %v8375_v44 = vpop.f32.mrf.mxu0  ;;  %v7875_v45 = vld [vmem:[%s10119_s4 + $0x8] sm:$0xff] }
 0x143   :  { %v3777_v47 = vpop.f32.mrf.mxu1  ;;  %v3632_v52 = vadd.f32 %v3631_v43, %v3558_v8  ;;  %v3798_v43 = vld [vmem:[%s10120_s5] sm:$0xff]  ;;  %v7877_v8 = vld [vmem:[%s10120_s5 + $0x8] sm:$0xff] }
 0x144   :  { %v3705_v46 = vpop.f32.mrf.mxu0 }
 0x145   :  { %v8390_v36 = vpop.f32.mrf.mxu1  ;;  %v3706_v37 = vadd.f32 %v3705_v46, %v3632_v52 }
 0x146   :  { %v8385_v35 = vpop.f32.mrf.mxu0 }
 0x147   :  { %v9486_v56 = vpop.f32.mrf.mxu1  ;;  %v9491_v60 = vadd.f32 %v3777_v47, %v3706_v37  ;;  %v7879_v47 = vld [vmem:[%s10119_s4 + $0x10] sm:$0xff] }
 0x148   :  { %v9484_v55 = vpop.f32.mrf.mxu0 }
 0x149   :  { %v8400_v13 = vpop.f32.mrf.mxu1  ;;  %v3789_v14 = vrot.slane %v9491_v60, %v9303_v1  ;;  %v3793_v15 = vmul.f32 %v3784_v24, %v9491_v60  ;;  %v3809_v17 = vrot.slane %v9491_v60, %v9305_v5  ;;  %v3813_v18 = vmul.f32 %v3804_v48, %v9491_v60 }
 0x14a   :  { %v8395_v7 = vpop.f32.mrf.mxu0  ;;  %v3829_v19 = vrot.slane %v9491_v60, %v9307_v6  ;;  %v3833_v20 = vmul.f32 %v3824_v16, %v9491_v60  ;;  %v3849_v0 = vrot.slane %v9491_v60, %v9309_v4  ;;  %v3853_v21 = vmul.f32 %v3844_v51, %v9491_v60 }
 0x14b   :  { %v9523_v29 = vpop.f32.mrf.mxu1  ;;  %v3790_v30 = vmul.f32 %v3789_v14, %v9491_v60  ;;  %v3792_v25 = vmul.f32 %v3789_v14, %v9457_v41  ;;  %v3810_v26 = vmul.f32 %v3809_v17, %v9491_v60  ;;  %v3812_v49 = vmul.f32 %v3809_v17, %v9457_v41 }
 0x14c   :  { %v9521_v22 = vpop.f32.mrf.mxu0  ;;  %v3830_v27 = vmul.f32 %v3829_v19, %v9491_v60  ;;  %v3832_v28 = vmul.f32 %v3829_v19, %v9457_v41  ;;  %v3850_v31 = vmul.f32 %v3849_v0, %v9491_v60  ;;  %v3852_v32 = vmul.f32 %v3849_v0, %v9457_v41 }
 0x14d   :  { %v8410_v39 = vpop.f32.mrf.mxu1  ;;  %v3791_v50 = vadd.f32 %v3790_v30, %v3785_v38  ;;  %v3794_v40 = vsub.f32 %v3792_v25, %v3793_v15  ;;  %v3811_v23 = vadd.f32 %v3810_v26, %v3805_v57  ;;  %v3814_v44 = vsub.f32 %v3812_v49, %v3813_v18  ;;  %v7881_v57 = vld [vmem:[%s10120_s5 + $0x10] sm:$0xff] }
 0x14e   :  { %v8405_v33 = vpop.f32.mrf.mxu0  ;;  %v3831_v24 = vadd.f32 %v3830_v27, %v3825_v58  ;;  %v3834_v46 = vsub.f32 %v3832_v28, %v3833_v20  ;;  %v3851_v48 = vadd.f32 %v3850_v31, %v3845_v59  ;;  %v3854_v16 = vsub.f32 %v3852_v32, %v3853_v21  ;;  %v7883_v58 = vld [vmem:[%s10119_s4 + $0x18] sm:$0xff] }
 0x14f   :  { %v9550_v52 = vpop.f32.mrf.mxu1  ;;  %v3796_v35 = vadd.f32 %v3795_v42, %v3791_v50  ;;  %v3799_v36 = vadd.f32 %v3798_v43, %v3794_v40  ;;  %v3816_v37 = vadd.f32 %v7875_v45, %v3811_v23  ;;  %v3819_v38 = vadd.f32 %v7877_v8, %v3814_v44  ;;  %v7885_v59 = vld [vmem:[%s10120_s5 + $0x18] sm:$0xff]  ;;  %v7887_v23 = vld [vmem:[%s10119_s4 + $0x20] sm:$0xff] }
 0x150   :  { %v9548_v51 = vpop.f32.mrf.mxu0  ;;  %v3836_v7 = vadd.f32 %v7879_v47, %v3831_v24  ;;  %v3839_v13 = vadd.f32 %v7881_v57, %v3834_v46  ;;  %v3856_v14 = vadd.f32 %v7883_v58, %v3851_v48  ;;  %v3859_v15 = vadd.f32 %v7885_v59, %v3854_v16  ;;  %v7889_v44 = vld [vmem:[%s10120_s5 + $0x20] sm:$0xff]  ;;  %v7895_v46 = vld [vmem:[%s10119_s4 + $0x30] sm:$0xff]  ;;  %v7901_v58 = vld [vmem:[%s10120_s5 + $0x38] sm:$0xff] }
 0x151   :  { %v8420_v18 = vpop.f32.mrf.mxu1  ;;  %3797 = vst.msk [vmem:[%s10119_s4] sm:$0xff] %vm1857_vm2, %v3796_v35  ;;  %3800 = vst.msk [vmem:[%s10120_s5] sm:$0xff] %vm1857_vm2, %v3799_v36  ;;  %v3869_v19 = vrot.slane %v9491_v60, %v9311_v9  ;;  %v3873_v20 = vmul.f32 %v9469_v53, %v9491_v60  ;;  %v3889_v0 = vrot.slane %v9491_v60, %v9313_v10  ;;  %v7897_v57 = vld [vmem:[%s10120_s5 + $0x30] sm:$0xff] }
 0x152   :  { %v8415_v17 = vpop.f32.mrf.mxu0  ;;  %7876 = vst.msk [vmem:[%s10119_s4 + $0x8] sm:$0xff] %vm1857_vm2, %v3816_v37  ;;  %7878 = vst.msk [vmem:[%s10120_s5 + $0x8] sm:$0xff] %vm1857_vm2, %v3819_v38  ;;  %v3893_v21 = vmul.f32 %v9473_v54, %v9491_v60  ;;  %v3909_v53 = vrot.slane %v9491_v60, %v9315_v11  ;;  %v3913_v54 = vmul.f32 %v9477_v63, %v9491_v60 }
 0x153   :  { %7880 = vst.msk [vmem:[%s10119_s4 + $0x10] sm:$0xff] %vm1857_vm2, %v3836_v7  ;;  %7882 = vst.msk [vmem:[%s10120_s5 + $0x10] sm:$0xff] %vm1857_vm2, %v3839_v13  ;;  %v3929_v30 = vrot.slane %v9491_v60, %v9317_v12  ;;  %v3933_v25 = vmul.f32 %v9481_v34, %v9491_v60  ;;  %v4545_v49 = vpop.f32.mrf.mxu1  ;;  %v3870_v27 = vmul.f32 %v3869_v19, %v9491_v60 }
 0x154   :  { %7884 = vst.msk [vmem:[%s10119_s4 + $0x18] sm:$0xff] %vm1857_vm2, %v3856_v14  ;;  %7886 = vst.msk [vmem:[%s10120_s5 + $0x18] sm:$0xff] %vm1857_vm2, %v3859_v15  ;;  %v4469_v26 = vpop.f32.mrf.mxu0  ;;  %v3872_v28 = vmul.f32 %v3869_v19, %v9457_v41  ;;  %v3890_v31 = vmul.f32 %v3889_v0, %v9491_v60  ;;  %v3892_v32 = vmul.f32 %v3889_v0, %v9457_v41 }
 0x155   :  { %v3910_v33 = vmul.f32 %v3909_v53, %v9491_v60  ;;  %v3912_v63 = vmul.f32 %v3909_v53, %v9457_v41  ;;  %v3930_v39 = vmul.f32 %v3929_v30, %v9491_v60  ;;  %v3932_v50 = vmul.f32 %v3929_v30, %v9457_v41  ;;  %v8430_v34 = vpop.f32.mrf.mxu1  ;;  %v7891_v41 = vld [vmem:[%s10119_s4 + $0x28] sm:$0xff] }
 0x156   :  { %v8425_v40 = vpop.f32.mrf.mxu0  ;;  %v3871_v42 = vadd.f32 %v3870_v27, %v9495_v61  ;;  %v3874_v43 = vsub.f32 %v3872_v28, %v3873_v20  ;;  %v3891_v45 = vadd.f32 %v3890_v31, %v9499_v62  ;;  %v3894_v8 = vsub.f32 %v3892_v32, %v3893_v21  ;;  %v7893_v60 = vld [vmem:[%s10120_s5 + $0x28] sm:$0xff] }
 0x157   :  { %v3911_v61 = vadd.f32 %v3910_v33, %v9503_v2  ;;  %v3914_v24 = vsub.f32 %v3912_v63, %v3913_v54  ;;  %v3931_v47 = vadd.f32 %v3930_v39, %v9507_v3  ;;  %v3934_v48 = vsub.f32 %v3932_v50, %v3933_v25  ;;  %v4693_v16 = vpop.f32.mrf.mxu1  ;;  %v7899_v2 = vld [vmem:[%s10119_s4 + $0x38] sm:$0xff] }
 0x158   :  { %v4619_v62 = vpop.f32.mrf.mxu0  ;;  %v3876_v35 = vadd.f32 %v7887_v23, %v3871_v42  ;;  %v3879_v36 = vadd.f32 %v7889_v44, %v3874_v43  ;;  %v3896_v37 = vadd.f32 %v7891_v41, %v3891_v45  ;;  %v3899_v38 = vadd.f32 %v7893_v60, %v3894_v8 }
 0x159   :  { %v3916_v3 = vadd.f32 %v7895_v46, %v3911_v61  ;;  %v3919_v59 = vadd.f32 %v7897_v57, %v3914_v24  ;;  %v3936_v7 = vadd.f32 %v7899_v2, %v3931_v47  ;;  %v3939_v13 = vadd.f32 %v7901_v58, %v3934_v48  ;;  %v8440_v15 = vpop.f32.mrf.mxu1 }
 0x15a   :  { %v8435_v14 = vpop.f32.mrf.mxu0  ;;  %7888 = vst.msk [vmem:[%s10119_s4 + $0x20] sm:$0xff] %vm1857_vm2, %v3876_v35  ;;  %7890 = vst.msk [vmem:[%s10120_s5 + $0x20] sm:$0xff] %vm1857_vm2, %v3879_v36  ;;  %v4546_v0 = vadd.f32 %v4545_v49, %v4469_v26  ;;  %v4097_v54 = vadd.f32 %v9486_v56, %v9484_v55 }
 0x15b   :  { %7892 = vst.msk [vmem:[%s10119_s4 + $0x28] sm:$0xff] %vm1857_vm2, %v3896_v37  ;;  %7894 = vst.msk [vmem:[%s10120_s5 + $0x28] sm:$0xff] %vm1857_vm2, %v3899_v38  ;;  %v4839_v18 = vpop.f32.mrf.mxu1 }
 0x15c   :  { %7896 = vst.msk [vmem:[%s10119_s4 + $0x30] sm:$0xff] %vm1857_vm2, %v3916_v3  ;;  %7898 = vst.msk [vmem:[%s10120_s5 + $0x30] sm:$0xff] %vm1857_vm2, %v3919_v59  ;;  %v4767_v17 = vpop.f32.mrf.mxu0  ;;  %v4620_v30 = vadd.f32 %v4619_v62, %v4546_v0  ;;  %v4171_v28 = vadd.f32 %v9521_v22, %v4097_v54 }
 0x15d   :  { %7900 = vst.msk [vmem:[%s10119_s4 + $0x38] sm:$0xff] %vm1857_vm2, %v3936_v7  ;;  %7902 = vst.msk [vmem:[%s10120_s5 + $0x38] sm:$0xff] %vm1857_vm2, %v3939_v13  ;;  %v8450_v20 = vpop.f32.mrf.mxu1 }
 0x15e   :  { %v8445_v19 = vpop.f32.mrf.mxu0  ;;  %v4694_v63 = vadd.f32 %v4693_v16, %v4620_v30  ;;  %v4245_v34 = vadd.f32 %v9523_v29, %v4171_v28 }
 0x15f   :  { %v4991_v53 = vpop.f32.mrf.mxu1 }
 0x160   :  { %v4915_v21 = vpop.f32.mrf.mxu0  ;;  %v4768_v42 = vadd.f32 %v4767_v17, %v4694_v63  ;;  %v4319_v56 = vadd.f32 %v9548_v51, %v4245_v34 }
 0x161   :  { %v8460_v27 = vpop.f32.mrf.mxu1  ;;  %v4992_v33 = vadd.f32 %v4991_v53, %v4915_v21 }
 0x162   :  { %v8455_v25 = vpop.f32.mrf.mxu0  ;;  %v4840_v8 = vadd.f32 %v4839_v18, %v4768_v42  ;;  %v4391_v24 = vadd.f32 %v9550_v52, %v4319_v56 }
 0x163   :  { %v5139_v32 = vpop.f32.mrf.mxu1 }
 0x164   :  { %v5065_v31 = vpop.f32.mrf.mxu0  ;;  %v9683_v48 = vsub.f32 %v4391_v24, %v4840_v8 }
 0x165   :  { %v8470_v50 = vpop.f32.mrf.mxu1  ;;  %v5066_v40 = vadd.f32 %v5065_v31, %v4992_v33 }
 0x166   :  { %v8465_v39 = vpop.f32.mrf.mxu0  ;;  %v5739_v38 = vrot.slane %v9683_v48, %v9303_v1  ;;  %v5759_v58 = vrot.slane %v9683_v48, %v9305_v5  ;;  %v5779_v52 = vrot.slane %v9683_v48, %v9307_v6  ;;  %v5799_v3 = vrot.slane %v9683_v48, %v9309_v4 }
 0x167   :  { %v5285_v49 = vpop.f32.mrf.mxu1  ;;  %v5140_v55 = vadd.f32 %v5139_v32, %v5066_v40  ;;  %v9695_v7 = vrot.slane %v9683_v48, %v9311_v9  ;;  %v9699_v13 = vrot.slane %v9683_v48, %v9313_v10  ;;  %v9703_v14 = vrot.slane %v9683_v48, %v9315_v11 }
 0x168   :  { %v5213_v26 = vpop.f32.mrf.mxu0  ;;  %v9707_v15 = vrot.slane %v9683_v48, %v9317_v12  ;;  %v5740_v20 = vmul.f32 %v5739_v38, %v9683_v48  ;;  %v5760_v53 = vmul.f32 %v5759_v58, %v9683_v48  ;;  %v5780_v54 = vmul.f32 %v5779_v52, %v9683_v48 }
 0x169   :  { %v8480_v23 = vpop.f32.mrf.mxu1  ;;  %v5214_v22 = vadd.f32 %v5213_v26, %v5140_v55  ;;  %v5800_v30 = vmul.f32 %v5799_v3, %v9683_v48  ;;  %v9721_v27 = vmul.f32 %v9695_v7, %v9683_v48  ;;  %v9725_v28 = vmul.f32 %v9699_v13, %v9683_v48 }
 0x16a   :  { %v8475_v43 = vpop.f32.mrf.mxu0  ;;  %v9729_v31 = vmul.f32 %v9703_v14, %v9683_v48  ;;  %v9733_v32 = vmul.f32 %v9707_v15, %v9683_v48 }
 0x16b   :  { %v5438_v45 = vpop.f32.mrf.mxu1  ;;  %v5286_v61 = vadd.f32 %v5285_v49, %v5214_v22 }
 0x16c   :  { %v5362_v44 = vpop.f32.mrf.mxu0 }
 0x16d   :  { %v8490_v60 = vpop.f32.mrf.mxu1  ;;  %v5363_v29 = vadd.f32 %v5362_v44, %v5286_v61 }
 0x16e   :  { %v8485_v41 = vpop.f32.mrf.mxu0 }
 0x16f   :  { %v5586_v47 = vpop.f32.mrf.mxu1  ;;  %v5439_v35 = vadd.f32 %v5438_v45, %v5363_v29 }
 0x170   :  { %v5512_v46 = vpop.f32.mrf.mxu0 }
 0x171   :  { %v8500_v16 = vpop.f32.mrf.mxu1  ;;  %v5513_v51 = vadd.f32 %v5512_v46, %v5439_v35 }
 0x172   :  { %v8495_v62 = vpop.f32.mrf.mxu0  ;;  %v5753_v16 = vld [vmem:[%s10120_s5] sm:$0xff] }
 0x173   :  { %v5732_v37 = vpop.f32.mrf.mxu1  ;;  %v5587_v59 = vadd.f32 %v5586_v47, %v5513_v51  ;;  %v5750_v62 = vld [vmem:[%s10119_s4] sm:$0xff]  ;;  %v7905_v51 = vld [vmem:[%s10120_s5 + $0x8] sm:$0xff] }
 0x174   :  { %v5660_v36 = vpop.f32.mrf.mxu0 }
 0x175   :  { %v8510_v2 = vpop.f32.mrf.mxu1  ;;  %v5661_v19 = vadd.f32 %v5660_v36, %v5587_v59 }
 0x176   :  { %v8505_v57 = vpop.f32.mrf.mxu0  ;;  %v7907_v2 = vld [vmem:[%s10119_s4 + $0x10] sm:$0xff] }
 0x177   :  { %v9711_v18 = vpop.f32.mrf.mxu1  ;;  %v9717_v25 = vadd.f32 %v5732_v37, %v5661_v19  ;;  %v7903_v37 = vld [vmem:[%s10119_s4 + $0x8] sm:$0xff] }
 0x178   :  { %v9709_v17 = vpop.f32.mrf.mxu0 }
 0x179   :  { %v8520_v21 = vpop.f32.mrf.mxu1  ;;  %v5744_v39 = vrot.slane %v9717_v25, %v9303_v1  ;;  %v5748_v50 = vmul.f32 %v5739_v38, %v9717_v25  ;;  %v5764_v40 = vrot.slane %v9717_v25, %v9305_v5  ;;  %v5768_v34 = vmul.f32 %v5759_v58, %v9717_v25 }
 0x17a   :  { %v8515_v0 = vpop.f32.mrf.mxu0  ;;  %v5784_v26 = vrot.slane %v9717_v25, %v9307_v6  ;;  %v5788_v49 = vmul.f32 %v5779_v52, %v9717_v25  ;;  %v5804_v42 = vrot.slane %v9717_v25, %v9309_v4  ;;  %v5808_v43 = vmul.f32 %v5799_v3, %v9717_v25 }
 0x17b   :  { %v9737_v63 = vpop.f32.mrf.mxu1  ;;  %v5745_v56 = vmul.f32 %v5744_v39, %v9717_v25  ;;  %v5747_v44 = vmul.f32 %v5744_v39, %v9683_v48  ;;  %v5765_v45 = vmul.f32 %v5764_v40, %v9717_v25  ;;  %v5767_v22 = vmul.f32 %v5764_v40, %v9683_v48  ;;  %v7913_v39 = vld [vmem:[%s10120_s5 + $0x18] sm:$0xff] }
 0x17c   :  { %v9735_v33 = vpop.f32.mrf.mxu0  ;;  %v5785_v8 = vmul.f32 %v5784_v26, %v9717_v25  ;;  %v5787_v41 = vmul.f32 %v5784_v26, %v9683_v48  ;;  %v5805_v60 = vmul.f32 %v5804_v42, %v9717_v25  ;;  %v5807_v61 = vmul.f32 %v5804_v42, %v9683_v48 }
 0x17d   :  { %v8530_v55 = vpop.f32.mrf.mxu1  ;;  %v5746_v47 = vadd.f32 %v5745_v56, %v5740_v20  ;;  %v5749_v29 = vsub.f32 %v5747_v44, %v5748_v50  ;;  %v5766_v35 = vadd.f32 %v5765_v45, %v5760_v53  ;;  %v5769_v36 = vsub.f32 %v5767_v22, %v5768_v34  ;;  %v7909_v53 = vld [vmem:[%s10120_s5 + $0x10] sm:$0xff] }
 0x17e   :  { %v8525_v23 = vpop.f32.mrf.mxu0  ;;  %v5786_v38 = vadd.f32 %v5785_v8, %v5780_v54  ;;  %v5789_v57 = vsub.f32 %v5787_v41, %v5788_v49  ;;  %v5806_v58 = vadd.f32 %v5805_v60, %v5800_v30  ;;  %v5809_v52 = vsub.f32 %v5807_v61, %v5808_v43  ;;  %v7911_v54 = vld [vmem:[%s10119_s4 + $0x18] sm:$0xff] }
 0x17f   :  { %v9761_v46 = vpop.f32.mrf.mxu1  ;;  %v5751_v19 = vadd.f32 %v5750_v62, %v5746_v47  ;;  %v5754_v20 = vadd.f32 %v5753_v16, %v5749_v29  ;;  %v5771_v0 = vadd.f32 %v7903_v37, %v5766_v35  ;;  %v5774_v21 = vadd.f32 %v7905_v51, %v5769_v36  ;;  %v7915_v37 = vld [vmem:[%s10119_s4 + $0x20] sm:$0xff] }
 0x180   :  { %v9759_v24 = vpop.f32.mrf.mxu0  ;;  %v5791_v30 = vadd.f32 %v7907_v2, %v5786_v38  ;;  %v5794_v50 = vadd.f32 %v7909_v53, %v5789_v57  ;;  %v5811_v40 = vadd.f32 %v7911_v54, %v5806_v58  ;;  %v5814_v34 = vadd.f32 %v7913_v39, %v5809_v52  ;;  %v7917_v51 = vld [vmem:[%s10120_s5 + $0x20] sm:$0xff]  ;;  %v7923_v58 = vld [vmem:[%s10119_s4 + $0x30] sm:$0xff]  ;;  %v7929_v54 = vld [vmem:[%s10120_s5 + $0x38] sm:$0xff] }
 0x181   :  { %v8540_v59 = vpop.f32.mrf.mxu1  ;;  %5752 = vst.msk [vmem:[%s10119_s4] sm:$0xff] %vm1857_vm2, %v5751_v19  ;;  %5755 = vst.msk [vmem:[%s10120_s5] sm:$0xff] %vm1857_vm2, %v5754_v20  ;;  %v5824_v42 = vrot.slane %v9717_v25, %v9311_v9  ;;  %v5828_v43 = vmul.f32 %v9695_v7, %v9717_v25  ;;  %v5844_v23 = vrot.slane %v9717_v25, %v9313_v10  ;;  %v7925_v53 = vld [vmem:[%s10120_s5 + $0x30] sm:$0xff] }
 0x182   :  { %v8535_v3 = vpop.f32.mrf.mxu0  ;;  %7904 = vst.msk [vmem:[%s10119_s4 + $0x8] sm:$0xff] %vm1857_vm2, %v5771_v0  ;;  %7906 = vst.msk [vmem:[%s10120_s5 + $0x8] sm:$0xff] %vm1857_vm2, %v5774_v21  ;;  %v5848_v55 = vmul.f32 %v9699_v13, %v9717_v25  ;;  %v5864_v7 = vrot.slane %v9717_v25, %v9315_v11  ;;  %v5868_v13 = vmul.f32 %v9703_v14, %v9717_v25 }
 0x183   :  { %v9789_v49 = vpop.f32.mrf.mxu1  ;;  %7908 = vst.msk [vmem:[%s10119_s4 + $0x10] sm:$0xff] %vm1857_vm2, %v5791_v30  ;;  %7910 = vst.msk [vmem:[%s10120_s5 + $0x10] sm:$0xff] %vm1857_vm2, %v5794_v50  ;;  %v5884_v56 = vrot.slane %v9717_v25, %v9317_v12  ;;  %v5888_v44 = vmul.f32 %v9707_v15, %v9717_v25  ;;  %v5825_v8 = vmul.f32 %v5824_v42, %v9717_v25 }
 0x184   :  { %v9787_v26 = vpop.f32.mrf.mxu0  ;;  %7912 = vst.msk [vmem:[%s10119_s4 + $0x18] sm:$0xff] %vm1857_vm2, %v5811_v40  ;;  %7914 = vst.msk [vmem:[%s10120_s5 + $0x18] sm:$0xff] %vm1857_vm2, %v5814_v34  ;;  %v5827_v41 = vmul.f32 %v5824_v42, %v9683_v48  ;;  %v5845_v60 = vmul.f32 %v5844_v23, %v9717_v25  ;;  %v5847_v61 = vmul.f32 %v5844_v23, %v9683_v48 }
 0x185   :  { %v8550_v22 = vpop.f32.mrf.mxu1  ;;  %v5865_v47 = vmul.f32 %v5864_v7, %v9717_v25  ;;  %v5867_v14 = vmul.f32 %v5864_v7, %v9683_v48  ;;  %v5885_v29 = vmul.f32 %v5884_v56, %v9717_v25  ;;  %v5887_v62 = vmul.f32 %v5884_v56, %v9683_v48  ;;  %v7919_v48 = vld [vmem:[%s10119_s4 + $0x28] sm:$0xff] }
 0x186   :  { %v8545_v45 = vpop.f32.mrf.mxu0  ;;  %v5826_v35 = vadd.f32 %v5825_v8, %v9721_v27  ;;  %v5829_v36 = vsub.f32 %v5827_v41, %v5828_v43  ;;  %v5846_v38 = vadd.f32 %v5845_v60, %v9725_v28  ;;  %v5849_v57 = vsub.f32 %v5847_v61, %v5848_v55  ;;  %v7921_v25 = vld [vmem:[%s10120_s5 + $0x28] sm:$0xff] }
 0x187   :  { %v6648_v15 = vpop.f32.mrf.mxu1  ;;  %v5866_v27 = vadd.f32 %v5865_v47, %v9729_v31  ;;  %v5869_v2 = vsub.f32 %v5867_v14, %v5868_v13  ;;  %v5886_v52 = vadd.f32 %v5885_v29, %v9733_v32  ;;  %v5889_v3 = vsub.f32 %v5887_v62, %v5888_v44  ;;  %v7927_v31 = vld [vmem:[%s10119_s4 + $0x38] sm:$0xff] }
 0x188   :  { %v6574_v16 = vpop.f32.mrf.mxu0  ;;  %v5831_v19 = vadd.f32 %v7915_v37, %v5826_v35  ;;  %v5834_v20 = vadd.f32 %v7917_v51, %v5829_v36  ;;  %v5851_v0 = vadd.f32 %v7919_v48, %v5846_v38  ;;  %v5854_v21 = vadd.f32 %v7921_v25, %v5849_v57 }
 0x189   :  { %v8560_v59 = vpop.f32.mrf.mxu1  ;;  %v5871_v32 = vadd.f32 %v7923_v58, %v5866_v27  ;;  %v5874_v39 = vadd.f32 %v7925_v53, %v5869_v2  ;;  %v5891_v30 = vadd.f32 %v7927_v31, %v5886_v52  ;;  %v5894_v50 = vadd.f32 %v7929_v54, %v5889_v3 }
 0x18a   :  { %v8555_v28 = vpop.f32.mrf.mxu0  ;;  %7916 = vst.msk [vmem:[%s10119_s4 + $0x20] sm:$0xff] %vm1857_vm2, %v5831_v19  ;;  %7918 = vst.msk [vmem:[%s10120_s5 + $0x20] sm:$0xff] %vm1857_vm2, %v5834_v20  ;;  %v6501_v23 = vadd.f32 %v9789_v49, %v9787_v26  ;;  %v6052_v13 = vadd.f32 %v9711_v18, %v9709_v17 }
 0x18b   :  { %v6794_v34 = vpop.f32.mrf.mxu1  ;;  %7920 = vst.msk [vmem:[%s10119_s4 + $0x28] sm:$0xff] %vm1857_vm2, %v5851_v0  ;;  %7922 = vst.msk [vmem:[%s10120_s5 + $0x28] sm:$0xff] %vm1857_vm2, %v5854_v21 }
 0x18c   :  { %v6722_v40 = vpop.f32.mrf.mxu0  ;;  %7924 = vst.msk [vmem:[%s10119_s4 + $0x30] sm:$0xff] %vm1857_vm2, %v5871_v32  ;;  %7926 = vst.msk [vmem:[%s10120_s5 + $0x30] sm:$0xff] %vm1857_vm2, %v5874_v39  ;;  %v6575_v56 = vadd.f32 %v6574_v16, %v6501_v23  ;;  %v6126_v8 = vadd.f32 %v9735_v33, %v6052_v13 }
 0x18d   :  { %7928 = vst.msk [vmem:[%s10119_s4 + $0x38] sm:$0xff] %vm1857_vm2, %v5891_v30  ;;  %7930 = vst.msk [vmem:[%s10120_s5 + $0x38] sm:$0xff] %vm1857_vm2, %v5894_v50  ;;  %v8570_v43 = vpop.f32.mrf.mxu1 }
 0x18e   :  { %v8565_v42 = vpop.f32.mrf.mxu0  ;;  %v6649_v47 = vadd.f32 %v6648_v15, %v6575_v56  ;;  %v6200_v62 = vadd.f32 %v9737_v63, %v6126_v8 }
 0x18f   :  { %v6946_v7 = vpop.f32.mrf.mxu1 }
 0x190   :  { %v6870_v55 = vpop.f32.mrf.mxu0  ;;  %v6723_v36 = vadd.f32 %v6722_v40, %v6649_v47  ;;  %v6274_v18 = vadd.f32 %v9759_v24, %v6200_v62 }
 0x191   :  { %v8580_v45 = vpop.f32.mrf.mxu1  ;;  %v6947_v22 = vadd.f32 %v6946_v7, %v6870_v55 }
 0x192   :  { %v8575_v44 = vpop.f32.mrf.mxu0  ;;  %v6795_v33 = vadd.f32 %v6794_v34, %v6723_v36  ;;  %v6346_v15 = vadd.f32 %v9761_v46, %v6274_v18 }
 0x193   :  { %v7094_v60 = vpop.f32.mrf.mxu1 }
 0x194   :  { %v7020_v41 = vpop.f32.mrf.mxu0  ;;  %v9915_v58 = vsub.f32 %v6346_v15, %v6795_v33 }
 0x195   :  { %v7021_v61 = vadd.f32 %v7020_v41, %v6947_v22  ;;  %v8590_v29 = vpop.f32.mrf.mxu1 }
 0x196   :  { %v8585_v14 = vpop.f32.mrf.mxu0  ;;  %v7694_v20 = vrot.slane %v9915_v58, %v9303_v1  ;;  %v7714_v53 = vrot.slane %v9915_v58, %v9305_v5  ;;  %v7734_v46 = vrot.slane %v9915_v58, %v9307_v6  ;;  %v7754_v31 = vrot.slane %v9915_v58, %v9309_v4 }
 0x197   :  { %v7240_v49 = vpop.f32.mrf.mxu1  ;;  %v7095_v35 = vadd.f32 %v7094_v60, %v7021_v61  ;;  %v7774_v32 = vrot.slane %v9915_v58, %v9311_v9  ;;  %v7794_v39 = vrot.slane %v9915_v58, %v9313_v10  ;;  %v9931_v30 = vrot.slane %v9915_v58, %v9315_v11 }
 0x198   :  { %v7168_v26 = vpop.f32.mrf.mxu0  ;;  %v9935_v50 = vrot.slane %v9915_v58, %v9317_v12  ;;  %v7695_v34 = vmul.f32 %v7694_v20, %v9915_v58  ;;  %v7715_v42 = vmul.f32 %v7714_v53, %v9915_v58  ;;  %v7735_v43 = vmul.f32 %v7734_v46, %v9915_v58 }
 0x199   :  { %v8600_v17 = vpop.f32.mrf.mxu1  ;;  %v7169_v38 = vadd.f32 %v7168_v26, %v7095_v35  ;;  %v7755_v23 = vmul.f32 %v7754_v31, %v9915_v58  ;;  %v9944_v7 = vmul.f32 %v7774_v32, %v9915_v58  ;;  %v9947_v13 = vmul.f32 %v7794_v39, %v9915_v58 }
 0x19a   :  { %v8595_v37 = vpop.f32.mrf.mxu0  ;;  %v9951_v56 = vmul.f32 %v9931_v30, %v9915_v58  ;;  %v9955_v44 = vmul.f32 %v9935_v50, %v9915_v58  ;;  %v7708_v17 = vld [vmem:[%s10120_s5] sm:$0xff] }
 0x19b   :  { %v7393_v51 = vpop.f32.mrf.mxu1  ;;  %v7241_v25 = vadd.f32 %v7240_v49, %v7169_v38  ;;  %v7705_v37 = vld [vmem:[%s10119_s4] sm:$0xff]  ;;  %v7933_v38 = vld [vmem:[%s10120_s5 + $0x8] sm:$0xff] }
 0x19c   :  { %v7317_v16 = vpop.f32.mrf.mxu0 }
 0x19d   :  { %v8610_v48 = vpop.f32.mrf.mxu1  ;;  %v7318_v63 = vadd.f32 %v7317_v16, %v7241_v25 }
 0x19e   :  { %v8605_v57 = vpop.f32.mrf.mxu0  ;;  %v7935_v48 = vld [vmem:[%s10119_s4 + $0x10] sm:$0xff] }
 0x19f   :  { %v7541_v2 = vpop.f32.mrf.mxu1  ;;  %v7394_v28 = vadd.f32 %v7393_v51, %v7318_v63  ;;  %v7931_v51 = vld [vmem:[%s10119_s4 + $0x8] sm:$0xff] }
 0x1a0   :  { %v7467_v27 = vpop.f32.mrf.mxu0 }
 0x1a1   :  { %v8620_v3 = vpop.f32.mrf.mxu1  ;;  %v7468_v24 = vadd.f32 %v7467_v27, %v7394_v28  ;;  %v7939_v28 = vld [vmem:[%s10119_s4 + $0x18] sm:$0xff] }
 0x1a2   :  { %v8615_v52 = vpop.f32.mrf.mxu0  ;;  %v7937_v3 = vld [vmem:[%s10120_s5 + $0x10] sm:$0xff] }
 0x1a3   :  { %v7687_v19 = vpop.f32.mrf.mxu1  ;;  %v7542_v54 = vadd.f32 %v7541_v2, %v7468_v24 }
 0x1a4   :  { %v7615_v59 = vpop.f32.mrf.mxu0 }
 0x1a5   :  { %v8630_v21 = vpop.f32.mrf.mxu1  ;;  %v7616_v40 = vadd.f32 %v7615_v59, %v7542_v54  ;;  %v7941_v59 = vld [vmem:[%s10120_s5 + $0x18] sm:$0xff] }
 0x1a6   :  { %v8625_v0 = vpop.f32.mrf.mxu0 }
 0x1a7   :  { %v9941_v55 = vadd.f32 %v7687_v19, %v7616_v40 }
 0x1a9   :  { %v7699_v45 = vrot.slane %v9941_v55, %v9303_v1  ;;  %v7703_v22 = vmul.f32 %v7694_v20, %v9941_v55  ;;  %v7719_v8 = vrot.slane %v9941_v55, %v9305_v5  ;;  %v7723_v41 = vmul.f32 %v7714_v53, %v9941_v55 }
 0x1aa   :  { %v7739_v60 = vrot.slane %v9941_v55, %v9307_v6  ;;  %v7743_v61 = vmul.f32 %v7734_v46, %v9941_v55  ;;  %v7759_v47 = vrot.slane %v9941_v55, %v9309_v4  ;;  %v7763_v14 = vmul.f32 %v7754_v31, %v9941_v55 }
 0x1ab   :  { %v7700_v29 = vmul.f32 %v7699_v45, %v9941_v55  ;;  %v7702_v1 = vmul.f32 %v7699_v45, %v9915_v58  ;;  %v7720_v62 = vmul.f32 %v7719_v8, %v9941_v55  ;;  %v7722_v5 = vmul.f32 %v7719_v8, %v9915_v58 }
 0x1ac   :  { %v7740_v26 = vmul.f32 %v7739_v60, %v9941_v55  ;;  %v7742_v49 = vmul.f32 %v7739_v60, %v9915_v58  ;;  %v7760_v6 = vmul.f32 %v7759_v47, %v9941_v55  ;;  %v7762_v35 = vmul.f32 %v7759_v47, %v9915_v58 }
 0x1ad   :  { %v7701_v36 = vadd.f32 %v7700_v29, %v7695_v34  ;;  %v7704_v4 = vsub.f32 %v7702_v1, %v7703_v22  ;;  %v7721_v18 = vadd.f32 %v7720_v62, %v7715_v42  ;;  %v7724_v16 = vsub.f32 %v7722_v5, %v7723_v41  ;;  %v7945_v22 = vld [vmem:[%s10120_s5 + $0x20] sm:$0xff]  ;;  %v7953_v5 = vld [vmem:[%s10120_s5 + $0x30] sm:$0xff] }
 0x1ae   :  { %v7741_v33 = vadd.f32 %v7740_v26, %v7735_v43  ;;  %v7744_v57 = vsub.f32 %v7742_v49, %v7743_v61  ;;  %v7761_v25 = vadd.f32 %v7760_v6, %v7755_v23  ;;  %v7764_v15 = vsub.f32 %v7762_v35, %v7763_v14  ;;  %v7951_v61 = vld [vmem:[%s10119_s4 + $0x30] sm:$0xff]  ;;  %v7957_v26 = vld [vmem:[%s10120_s5 + $0x38] sm:$0xff] }
 0x1af   :  { %v7706_v27 = vadd.f32 %v7705_v37, %v7701_v36  ;;  %v7709_v2 = vadd.f32 %v7708_v17, %v7704_v4  ;;  %v7726_v63 = vadd.f32 %v7931_v51, %v7721_v18  ;;  %v7729_v52 = vadd.f32 %v7933_v38, %v7724_v16 }
 0x1b0   :  { %v7746_v19 = vadd.f32 %v7935_v48, %v7741_v33  ;;  %v7749_v24 = vadd.f32 %v7937_v3, %v7744_v57  ;;  %v7766_v20 = vadd.f32 %v7939_v28, %v7761_v25  ;;  %v7769_v0 = vadd.f32 %v7941_v59, %v7764_v15 }
 0x1b1   :  { %7707 = vst.msk [vmem:[%s10119_s4] sm:$0xff] %vm1857_vm2, %v7706_v27  ;;  %7710 = vst.msk [vmem:[%s10120_s5] sm:$0xff] %vm1857_vm2, %v7709_v2  ;;  %v7779_v21 = vrot.slane %v9941_v55, %v9311_v9  ;;  %v7783_v53 = vmul.f32 %v7774_v32, %v9941_v55  ;;  %v7799_v46 = vrot.slane %v9941_v55, %v9313_v10 }
 0x1b2   :  { %7932 = vst.msk [vmem:[%s10119_s4 + $0x8] sm:$0xff] %vm1857_vm2, %v7726_v63  ;;  %7934 = vst.msk [vmem:[%s10120_s5 + $0x8] sm:$0xff] %vm1857_vm2, %v7729_v52  ;;  %v7803_v31 = vmul.f32 %v7794_v39, %v9941_v55  ;;  %v7819_v9 = vrot.slane %v9941_v55, %v9315_v11  ;;  %v7823_v10 = vmul.f32 %v9931_v30, %v9941_v55 }
 0x1b3   :  { %7936 = vst.msk [vmem:[%s10119_s4 + $0x10] sm:$0xff] %vm1857_vm2, %v7746_v19  ;;  %7938 = vst.msk [vmem:[%s10120_s5 + $0x10] sm:$0xff] %vm1857_vm2, %v7749_v24  ;;  %v7839_v54 = vrot.slane %v9941_v55, %v9317_v12  ;;  %v7843_v32 = vmul.f32 %v9935_v50, %v9941_v55  ;;  %v7780_v39 = vmul.f32 %v7779_v21, %v9941_v55  ;;  %v7943_v50 = vld [vmem:[%s10119_s4 + $0x20] sm:$0xff] }
 0x1b4   :  { %7940 = vst.msk [vmem:[%s10119_s4 + $0x18] sm:$0xff] %vm1857_vm2, %v7766_v20  ;;  %7942 = vst.msk [vmem:[%s10120_s5 + $0x18] sm:$0xff] %vm1857_vm2, %v7769_v0  ;;  %v7782_v40 = vmul.f32 %v7779_v21, %v9915_v58  ;;  %v7800_v34 = vmul.f32 %v7799_v46, %v9941_v55  ;;  %v7802_v42 = vmul.f32 %v7799_v46, %v9915_v58 }
 0x1b5   :  { %v7820_v43 = vmul.f32 %v7819_v9, %v9941_v55  ;;  %v7822_v11 = vmul.f32 %v7819_v9, %v9915_v58  ;;  %v7840_v30 = vmul.f32 %v7839_v54, %v9941_v55  ;;  %v7842_v23 = vmul.f32 %v7839_v54, %v9915_v58  ;;  %v7947_v55 = vld [vmem:[%s10119_s4 + $0x28] sm:$0xff] }
 0x1b6   :  { %v7781_v12 = vadd.f32 %v7780_v39, %v9944_v7  ;;  %v7784_v45 = vsub.f32 %v7782_v40, %v7783_v53  ;;  %v7801_v8 = vadd.f32 %v7800_v34, %v9947_v13  ;;  %v7804_v41 = vsub.f32 %v7802_v42, %v7803_v31  ;;  %v7949_v58 = vld [vmem:[%s10120_s5 + $0x28] sm:$0xff] }
 0x1b7   :  { %v7821_v7 = vadd.f32 %v7820_v43, %v9951_v56  ;;  %v7824_v60 = vsub.f32 %v7822_v11, %v7823_v10  ;;  %v7841_v47 = vadd.f32 %v7840_v30, %v9955_v44  ;;  %v7844_v14 = vsub.f32 %v7842_v23, %v7843_v32  ;;  %v7955_v56 = vld [vmem:[%s10119_s4 + $0x38] sm:$0xff] }
 0x1b8   :  { %v7786_v13 = vadd.f32 %v7943_v50, %v7781_v12  ;;  %v7789_v29 = vadd.f32 %v7945_v22, %v7784_v45  ;;  %v7806_v1 = vadd.f32 %v7947_v55, %v7801_v8  ;;  %v7809_v62 = vadd.f32 %v7949_v58, %v7804_v41 }
 0x1b9   :  { %v7826_v49 = vadd.f32 %v7951_v61, %v7821_v7  ;;  %v7829_v6 = vadd.f32 %v7953_v5, %v7824_v60  ;;  %v7846_v44 = vadd.f32 %v7955_v56, %v7841_v47  ;;  %v7849_v35 = vadd.f32 %v7957_v26, %v7844_v14 }
 0x1ba   :  { %7944 = vst.msk [vmem:[%s10119_s4 + $0x20] sm:$0xff] %vm1857_vm2, %v7786_v13  ;;  %7946 = vst.msk [vmem:[%s10120_s5 + $0x20] sm:$0xff] %vm1857_vm2, %v7789_v29 }
 0x1bb   :  { %7948 = vst.msk [vmem:[%s10119_s4 + $0x28] sm:$0xff] %vm1857_vm2, %v7806_v1  ;;  %7950 = vst.msk [vmem:[%s10120_s5 + $0x28] sm:$0xff] %vm1857_vm2, %v7809_v62 }
 0x1bc   :  { %7952 = vst.msk [vmem:[%s10119_s4 + $0x30] sm:$0xff] %vm1857_vm2, %v7826_v49  ;;  %7954 = vst.msk [vmem:[%s10120_s5 + $0x30] sm:$0xff] %vm1857_vm2, %v7829_v6 }
 0x1bd   :  { %7956 = vst.msk [vmem:[%s10119_s4 + $0x38] sm:$0xff] %vm1857_vm2, %v7846_v44  ;;  %7958 = vst.msk [vmem:[%s10120_s5 + $0x38] sm:$0xff] %vm1857_vm2, %v7849_v35 }
 0x1be   :  { %7859 = vsyncpa [#allocation3], 1 }
 0x1bf   :  { %7860 = vsyncpa [#allocation5], 1 }

</bundles_post_ra>
